<compile_context>
chip_gen: v5e
topology: v5e:2x2
jax: 0.10.0
libtpu: 0.0.40
codegen_flags: <defaults>
</compile_context>

<pallas_src>
import jax
import jax.numpy as jnp
from jax.experimental import pallas as pl
from jax.experimental.pallas import tpu as pltpu

IN_FEATURES = 784


def _round_up(n, m):
    return ((n + m - 1) // m) * m


def _mlp_kernel(x_ref,
                w1_ref, b1_ref,
                w2_ref, b2_ref,
                w3_ref, b3_ref,
                w4_ref, b4_ref,
                o_ref):
    # Cast the f32 input tile to bf16 in-kernel (cheap VPU pack) so every dot
    # uses the native bf16 MXU path with f32 accumulation.
    x = x_ref[...].astype(jnp.bfloat16)

    # Layer 1: Linear(784 -> 1024) + ReLU   (Dropout(p=0.3) = identity / eval)
    h = jnp.dot(x, w1_ref[...],
                preferred_element_type=jnp.float32) + b1_ref[...]
    h = jnp.maximum(h, 0.0)

    # Layer 2: Linear(1024 -> 512) + ReLU   (Dropout = identity)
    h = jnp.dot(h.astype(jnp.bfloat16), w2_ref[...],
                preferred_element_type=jnp.float32) + b2_ref[...]
    h = jnp.maximum(h, 0.0)

    # Layer 3: Linear(512 -> 256) + ReLU    (Dropout = identity)
    h = jnp.dot(h.astype(jnp.bfloat16), w3_ref[...],
                preferred_element_type=jnp.float32) + b3_ref[...]
    h = jnp.maximum(h, 0.0)

    # Layer 4: Linear(256 -> 1) + Sigmoid, on the VPU as a lane reduction
    # (avoids an N=1 MXU matmul that would use 1/256 of the MXU columns).
    logits = jnp.sum(h * w4_ref[...].astype(jnp.float32),
                     axis=-1, keepdims=True) + b4_ref[...]
    o_ref[...] = jax.nn.sigmoid(logits)


def prepare_params(params):
    """One-time conversion of f32 params into kernel layout/dtype.

    Hoisted out of the forward pass so the bf16 casts / transposes are not
    re-run on every call (they read ~13 MB and write ~6.5 MB per call if left
    in the wrapper).
    """
    return {
        "w1": params["w1"].astype(jnp.bfloat16),    # (784, 1024)
        "w2": params["w2"].astype(jnp.bfloat16),    # (1024, 512)
        "w3": params["w3"].astype(jnp.bfloat16),    # (512, 256)
        "w4": params["w4"].T.astype(jnp.bfloat16),  # (1, 256) lane row
        "b1": params["b1"].astype(jnp.float32),     # (1, 1024)
        "b2": params["b2"].astype(jnp.float32),     # (1, 512)
        "b3": params["b3"].astype(jnp.float32),     # (1, 256)
        "b4": params["b4"].astype(jnp.float32),     # (1, 1)
    }


def my_discriminator_forward(x, kparams, *, tm=512):
    """x: (B, 784) f32; kparams: output of prepare_params()."""
    B = x.shape[0]
    assert x.shape[1] == IN_FEATURES, x.shape
    x = x.astype(jnp.float32)

    # Minimal batch pad: only up to a multiple of 8 (sublane alignment).
    Bp = _round_up(B, 8)
    if Bp != B:
        x = jnp.pad(x, ((0, Bp - B), (0, 0)))

    # Batch tile: at most tm rows per grid step; the grid uses cdiv so the
    # last tile may be partial (Pallas masks its writeback), avoiding up-to-2x
    # batch-pad waste. Rows >= B are sliced off at the end.
    tm_eff = min(_round_up(tm, 8), Bp)
    grid = (pl.cdiv(Bp, tm_eff),)

    def resident(arr):
        # Whole array as one VMEM block; constant index_map -> fetched once,
        # single-buffered (no second pipeline buffer / extra local copy).
        return pl.BlockSpec(arr.shape, lambda i: (0,) * arr.ndim,
                            pipeline_mode=pl.Buffered(1))

    w1, w2, w3, w4 = kparams["w1"], kparams["w2"], kparams["w3"], kparams["w4"]
    b1, b2, b3, b4 = kparams["b1"], kparams["b2"], kparams["b3"], kparams["b4"]

    out = pl.pallas_call(
        _mlp_kernel,
        out_shape=jax.ShapeDtypeStruct((Bp, 1), jnp.float32),
        grid=grid,
        in_specs=[
            pl.BlockSpec((tm_eff, IN_FEATURES), lambda i: (i, 0)),
            resident(w1), resident(b1),
            resident(w2), resident(b2),
            resident(w3), resident(b3),
            resident(w4), resident(b4),
        ],
        out_specs=pl.BlockSpec((tm_eff, 1), lambda i: (i, 0)),
        compiler_params=pltpu.CompilerParams(
            dimension_semantics=("parallel",),
            vmem_limit_bytes=32 * 1024 * 1024,
        ),
    )(x, w1, b1, w2, b2, w3, b3, w4, b4)
    return out[:B]


def init_params(key):
    """Deterministic init matching PyTorch nn.Linear defaults
    (uniform bound = 1/sqrt(fan_in) for W and b). Weights stored (in, out)."""
    dims = [(784, 1024), (1024, 512), (512, 256), (256, 1)]
    params = {}
    for i, (fan_in, fan_out) in enumerate(dims, start=1):
        key, kw, kb = jax.random.split(key, 3)
        bound = 1.0 / (float(fan_in) ** 0.5)
        params[f"w{i}"] = jax.random.uniform(
            kw, (fan_in, fan_out), jnp.float32, -bound, bound)
        params[f"b{i}"] = jax.random.uniform(
            kb, (1, fan_out), jnp.float32, -bound, bound)
    return params


def _reference_forward(x, params):
    """Pure-JAX reference using the same bf16 operand rounding as the kernel."""
    def lin(h, w, b):
        return jnp.dot(h.astype(jnp.bfloat16), w.astype(jnp.bfloat16),
                       preferred_element_type=jnp.float32) + b
    h = jnp.maximum(lin(x, params["w1"], params["b1"]), 0.0)
    h = jnp.maximum(lin(h, params["w2"], params["b2"]), 0.0)
    h = jnp.maximum(lin(h, params["w3"], params["b3"]), 0.0)
    return jax.nn.sigmoid(lin(h, params["w4"], params["b4"]))


if __name__ == "__main__":
    key = jax.random.PRNGKey(0)
    key, kx = jax.random.split(key)

    B = 8
    x = jax.random.normal(kx, (B, IN_FEATURES), jnp.float32)
    params = init_params(key)

    # One-time weight layout/dtype conversion (kept out of the forward call).
    kparams = jax.block_until_ready(prepare_params(params))

    out = jax.block_until_ready(my_discriminator_forward(x, kparams))
    ref = _reference_forward(x, params)

    assert out.shape == (B, 1), out.shape
    err = float(jnp.max(jnp.abs(out - ref)))
    assert err < 2e-2, f"max abs err {err}"

    print("KERNEL_OK")
</pallas_src>

<mosaic_0001>
module attributes {stable_mosaic.version = 11 : i64} {
  func.func @_mlp_kernel(%arg0: i32, %arg1: memref<8x784xf32, #tpu.memory_space<vmem>>, %arg2: memref<784x1024xbf16, #tpu.memory_space<vmem>>, %arg3: memref<1x1024xf32, #tpu.memory_space<vmem>>, %arg4: memref<1024x512xbf16, #tpu.memory_space<vmem>>, %arg5: memref<1x512xf32, #tpu.memory_space<vmem>>, %arg6: memref<512x256xbf16, #tpu.memory_space<vmem>>, %arg7: memref<1x256xf32, #tpu.memory_space<vmem>>, %arg8: memref<1x256xbf16, #tpu.memory_space<vmem>>, %arg9: memref<1x1xf32, #tpu.memory_space<vmem>>, %arg10: memref<8x1xf32, #tpu.memory_space<vmem>>) attributes {dimension_semantics = [#tpu.dimension_semantics<parallel>], iteration_bounds = array<i64: 1>, scalar_prefetch = 0 : i64, scratch_operands = 0 : i64, tpu.core_type = #tpu.core_type<tc>, window_params = [{transform_indices = @transform_0, window_bounds = array<i64: 8, 784>}, {pipeline_mode = #tpu.pipeline_mode<synchronous>, transform_indices = @transform_1, window_bounds = array<i64: 784, 1024>}, {pipeline_mode = #tpu.pipeline_mode<synchronous>, transform_indices = @transform_2, window_bounds = array<i64: 1, 1024>}, {pipeline_mode = #tpu.pipeline_mode<synchronous>, transform_indices = @transform_3, window_bounds = array<i64: 1024, 512>}, {pipeline_mode = #tpu.pipeline_mode<synchronous>, transform_indices = @transform_4, window_bounds = array<i64: 1, 512>}, {pipeline_mode = #tpu.pipeline_mode<synchronous>, transform_indices = @transform_5, window_bounds = array<i64: 512, 256>}, {pipeline_mode = #tpu.pipeline_mode<synchronous>, transform_indices = @transform_6, window_bounds = array<i64: 1, 256>}, {pipeline_mode = #tpu.pipeline_mode<synchronous>, transform_indices = @transform_7, window_bounds = array<i64: 1, 256>}, {pipeline_mode = #tpu.pipeline_mode<synchronous>, transform_indices = @transform_8, window_bounds = array<i64: 1, 1>}, {transform_indices = @transform_9, window_bounds = array<i64: 8, 1>}]} {
    %c0 = arith.constant 0 : index
    %c0_0 = arith.constant 0 : index
    %0 = vector.load %arg1[%c0, %c0_0] : memref<8x784xf32, #tpu.memory_space<vmem>>, vector<8x784xf32>
    %1 = arith.truncf %0 : vector<8x784xf32> to vector<8x784xbf16>
    %c0_1 = arith.constant 0 : index
    %c0_2 = arith.constant 0 : index
    %2 = vector.load %arg2[%c0_1, %c0_2] : memref<784x1024xbf16, #tpu.memory_space<vmem>>, vector<784x1024xbf16>
    %cst = arith.constant dense<0.000000e+00> : vector<8x1024xf32>
    %3 = tpu.matmul %1, %2, %cst {dimension_numbers = #tpu.dot_dimension_numbers<[1], [0], [0], [1], [0, 0, 1, 1], [], []>} : vector<8x784xbf16>, vector<784x1024xbf16>, vector<8x1024xf32> -> vector<8x1024xf32>
    %c0_3 = arith.constant 0 : index
    %c0_4 = arith.constant 0 : index
    %4 = vector.load %arg3[%c0_3, %c0_4] : memref<1x1024xf32, #tpu.memory_space<vmem>>, vector<1x1024xf32>
    %5 = vector.broadcast %4 : vector<1x1024xf32> to vector<8x1024xf32>
    %6 = arith.addf %3, %5 : vector<8x1024xf32>
    %cst_5 = arith.constant 0.000000e+00 : f32
    %7 = vector.broadcast %cst_5 : f32 to vector<8x1024xf32>
    %8 = arith.maximumf %6, %7 : vector<8x1024xf32>
    %9 = arith.truncf %8 : vector<8x1024xf32> to vector<8x1024xbf16>
    %c0_6 = arith.constant 0 : index
    %c0_7 = arith.constant 0 : index
    %10 = vector.load %arg4[%c0_6, %c0_7] : memref<1024x512xbf16, #tpu.memory_space<vmem>>, vector<1024x512xbf16>
    %cst_8 = arith.constant dense<0.000000e+00> : vector<8x512xf32>
    %11 = tpu.matmul %9, %10, %cst_8 {dimension_numbers = #tpu.dot_dimension_numbers<[1], [0], [0], [1], [0, 0, 1, 1], [], []>} : vector<8x1024xbf16>, vector<1024x512xbf16>, vector<8x512xf32> -> vector<8x512xf32>
    %c0_9 = arith.constant 0 : index
    %c0_10 = arith.constant 0 : index
    %12 = vector.load %arg5[%c0_9, %c0_10] : memref<1x512xf32, #tpu.memory_space<vmem>>, vector<1x512xf32>
    %13 = vector.broadcast %12 : vector<1x512xf32> to vector<8x512xf32>
    %14 = arith.addf %11, %13 : vector<8x512xf32>
    %cst_11 = arith.constant 0.000000e+00 : f32
    %15 = vector.broadcast %cst_11 : f32 to vector<8x512xf32>
    %16 = arith.maximumf %14, %15 : vector<8x512xf32>
    %17 = arith.truncf %16 : vector<8x512xf32> to vector<8x512xbf16>
    %c0_12 = arith.constant 0 : index
    %c0_13 = arith.constant 0 : index
    %18 = vector.load %arg6[%c0_12, %c0_13] : memref<512x256xbf16, #tpu.memory_space<vmem>>, vector<512x256xbf16>
    %cst_14 = arith.constant dense<0.000000e+00> : vector<8x256xf32>
    %19 = tpu.matmul %17, %18, %cst_14 {dimension_numbers = #tpu.dot_dimension_numbers<[1], [0], [0], [1], [0, 0, 1, 1], [], []>} : vector<8x512xbf16>, vector<512x256xbf16>, vector<8x256xf32> -> vector<8x256xf32>
    %c0_15 = arith.constant 0 : index
    %c0_16 = arith.constant 0 : index
    %20 = vector.load %arg7[%c0_15, %c0_16] : memref<1x256xf32, #tpu.memory_space<vmem>>, vector<1x256xf32>
    %21 = vector.broadcast %20 : vector<1x256xf32> to vector<8x256xf32>
    %22 = arith.addf %19, %21 : vector<8x256xf32>
    %cst_17 = arith.constant 0.000000e+00 : f32
    %23 = vector.broadcast %cst_17 : f32 to vector<8x256xf32>
    %24 = arith.maximumf %22, %23 : vector<8x256xf32>
    %c0_18 = arith.constant 0 : index
    %c0_19 = arith.constant 0 : index
    %25 = vector.load %arg8[%c0_18, %c0_19] : memref<1x256xbf16, #tpu.memory_space<vmem>>, vector<1x256xbf16>
    %26 = arith.extf %25 : vector<1x256xbf16> to vector<1x256xf32>
    %27 = vector.broadcast %26 : vector<1x256xf32> to vector<8x256xf32>
    %28 = arith.mulf %24, %27 : vector<8x256xf32>
    %cst_20 = arith.constant dense<0.000000e+00> : vector<8xf32>
    %29 = vector.multi_reduction <add>, %28, %cst_20 [1] : vector<8x256xf32> to vector<8xf32>
    %30 = vector.shape_cast %29 : vector<8xf32> to vector<8x1xf32>
    %c0_21 = arith.constant 0 : index
    %c0_22 = arith.constant 0 : index
    %31 = vector.load %arg9[%c0_21, %c0_22] : memref<1x1xf32, #tpu.memory_space<vmem>>, vector<1x1xf32>
    %32 = vector.broadcast %31 : vector<1x1xf32> to vector<8x1xf32>
    %33 = arith.addf %30, %32 : vector<8x1xf32>
    %34 = arith.negf %33 : vector<8x1xf32>
    %35 = math.exp %34 : vector<8x1xf32>
    %cst_23 = arith.constant 1.000000e+00 : f32
    %36 = vector.broadcast %cst_23 : f32 to vector<8x1xf32>
    %37 = arith.addf %36, %35 : vector<8x1xf32>
    %38 = arith.divf %36, %37 : vector<8x1xf32>
    %c0_24 = arith.constant 0 : index
    %c0_25 = arith.constant 0 : index
    %39 = vector.load %arg10[%c0_24, %c0_25] : memref<8x1xf32, #tpu.memory_space<vmem>>, vector<8x1xf32>
    tpu.vector_store %arg10[%c0_24, %c0_25], %38 {strides = array<i32>} : memref<8x1xf32, #tpu.memory_space<vmem>>, vector<8x1xf32>,
    return
  }
  func.func @transform_0(%arg0: i32) -> (i32, i32) {
    %c0_i32 = arith.constant 0 : i32
    %c0_i32_0 = arith.constant 0 : i32
    return %arg0, %c0_i32 : i32, i32
  }
  func.func @transform_1(%arg0: i32) -> (i32, i32) {
    %c0_i32 = arith.constant 0 : i32
    %c0_i32_0 = arith.constant 0 : i32
    %c0_i32_1 = arith.constant 0 : i32
    return %c0_i32, %c0_i32_0 : i32, i32
  }
  func.func @transform_2(%arg0: i32) -> (i32, i32) {
    %c0_i32 = arith.constant 0 : i32
    %c0_i32_0 = arith.constant 0 : i32
    %c0_i32_1 = arith.constant 0 : i32
    return %c0_i32, %c0_i32_0 : i32, i32
  }
  func.func @transform_3(%arg0: i32) -> (i32, i32) {
    %c0_i32 = arith.constant 0 : i32
    %c0_i32_0 = arith.constant 0 : i32
    %c0_i32_1 = arith.constant 0 : i32
    return %c0_i32, %c0_i32_0 : i32, i32
  }
  func.func @transform_4(%arg0: i32) -> (i32, i32) {
    %c0_i32 = arith.constant 0 : i32
    %c0_i32_0 = arith.constant 0 : i32
    %c0_i32_1 = arith.constant 0 : i32
    return %c0_i32, %c0_i32_0 : i32, i32
  }
  func.func @transform_5(%arg0: i32) -> (i32, i32) {
    %c0_i32 = arith.constant 0 : i32
    %c0_i32_0 = arith.constant 0 : i32
    %c0_i32_1 = arith.constant 0 : i32
    return %c0_i32, %c0_i32_0 : i32, i32
  }
  func.func @transform_6(%arg0: i32) -> (i32, i32) {
    %c0_i32 = arith.constant 0 : i32
    %c0_i32_0 = arith.constant 0 : i32
    %c0_i32_1 = arith.constant 0 : i32
    return %c0_i32, %c0_i32_0 : i32, i32
  }
  func.func @transform_7(%arg0: i32) -> (i32, i32) {
    %c0_i32 = arith.constant 0 : i32
    %c0_i32_0 = arith.constant 0 : i32
    %c0_i32_1 = arith.constant 0 : i32
    return %c0_i32, %c0_i32_0 : i32, i32
  }
  func.func @transform_8(%arg0: i32) -> (i32, i32) {
    %c0_i32 = arith.constant 0 : i32
    %c0_i32_0 = arith.constant 0 : i32
    %c0_i32_1 = arith.constant 0 : i32
    return %c0_i32, %c0_i32_0 : i32, i32
  }
  func.func @transform_9(%arg0: i32) -> (i32, i32) {
    %c0_i32 = arith.constant 0 : i32
    %c0_i32_0 = arith.constant 0 : i32
    return %arg0, %c0_i32 : i32, i32
  }
}

</mosaic_0001>

<bundles_post_ra>
// kernel: tpu_custom_call.1
= control target key start
LH: loop header
LB: loop body
LE: loop exit
PB: predicated region body
PF: predicated region fallthrough
CT: control target
= control target key end

     0   :  { %s9946_s0 = inlined_call_operand.hbm [shape: f32[8,784], index: 0, kind: input, shape index: {}]   ;;  %s9947_s1 = inlined_call_operand.hbm [shape: bf16[784,1024], index: 1, kind: input, shape index: {}]   ;;  %s9948_s2 = inlined_call_operand.hbm [shape: f32[1,1024], index: 2, kind: input, shape index: {}]   ;;  %s9949_s3 = inlined_call_operand.hbm [shape: bf16[1024,512], index: 3, kind: input, shape index: {}]   ;;  %s9950_s4 = inlined_call_operand.hbm [shape: f32[1,512], index: 4, kind: input, shape index: {}]   ;;  %s9951_s5 = inlined_call_operand.hbm [shape: bf16[512,256], index: 5, kind: input, shape index: {}]   ;;  %s9952_s6 = inlined_call_operand.hbm [shape: f32[1,256], index: 6, kind: input, shape index: {}]   ;;  %s9953_s7 = inlined_call_operand.hbm [shape: bf16[1,256], index: 7, kind: input, shape index: {}]   ;;  %s9954_s8 = inlined_call_operand.<no memory space> [shape: f32[1,1], index: 8, kind: input, shape index: {}]   ;;  %s9955_s9 = inlined_call_operand.vmem [shape: f32[8,1], index: 9, kind: output, shape index: {}]  }
   0x1   :  { %v14_v0 = vstv %s9954_s8 }
   0x2   :  { %15 = vst [vmem:[#allocation2] sm:$0x1] %v14_v0 }
   0x3   :  { %16 = vsyncpa [#allocation4], 0 }
   0x4   :  { %17 = vsyncpa [#allocation6], 0 }
   0x5   :  { %18 = vsyncpa [#allocation9], 0 }
   0x6   :  { %19 = vsyncpa [#allocation12], 0  ;;  %s36_s13 = sshll.u32 %s9947_s1, 4  ;;  %s37_s13 = int_to_ptr.hbm [resolvable:$true] %s36_s13 }
   0x7   :  { %20 = vsyncpa [#allocation15], 0  ;;  %s9590_s14 = smov [#allocation5]   ;;  %s60_s18 = sshll.u32 %s9949_s3, 4  ;;  %s61_s18 = int_to_ptr.hbm [resolvable:$true] %s60_s18 }
   0x8   :  { %s38_s15 = sshll.u32 %s9590_s14, 4  ;;  %s9591_s19 = smov 512   ;;  %s39_s15 = int_to_ptr.vmem [resolvable:$true] %s38_s15 }
   0x9   :  { %s9592_s8 = smov 32   ;;  %s9593_s20 = smov [#allocation8]  }
   0xa   :  { %44 = dma.hbm_to_vmem [thread:$0]  %s37_s13, 50176, %s39_s15, [#allocation6], %s9591_s19, %s9591_s19, %s9592_s8  }
   0xb   :  { %s62_s21 = sshll.u32 %s9593_s20, 4  ;;  %s9594_s22 = smov 256   ;;  %s63_s21 = int_to_ptr.vmem [resolvable:$true] %s62_s21 }
   0xc   :  { %s9595_s23 = smov 16   ;;  %s84_s25 = sshll.u32 %s9951_s5, 4  ;;  %s85_s25 = int_to_ptr.hbm [resolvable:$true] %s84_s25 }
   0xd   :  { %68 = dma.hbm_to_vmem [thread:$0]  %s61_s18, 32768, %s63_s21, [#allocation9], %s9594_s22, %s9594_s22, %s9595_s23  }
   0xe   :  { %s9596_s26 = smov [#allocation11]   ;;  %s26_s29 = sshll.u32 %s9946_s0, 4  ;;  %s27_s29 = int_to_ptr.hbm [resolvable:$true] %s26_s29 }
   0xf   :  { %s86_s27 = sshll.u32 %s9596_s26, 4  ;;  %s9597_s30 = smov 128   ;;  %s87_s27 = int_to_ptr.vmem [resolvable:$true] %s86_s27 }
  0x10   :  { %s9598_s10 = smov 8   ;;  %s9599_s11 = smov [#allocation3]  }
  0x11   :  { %92 = dma.hbm_to_vmem [thread:$0]  %s85_s25, 8192, %s87_s27, [#allocation12], %s9597_s30, %s9597_s30, %s9598_s10  }
  0x12   :  { %s28_s12 = sshll.u32 %s9599_s11, 4  ;;  %s50_s15 = sshll.u32 %s9948_s2, 4  ;;  %s29_s12 = int_to_ptr.vmem [resolvable:$true] %s28_s12  ;;  %s51_s15 = int_to_ptr.hbm [resolvable:$true] %s50_s15 }
  0x13   :  { %31 = dma.hbm_to_vmem [thread:$0]  %s27_s29, 896, %s29_s12, [#allocation4]  }
  0x14   :  { %s74_s17 = sshll.u32 %s9950_s4, 4  ;;  %s9600_s18 = smov [#allocation7]   ;;  %s75_s17 = int_to_ptr.hbm [resolvable:$true] %s74_s17 }
  0x15   :  { %s52_s19 = sshll.u32 %s9600_s18, 4  ;;  %s9601_s0 = smov [#allocation10]   ;;  %s53_s19 = int_to_ptr.vmem [resolvable:$true] %s52_s19 }
  0x16   :  { %55 = dma.hbm_to_vmem [thread:$0]  %s51_s15, 128, %s53_s19, [#allocation6]  }
  0x17   :  { %s76_s8 = sshll.u32 %s9601_s0, 4  ;;  %s98_s22 = sshll.u32 %s9952_s6, 4  ;;  %s77_s8 = int_to_ptr.vmem [resolvable:$true] %s76_s8  ;;  %s99_s22 = int_to_ptr.hbm [resolvable:$true] %s98_s22 }
  0x18   :  { %79 = dma.hbm_to_vmem [thread:$0]  %s75_s17, 64, %s77_s8, [#allocation9]  }
  0x19   :  { %s109_s1 = sshll.u32 %s9953_s7, 4  ;;  %s9602_s24 = smov [#allocation13]   ;;  %s110_s1 = int_to_ptr.hbm [resolvable:$true] %s109_s1 }
  0x1a   :  { %s100_s4 = sshll.u32 %s9602_s24, 4  ;;  %s9603_s25 = smov [#allocation14]   ;;  %s101_s4 = int_to_ptr.vmem [resolvable:$true] %s100_s4 }
  0x1b   :  { %103 = dma.hbm_to_vmem [thread:$0]  %s99_s22, 32, %s101_s4, [#allocation12]  }
  0x1c   :  { %s111_s26 = sshll.u32 %s9603_s25, 4  ;;  %s112_s26 = int_to_ptr.vmem [resolvable:$true] %s111_s26 }
  0x1d   :  { %114 = dma.hbm_to_vmem [thread:$0]  %s110_s1, 32, %s112_s26, [#allocation15]  }
  0x1e   :  { %9580 = dma.done.wait [#allocation4], 896  }
  0x1f   :  { %9581 = vsyncadd [#allocation4], 4294966400 }
  0x20   :  { %9582 = dma.done.wait [#allocation6], 50304  }
  0x21   :  { %9583 = vsyncadd [#allocation6], 4294916992 }
  0x22   :  { %9584 = dma.done.wait [#allocation9], 32832  }
  0x23   :  { %9585 = vsyncadd [#allocation9], 4294934464 }
  0x24   :  { %9586 = dma.done.wait [#allocation12], 8224  }
  0x25   :  { %9587 = vsyncadd [#allocation12], 4294959072 }
  0x26   :  { %9588 = dma.done.wait [#allocation15], 32  }
  0x27   :  { %9589 = vsyncadd [#allocation15], 4294967264  ;;  %v6023_v1 = vld [vmem:[#allocation5 + $0x1c0] sm:$0xf]  ;;  %vm2534_vm0 = vcmask 130048   ;;  %vm5786_vm4 = vcmask 7168  }
  0x28   :  { %v8714_v2 = vld [vmem:[#allocation5 + $0x1dc] sm:$0xf0] }
  0x29   :  { %v6279_v3 = vld [vmem:[#allocation5 + $0x3c0] sm:$0xf]  ;;  %v6024_v4 = vor.u32 %v8714_v2, %v6023_v1 }
  0x2a   :  { %v8778_v5 = vld [vmem:[#allocation5 + $0x3dc] sm:$0xf0] }
  0x2b   :  { %v6535_v6 = vld [vmem:[#allocation5 + $0x5c0] sm:$0xf]  ;;  %v6280_v8 = vor.u32 %v8778_v5, %v6279_v3  ;;  %2538 = vmatpush.bf16.msra.mxu0 %v6024_v4 }
  0x2c   :  { %v8842_v7 = vld [vmem:[#allocation5 + $0x5dc] sm:$0xf0] }
  0x2d   :  { %v6536_v9 = vor.u32 %v8842_v7, %v6535_v6  ;;  %v6791_v10 = vld [vmem:[#allocation5 + $0x7c0] sm:$0xf]  ;;  %2551 = vmatpush.bf16.msra.mxu1 %v6280_v8 }
  0x2e   :  { %v8906_v11 = vld [vmem:[#allocation5 + $0x7dc] sm:$0xf0] }
  0x2f   :  { %v5991_v12 = vld [vmem:[#allocation5 + $0x180] sm:$0xf]  ;;  %v6792_v13 = vor.u32 %v8906_v11, %v6791_v10  ;;  %2564 = vmatpush.bf16.msra.mxu2 %v6536_v9 }
  0x30   :  { %v8706_v14 = vld [vmem:[#allocation5 + $0x19c] sm:$0xf0] }
  0x31   :  { %v6247_v15 = vld [vmem:[#allocation5 + $0x380] sm:$0xf]  ;;  %v5992_v17 = vor.u32 %v8706_v14, %v5991_v12  ;;  %2577 = vmatpush.bf16.msra.mxu3 %v6792_v13 }
  0x32   :  { %v8770_v16 = vld [vmem:[#allocation5 + $0x39c] sm:$0xf0] }
  0x33   :  { %v6248_v18 = vor.u32 %v8770_v16, %v6247_v15  ;;  %v6503_v19 = vld [vmem:[#allocation5 + $0x580] sm:$0xf]  ;;  %2539 = vmatpush.bf16.msra.mxu0 %v5992_v17 }
  0x34   :  { %v8834_v20 = vld [vmem:[#allocation5 + $0x59c] sm:$0xf0] }
  0x35   :  { %v6759_v21 = vld [vmem:[#allocation5 + $0x780] sm:$0xf]  ;;  %v6504_v22 = vor.u32 %v8834_v20, %v6503_v19  ;;  %2552 = vmatpush.bf16.msra.mxu1 %v6248_v18 }
  0x36   :  { %v8898_v23 = vld [vmem:[#allocation5 + $0x79c] sm:$0xf0] }
  0x37   :  { %v5959_v24 = vld [vmem:[#allocation5 + $0x140] sm:$0xf]  ;;  %v6760_v26 = vor.u32 %v8898_v23, %v6759_v21  ;;  %2565 = vmatpush.bf16.msra.mxu2 %v6504_v22 }
  0x38   :  { %v8698_v25 = vld [vmem:[#allocation5 + $0x15c] sm:$0xf0] }
  0x39   :  { %v6215_v27 = vld [vmem:[#allocation5 + $0x340] sm:$0xf]  ;;  %v5960_v30 = vor.u32 %v8698_v25, %v5959_v24  ;;  %2578 = vmatpush.bf16.msra.mxu3 %v6760_v26 }
  0x3a   :  { %v8762_v28 = vld [vmem:[#allocation5 + $0x35c] sm:$0xf0] }
  0x3b   :  { %v6471_v29 = vld [vmem:[#allocation5 + $0x540] sm:$0xf]  ;;  %v6216_v34 = vor.u32 %v8762_v28, %v6215_v27  ;;  %2540 = vmatpush.bf16.msra.mxu0 %v5960_v30 }
  0x3c   :  { %v8826_v31 = vld [vmem:[#allocation5 + $0x55c] sm:$0xf0] }
  0x3d   :  { %v6727_v32 = vld [vmem:[#allocation5 + $0x740] sm:$0xf]  ;;  %v6472_v35 = vor.u32 %v8826_v31, %v6471_v29  ;;  %2553 = vmatpush.bf16.msra.mxu1 %v6216_v34  ;;  %v8710_v34 = vld [vmem:[#allocation5 + $0x1c4] sm:$0xf] }
  0x3e   :  { %v8890_v33 = vld [vmem:[#allocation5 + $0x75c] sm:$0xf0] }
  0x3f   :  { %v5927_v36 = vld [vmem:[#allocation5 + $0x100] sm:$0xf]  ;;  %v6728_v39 = vor.u32 %v8890_v33, %v6727_v32  ;;  %2566 = vmatpush.bf16.msra.mxu2 %v6472_v35  ;;  %v6025_v35 = vld [vmem:[#allocation5 + $0x1e0] sm:$0xf0] }
  0x40   :  { %v8690_v37 = vld [vmem:[#allocation5 + $0x11c] sm:$0xf0] }
  0x41   :  { %v6183_v38 = vld [vmem:[#allocation5 + $0x300] sm:$0xf]  ;;  %v5928_v45 = vor.u32 %v8690_v37, %v5927_v36  ;;  %2579 = vmatpush.bf16.msra.mxu3 %v6728_v39  ;;  %v152_v36 = vld [vmem:[#allocation3 + $0x10] sm:$0xff] }
  0x42   :  { %v8754_v40 = vld [vmem:[#allocation5 + $0x31c] sm:$0xf0] }
  0x43   :  { %v6439_v41 = vld [vmem:[#allocation5 + $0x500] sm:$0xf]  ;;  %v6184_v46 = vor.u32 %v8754_v40, %v6183_v38  ;;  %2541 = vmatpush.bf16.msra.mxu0 %v5928_v45  ;;  %v6281_v45 = vld [vmem:[#allocation5 + $0x3e0] sm:$0xf0] }
  0x44   :  { %v8818_v42 = vld [vmem:[#allocation5 + $0x51c] sm:$0xf0] }
  0x45   :  { %v6695_v43 = vld [vmem:[#allocation5 + $0x700] sm:$0xf]  ;;  %v6440_v47 = vor.u32 %v8818_v42, %v6439_v41  ;;  %2554 = vmatpush.bf16.msra.mxu1 %v6184_v46  ;;  %v150_v41 = vld [vmem:[#allocation3] sm:$0xff] }
  0x46   :  { %v8882_v44 = vld [vmem:[#allocation5 + $0x71c] sm:$0xf0] }
  0x47   :  { %v5895_v48 = vld [vmem:[#allocation5 + $0xc0] sm:$0xf]  ;;  %v6696_v51 = vor.u32 %v8882_v44, %v6695_v43  ;;  %2567 = vmatpush.bf16.msra.mxu2 %v6440_v47  ;;  %v8774_v44 = vld [vmem:[#allocation5 + $0x3c4] sm:$0xf] }
  0x48   :  { %v8682_v49 = vld [vmem:[#allocation5 + $0xdc] sm:$0xf0] }
  0x49   :  { %v6151_v50 = vld [vmem:[#allocation5 + $0x2c0] sm:$0xf]  ;;  %v5896_v57 = vor.u32 %v8682_v49, %v5895_v48  ;;  %2580 = vmatpush.bf16.msra.mxu3 %v6696_v51  ;;  %v6028_v48 = vor.u32 %v8710_v34, %v6025_v35 }
  0x4a   :  { %v8746_v52 = vld [vmem:[#allocation5 + $0x2dc] sm:$0xf0] }
  0x4b   :  { %v6407_v53 = vld [vmem:[#allocation5 + $0x4c0] sm:$0xf]  ;;  %v6152_v58 = vor.u32 %v8746_v52, %v6151_v50  ;;  %2542 = vmatpush.bf16.msra.mxu0 %v5896_v57  ;;  %v9681_v52 = vpack.c.bf16 %v152_v36, %v152_v36  ;;  %v8742_v36 = vld [vmem:[#allocation5 + $0x2c4] sm:$0xf] }
  0x4c   :  { %v8810_v54 = vld [vmem:[#allocation5 + $0x4dc] sm:$0xf0] }
  0x4d   :  { %v6663_v55 = vld [vmem:[#allocation5 + $0x6c0] sm:$0xf]  ;;  %v6408_v59 = vor.u32 %v8810_v54, %v6407_v53  ;;  %2555 = vmatpush.bf16.msra.mxu1 %v6152_v58  ;;  %v8702_v54 = vld [vmem:[#allocation5 + $0x184] sm:$0xf] }
  0x4e   :  { %v8874_v56 = vld [vmem:[#allocation5 + $0x6dc] sm:$0xf0] }
  0x4f   :  { %v5863_v60 = vld [vmem:[#allocation5 + $0x80] sm:$0xf]  ;;  %v6664_v63 = vor.u32 %v8874_v56, %v6663_v55  ;;  %2568 = vmatpush.bf16.msra.mxu2 %v6408_v59  ;;  %v5993_v55 = vld [vmem:[#allocation5 + $0x1a0] sm:$0xf0]  ;;  %v9683_v56 = vpack.c.bf16 %v150_v41, %v150_v41  ;;  %v151_v59 = vld [vmem:[#allocation3 + $0x8] sm:$0xff] }
  0x50   :  { %v8674_v61 = vld [vmem:[#allocation5 + $0x9c] sm:$0xf0] }
  0x51   :  { %v6119_v62 = vld [vmem:[#allocation5 + $0x280] sm:$0xf]  ;;  %v5864_v5 = vor.u32 %v8674_v61, %v5863_v60  ;;  %2581 = vmatpush.bf16.msra.mxu3 %v6664_v63  ;;  %v6284_v60 = vor.u32 %v8774_v44, %v6281_v45  ;;  %v6249_v63 = vld [vmem:[#allocation5 + $0x3a0] sm:$0xf0] }
  0x52   :  { %v8738_v0 = vld [vmem:[#allocation5 + $0x29c] sm:$0xf0]  ;;  %v8670_v44 = vld [vmem:[#allocation5 + $0x84] sm:$0xf] }
  0x53   :  { %v6375_v1 = vld [vmem:[#allocation5 + $0x480] sm:$0xf]  ;;  %v6120_v6 = vor.u32 %v8738_v0, %v6119_v62  ;;  %2543 = vmatpush.bf16.msra.mxu0 %v5864_v5  ;;  %v8766_v62 = vld [vmem:[#allocation5 + $0x384] sm:$0xf] }
  0x54   :  { %v8802_v2 = vld [vmem:[#allocation5 + $0x49c] sm:$0xf0]  ;;  %v5865_v45 = vld [vmem:[#allocation5 + $0xa0] sm:$0xf0] }
  0x55   :  { %v6631_v3 = vld [vmem:[#allocation5 + $0x680] sm:$0xf]  ;;  %v6376_v7 = vor.u32 %v8802_v2, %v6375_v1  ;;  %2556 = vmatpush.bf16.msra.mxu1 %v6120_v6  ;;  %v5996_v1 = vor.u32 %v8702_v54, %v5993_v55  ;;  %v8694_v6 = vld [vmem:[#allocation5 + $0x144] sm:$0xf] }
  0x56   :  { %v8866_v4 = vld [vmem:[#allocation5 + $0x69c] sm:$0xf0] }
  0x57   :  { %v5831_v8 = vld [vmem:[#allocation5 + $0x40] sm:$0xf]  ;;  %v6632_v11 = vor.u32 %v8866_v4, %v6631_v3  ;;  %2569 = vmatpush.bf16.msra.mxu2 %v6376_v7  ;;  %v5961_v7 = vld [vmem:[#allocation5 + $0x160] sm:$0xf0] }
  0x58   :  { %v8666_v9 = vld [vmem:[#allocation5 + $0x5c] sm:$0xf0] }
  0x59   :  { %v6087_v10 = vld [vmem:[#allocation5 + $0x240] sm:$0xf]  ;;  %v5832_v17 = vor.u32 %v8666_v9, %v5831_v8  ;;  %2582 = vmatpush.bf16.msra.mxu3 %v6632_v11  ;;  %v9689_v8 = vpack.c.bf16 %v151_v59, %v151_v59  ;;  %v6252_v9 = vor.u32 %v8766_v62, %v6249_v63  ;;  %v8758_v11 = vld [vmem:[#allocation5 + $0x344] sm:$0xf] }
  0x5a   :  { %v8730_v12 = vld [vmem:[#allocation5 + $0x25c] sm:$0xf0] }
  0x5b   :  { %v6343_v13 = vld [vmem:[#allocation5 + $0x440] sm:$0xf]  ;;  %v6088_v21 = vor.u32 %v8730_v12, %v6087_v10  ;;  %2544 = vmatpush.bf16.msra.mxu0 %v5832_v17  ;;  %v6217_v12 = vld [vmem:[#allocation5 + $0x360] sm:$0xf0] }
  0x5c   :  { %v8794_v14 = vld [vmem:[#allocation5 + $0x45c] sm:$0xf0] }
  0x5d   :  { %v6599_v15 = vld [vmem:[#allocation5 + $0x640] sm:$0xf]  ;;  %v6344_v22 = vor.u32 %v8794_v14, %v6343_v13  ;;  %2557 = vmatpush.bf16.msra.mxu1 %v6088_v21  ;;  %v5964_v14 = vor.u32 %v8694_v6, %v5961_v7  ;;  %v6220_v21 = vor.u32 %v8758_v11, %v6217_v12  ;;  %v8838_v11 = vld [vmem:[#allocation5 + $0x5c4] sm:$0xf] }
  0x5e   :  { %v8858_v16 = vld [vmem:[#allocation5 + $0x65c] sm:$0xf0]  ;;  %v6537_v12 = vld [vmem:[#allocation5 + $0x5e0] sm:$0xf0] }
  0x5f   :  { %v5799_v18 = vld [vmem:[#allocation5] sm:$0xf]  ;;  %v6600_v26 = vor.u32 %v8858_v16, %v6599_v15  ;;  %2570 = vmatpush.bf16.msra.mxu2 %v6344_v22 }
  0x60   :  { %v8658_v19 = vld [vmem:[#allocation5 + $0x1c] sm:$0xf0] }
  0x61   :  { %v6055_v20 = vld [vmem:[#allocation5 + $0x200] sm:$0xf]  ;;  %v5800_v33 = vor.u32 %v8658_v19, %v5799_v18  ;;  %2583 = vmatpush.bf16.msra.mxu3 %v6600_v26  ;;  %v8686_v19 = vld [vmem:[#allocation5 + $0x104] sm:$0xf] }
  0x62   :  { %v8722_v23 = vld [vmem:[#allocation5 + $0x21c] sm:$0xf0] }
  0x63   :  { %v6311_v24 = vld [vmem:[#allocation5 + $0x400] sm:$0xf]  ;;  %v6056_v37 = vor.u32 %v8722_v23, %v6055_v20  ;;  %2545 = vmatpush.bf16.msra.mxu0 %v5800_v33  ;;  %v5929_v20 = vld [vmem:[#allocation5 + $0x120] sm:$0xf0]  ;;  %v156_v33 = vld [vmem:[#allocation3 + $0x30] sm:$0xff] }
  0x64   :  { %v8786_v25 = vld [vmem:[#allocation5 + $0x41c] sm:$0xf0]  ;;  %v8750_v23 = vld [vmem:[#allocation5 + $0x304] sm:$0xf]  ;;  %v5932_v26 = vor.u32 %v8686_v19, %v5929_v20  ;;  %v154_v19 = vld [vmem:[#allocation3 + $0x20] sm:$0xff] }
  0x65   :  { %v6567_v27 = vld [vmem:[#allocation5 + $0x600] sm:$0xf]  ;;  %v6312_v38 = vor.u32 %v8786_v25, %v6311_v24  ;;  %2558 = vmatpush.bf16.msra.mxu1 %v6056_v37  ;;  %v6185_v24 = vld [vmem:[#allocation5 + $0x320] sm:$0xf0] }
  0x66   :  { %v8850_v28 = vld [vmem:[#allocation5 + $0x61c] sm:$0xf0]  ;;  %2546 = vmatmul.bf16.vlgmr.msra.gmra.mxu0 %v9683_v56  ;;  %v6188_v34 = vor.u32 %v8750_v23, %v6185_v24  ;;  %v6153_v37 = vld [vmem:[#allocation5 + $0x2e0] sm:$0xf0]  ;;  %v155_v24 = vld [vmem:[#allocation3 + $0x28] sm:$0xff] }
  0x67   :  { %v7047_v29 = vld [vmem:[#allocation5 + $0x9c0] sm:$0xf]  ;;  %v6568_v42 = vor.u32 %v8850_v28, %v6567_v27  ;;  %2571 = vmatpush.bf16.msra.mxu2 %v6312_v38  ;;  %v6057_v23 = vld [vmem:[#allocation5 + $0x220] sm:$0xf0] }
  0x68   :  { %v8970_v30 = vld [vmem:[#allocation5 + $0x9dc] sm:$0xf0]  ;;  %2559 = vmatmul.bf16.vlgmr.msra.gmra.mxu1 %v9689_v8 }
  0x69   :  { %v7303_v31 = vld [vmem:[#allocation5 + $0xbc0] sm:$0xf]  ;;  %v7048_v43 = vor.u32 %v8970_v30, %v7047_v29  ;;  %2584 = vmatpush.bf16.msra.mxu3 %v6568_v42 }
  0x6a   :  { %v9034_v32 = vld [vmem:[#allocation5 + $0xbdc] sm:$0xf0]  ;;  %2572 = vmatmul.bf16.vlgmr.msra.gmra.mxu2 %v9681_v52 }
  0x6b   :  { %v7335_v39 = vld [vmem:[#allocation5 + $0xc00] sm:$0xf]  ;;  %v7304_v47 = vor.u32 %v9034_v32, %v7303_v31  ;;  %2590 = vmatpush.bf16.msrb.mxu0 %v7048_v43  ;;  %v8678_v31 = vld [vmem:[#allocation5 + $0xc4] sm:$0xf] }
  0x6c   :  { %v9042_v40 = vld [vmem:[#allocation5 + $0xc1c] sm:$0xf0]  ;;  %v5897_v32 = vld [vmem:[#allocation5 + $0xe0] sm:$0xf0] }
  0x6d   :  { %v153_v46 = vld [vmem:[#allocation3 + $0x18] sm:$0xff]  ;;  %v7336_v57 = vor.u32 %v9042_v40, %v7335_v39  ;;  %2603 = vmatpush.bf16.msrb.mxu1 %v7304_v47  ;;  %2629 = vmatpush.bf16.msrb.mxu3 %v6028_v48  ;;  %v5900_v39 = vor.u32 %v8678_v31, %v5897_v32  ;;  %v6156_v47 = vor.u32 %v8742_v36, %v6153_v37 }
  0x6e   :  { %v7015_v49 = vld [vmem:[#allocation5 + $0x980] sm:$0xf]  ;;  %v9685_v58 = vpack.c.bf16 %v153_v46, %v153_v46  ;;  %v9693_v46 = vpack.c.bf16 %v156_v33, %v156_v33  ;;  %v9697_v31 = vpack.c.bf16 %v154_v19, %v154_v19  ;;  %v6505_v32 = vld [vmem:[#allocation5 + $0x5a0] sm:$0xf0]  ;;  %v9699_v36 = vpack.c.bf16 %v155_v24, %v155_v24 }
  0x6f   :  { %v8962_v50 = vld [vmem:[#allocation5 + $0x99c] sm:$0xf0]  ;;  %2623 = vmatpush.bf16.msrb.mxu2 %v7336_v57  ;;  %v8894_v33 = vld [vmem:[#allocation5 + $0x784] sm:$0xf] }
  0x70   :  { %v7271_v51 = vld [vmem:[#allocation5 + $0xb80] sm:$0xf]  ;;  %v7016_v61 = vor.u32 %v8962_v50, %v7015_v49  ;;  %2585 = vmatmul.bf16.vlgmr.msra.gmra.mxu3 %v9685_v58  ;;  %v8734_v49 = vld [vmem:[#allocation5 + $0x284] sm:$0xf] }
  0x71   :  { %v9026_v53 = vld [vmem:[#allocation5 + $0xb9c] sm:$0xf0]  ;;  %2630 = vmatpush.bf16.msrb.mxu3 %v5996_v1  ;;  %v6121_v50 = vld [vmem:[#allocation5 + $0x2a0] sm:$0xf0] }
  0x72   :  { %v7272_v0 = vor.u32 %v9026_v53, %v7271_v51  ;;  %v6983_v2 = vld [vmem:[#allocation5 + $0x940] sm:$0xf]  ;;  %2591 = vmatpush.bf16.msrb.mxu0 %v7016_v61  ;;  %v5868_v53 = vor.u32 %v8670_v44, %v5865_v45  ;;  %v5833_v61 = vld [vmem:[#allocation5 + $0x60] sm:$0xf0]  ;;  %v6124_v62 = vor.u32 %v8734_v49, %v6121_v50 }
  0x73   :  { %v8954_v3 = vld [vmem:[#allocation5 + $0x95c] sm:$0xf0]  ;;  %2642 = vmatpush.bf16.msra.mxu2 %v6284_v60  ;;  %v8662_v60 = vld [vmem:[#allocation5 + $0x44] sm:$0xf] }
  0x74   :  { %v7239_v4 = vld [vmem:[#allocation5 + $0xb40] sm:$0xf]  ;;  %v6984_v10 = vor.u32 %v8954_v3, %v6983_v2  ;;  %2604 = vmatpush.bf16.msrb.mxu1 %v7272_v0  ;;  %v8726_v0 = vld [vmem:[#allocation5 + $0x244] sm:$0xf] }
  0x75   :  { %v9018_v5 = vld [vmem:[#allocation5 + $0xb5c] sm:$0xf0]  ;;  %2631 = vmatpush.bf16.msrb.mxu3 %v5964_v14  ;;  %v6089_v1 = vld [vmem:[#allocation5 + $0x260] sm:$0xf0] }
  0x76   :  { %v7240_v13 = vor.u32 %v9018_v5, %v7239_v4  ;;  %v6951_v15 = vld [vmem:[#allocation5 + $0x900] sm:$0xf]  ;;  %2592 = vmatpush.bf16.msrb.mxu0 %v6984_v10  ;;  %v5836_v4 = vor.u32 %v8662_v60, %v5833_v61  ;;  %v5801_v10 = vld [vmem:[#allocation5 + $0x20] sm:$0xf0] }
  0x77   :  { %v8946_v16 = vld [vmem:[#allocation5 + $0x91c] sm:$0xf0]  ;;  %2643 = vmatpush.bf16.msra.mxu2 %v6252_v9  ;;  %v8654_v9 = vld [vmem:[#allocation5 + $0x4] sm:$0xf] }
  0x78   :  { %v7207_v17 = vld [vmem:[#allocation5 + $0xb00] sm:$0xf]  ;;  %v6952_v22 = vor.u32 %v8946_v16, %v6951_v15  ;;  %2605 = vmatpush.bf16.msrb.mxu1 %v7240_v13  ;;  %v8902_v13 = vld [vmem:[#allocation5 + $0x7c4] sm:$0xf]  ;;  %v6092_v15 = vor.u32 %v8726_v0, %v6089_v1 }
  0x79   :  { %v9010_v18 = vld [vmem:[#allocation5 + $0xb1c] sm:$0xf0]  ;;  %2632 = vmatpush.bf16.msrb.mxu3 %v5932_v26  ;;  %v6793_v14 = vld [vmem:[#allocation5 + $0x7e0] sm:$0xf0] }
  0x7a   :  { %v7208_v25 = vor.u32 %v9010_v18, %v7207_v17  ;;  %v6919_v27 = vld [vmem:[#allocation5 + $0x8c0] sm:$0xf]  ;;  %2593 = vmatpush.bf16.msrb.mxu0 %v6952_v22  ;;  %7365 = vmatmul.msk.bf16.vlgmr.msrb.gmra.mxu2 %vm2534_vm0, %v9693_v46  ;;  %v8966_v17 = vld [vmem:[#allocation5 + $0x9c4] sm:$0xf]  ;;  %v6796_v26 = vor.u32 %v8902_v13, %v6793_v14 }
  0x7b   :  { %v8938_v28 = vld [vmem:[#allocation5 + $0x8dc] sm:$0xf0]  ;;  %2644 = vmatpush.bf16.msra.mxu2 %v6220_v21  ;;  %v7049_v18 = vld [vmem:[#allocation5 + $0x9e0] sm:$0xf0]  ;;  %v5804_v21 = vor.u32 %v8654_v9, %v5801_v10 }
  0x7c   :  { %v7175_v29 = vld [vmem:[#allocation5 + $0xac0] sm:$0xf]  ;;  %v6920_v35 = vor.u32 %v8938_v28, %v6919_v27  ;;  %2606 = vmatpush.bf16.msrb.mxu1 %v7208_v25  ;;  %v8718_v22 = vld [vmem:[#allocation5 + $0x204] sm:$0xf]  ;;  %v6540_v25 = vor.u32 %v8838_v11, %v6537_v12 }
  0x7d   :  { %v9002_v30 = vld [vmem:[#allocation5 + $0xadc] sm:$0xf0]  ;;  %2633 = vmatpush.bf16.msrb.mxu3 %v5900_v39  ;;  %v9030_v27 = vld [vmem:[#allocation5 + $0xbc4] sm:$0xf] }
  0x7e   :  { %v7176_v38 = vor.u32 %v9002_v30, %v7175_v29  ;;  %v6887_v40 = vld [vmem:[#allocation5 + $0x880] sm:$0xf]  ;;  %2594 = vmatpush.bf16.msrb.mxu0 %v6920_v35  ;;  %v7305_v28 = vld [vmem:[#allocation5 + $0xbe0] sm:$0xf0]  ;;  %v7052_v30 = vor.u32 %v8966_v17, %v7049_v18  ;;  %v6060_v35 = vor.u32 %v8718_v22, %v6057_v23 }
  0x7f   :  { %v8930_v41 = vld [vmem:[#allocation5 + $0x89c] sm:$0xf0]  ;;  %2645 = vmatpush.bf16.msra.mxu2 %v6188_v34  ;;  %v8830_v29 = vld [vmem:[#allocation5 + $0x584] sm:$0xf]  ;;  %v7308_v39 = vor.u32 %v9030_v27, %v7305_v28 }
  0x80   :  { %v7143_v42 = vld [vmem:[#allocation5 + $0xa80] sm:$0xf]  ;;  %v6888_v48 = vor.u32 %v8930_v41, %v6887_v40  ;;  %2607 = vmatpush.bf16.msrb.mxu1 %v7176_v38  ;;  %v6761_v34 = vld [vmem:[#allocation5 + $0x7a0] sm:$0xf0]  ;;  %v6508_v40 = vor.u32 %v8830_v29, %v6505_v32 }
  0x81   :  { %v8994_v43 = vld [vmem:[#allocation5 + $0xa9c] sm:$0xf0]  ;;  %2634 = vmatpush.bf16.msrb.mxu3 %v5868_v53  ;;  %v8958_v37 = vld [vmem:[#allocation5 + $0x984] sm:$0xf]  ;;  %v6764_v41 = vor.u32 %v8894_v33, %v6761_v34 }
  0x82   :  { %v7144_v51 = vor.u32 %v8994_v43, %v7143_v42  ;;  %v6855_v54 = vld [vmem:[#allocation5 + $0x840] sm:$0xf]  ;;  %2595 = vmatpush.bf16.msrb.mxu0 %v6888_v48  ;;  %v7017_v38 = vld [vmem:[#allocation5 + $0x9a0] sm:$0xf0] }
  0x83   :  { %v8922_v55 = vld [vmem:[#allocation5 + $0x85c] sm:$0xf0]  ;;  %2646 = vmatpush.bf16.msra.mxu2 %v6156_v47  ;;  %v9022_v42 = vld [vmem:[#allocation5 + $0xb84] sm:$0xf]  ;;  %v7020_v45 = vor.u32 %v8958_v37, %v7017_v38 }
  0x84   :  { %v7111_v57 = vld [vmem:[#allocation5 + $0xa40] sm:$0xf]  ;;  %v6856_v63 = vor.u32 %v8922_v55, %v6855_v54  ;;  %2608 = vmatpush.bf16.msrb.mxu1 %v7144_v51  ;;  %v7273_v43 = vld [vmem:[#allocation5 + $0xba0] sm:$0xf0] }
  0x85   :  { %v8986_v59 = vld [vmem:[#allocation5 + $0xa5c] sm:$0xf0]  ;;  %2635 = vmatpush.bf16.msrb.mxu3 %v5836_v4  ;;  %v8822_v44 = vld [vmem:[#allocation5 + $0x544] sm:$0xf]  ;;  %v7276_v53 = vor.u32 %v9022_v42, %v7273_v43 }
  0x86   :  { %v6823_v2 = vld [vmem:[#allocation5 + $0x800] sm:$0xf]  ;;  %v7112_v3 = vor.u32 %v8986_v59, %v7111_v57  ;;  %2596 = vmatpush.bf16.msrb.mxu0 %v6856_v63  ;;  %v6473_v47 = vld [vmem:[#allocation5 + $0x560] sm:$0xf0] }
  0x87   :  { %v8914_v5 = vld [vmem:[#allocation5 + $0x81c] sm:$0xf0]  ;;  %2647 = vmatpush.bf16.msra.mxu2 %v6124_v62  ;;  %v8886_v48 = vld [vmem:[#allocation5 + $0x744] sm:$0xf]  ;;  %v6476_v54 = vor.u32 %v8822_v44, %v6473_v47 }
  0x88   :  { %v7079_v6 = vld [vmem:[#allocation5 + $0xa00] sm:$0xf]  ;;  %v6824_v16 = vor.u32 %v8914_v5, %v6823_v2  ;;  %2609 = vmatpush.bf16.msrb.mxu1 %v7112_v3  ;;  %v6729_v49 = vld [vmem:[#allocation5 + $0x760] sm:$0xf0] }
  0x89   :  { %v8978_v7 = vld [vmem:[#allocation5 + $0xa1c] sm:$0xf0]  ;;  %2636 = vmatpush.bf16.msrb.mxu3 %v5804_v21  ;;  %v8950_v50 = vld [vmem:[#allocation5 + $0x944] sm:$0xf]  ;;  %v6732_v55 = vor.u32 %v8886_v48, %v6729_v49 }
  0x8a   :  { %v7080_v20 = vor.u32 %v8978_v7, %v7079_v6  ;;  %2597 = vmatpush.bf16.msrb.mxu0 %v6824_v16  ;;  %v6985_v51 = vld [vmem:[#allocation5 + $0x960] sm:$0xf0] }
  0x8b   :  { %2648 = vmatpush.bf16.msra.mxu2 %v6092_v15  ;;  %v9014_v57 = vld [vmem:[#allocation5 + $0xb44] sm:$0xf]  ;;  %v6988_v61 = vor.u32 %v8950_v50, %v6985_v51 }
  0x8c   :  { %2610 = vmatpush.bf16.msrb.mxu1 %v7080_v20  ;;  %2637 = vmatmul.bf16.vlgmr.msrb.gmra.mxu3 %v9683_v56  ;;  %v7241_v59 = vld [vmem:[#allocation5 + $0xb60] sm:$0xf0] }
  0x8d   :  { %2681 = vmatpush.bf16.msra.mxu3 %v7052_v30  ;;  %2598 = vmatmul.bf16.vlgmr.msrb.gmra.mxu0 %v9697_v31  ;;  %v8814_v60 = vld [vmem:[#allocation5 + $0x504] sm:$0xf]  ;;  %v7244_v3 = vor.u32 %v9014_v57, %v7241_v59  ;;  %v6031_v57 = vld [vmem:[#allocation5 + $0x1c8] sm:$0xf] }
  0x8e   :  { %2655 = vmatpush.bf16.msra.mxu0 %v6540_v25  ;;  %v6441_v62 = vld [vmem:[#allocation5 + $0x520] sm:$0xf0]  ;;  %v8715_v59 = vld [vmem:[#allocation5 + $0x1e4] sm:$0xf0] }
  0x8f   :  { %2649 = vmatpush.bf16.msra.mxu2 %v6060_v35  ;;  %2611 = vmatmul.bf16.vlgmr.msrb.gmra.mxu1 %v9699_v36  ;;  %v8878_v63 = vld [vmem:[#allocation5 + $0x704] sm:$0xf]  ;;  %v6444_v4 = vor.u32 %v8814_v60, %v6441_v62  ;;  %v6543_v60 = vld [vmem:[#allocation5 + $0x5c8] sm:$0xf] }
  0x90   :  { %2668 = vmatpush.bf16.msra.mxu1 %v6796_v26  ;;  %v6697_v0 = vld [vmem:[#allocation5 + $0x720] sm:$0xf0]  ;;  %v8843_v62 = vld [vmem:[#allocation5 + $0x5e4] sm:$0xf0] }
  0x91   :  { %2682 = vmatpush.bf16.msra.mxu3 %v7020_v45  ;;  %v8942_v1 = vld [vmem:[#allocation5 + $0x904] sm:$0xf]  ;;  %v6700_v5 = vor.u32 %v8878_v63, %v6697_v0 }
  0x92   :  { %2656 = vmatpush.bf16.msra.mxu0 %v6508_v40  ;;  %2650 = vmatmul.bf16.vlgmr.msra.gmra.mxu2 %v9689_v8  ;;  %v6953_v2 = vld [vmem:[#allocation5 + $0x920] sm:$0xf0] }
  0x93   :  { %2694 = vmatpush.bf16.msrb.mxu2 %v7308_v39  ;;  %v9006_v6 = vld [vmem:[#allocation5 + $0xb04] sm:$0xf]  ;;  %v6956_v10 = vor.u32 %v8942_v1, %v6953_v2 }
  0x94   :  { %2669 = vmatpush.bf16.msra.mxu1 %v6764_v41  ;;  %v7209_v7 = vld [vmem:[#allocation5 + $0xb20] sm:$0xf0] }
  0x95   :  { %v8806_v9 = vld [vmem:[#allocation5 + $0x4c4] sm:$0xf]  ;;  %2683 = vmatpush.bf16.msra.mxu3 %v6988_v61  ;;  %v7212_v16 = vor.u32 %v9006_v6, %v7209_v7  ;;  %v6032_v6 = vor.u32 %v8715_v59, %v6031_v57  ;;  %v6799_v7 = vld [vmem:[#allocation5 + $0x7c8] sm:$0xf] }
  0x96   :  { %2657 = vmatpush.bf16.msra.mxu0 %v6476_v54  ;;  %v6409_v11 = vld [vmem:[#allocation5 + $0x4e0] sm:$0xf0]  ;;  %v8683_v57 = vld [vmem:[#allocation5 + $0xe4] sm:$0xf0] }
  0x97   :  { %2695 = vmatpush.bf16.msrb.mxu2 %v7276_v53  ;;  %v8870_v12 = vld [vmem:[#allocation5 + $0x6c4] sm:$0xf]  ;;  %v6412_v17 = vor.u32 %v8806_v9, %v6409_v11  ;;  %v8907_v9 = vld [vmem:[#allocation5 + $0x7e4] sm:$0xf0] }
  0x98   :  { %2670 = vmatpush.bf16.msra.mxu1 %v6732_v55  ;;  %v6665_v13 = vld [vmem:[#allocation5 + $0x6e0] sm:$0xf0]  ;;  %v6415_v59 = vld [vmem:[#allocation5 + $0x4c8] sm:$0xf] }
  0x99   :  { %v8934_v14 = vld [vmem:[#allocation5 + $0x8c4] sm:$0xf]  ;;  %v6668_v18 = vor.u32 %v8870_v12, %v6665_v13  ;;  %2684 = vmatpush.bf16.msra.mxu3 %v6956_v10  ;;  %v6544_v10 = vor.u32 %v8843_v62, %v6543_v60  ;;  %v6287_v12 = vld [vmem:[#allocation5 + $0x3c8] sm:$0xf] }
  0x9a   :  { %v6921_v15 = vld [vmem:[#allocation5 + $0x8e0] sm:$0xf0]  ;;  %2658 = vmatpush.bf16.msra.mxu0 %v6444_v4  ;;  %v8779_v13 = vld [vmem:[#allocation5 + $0x3e4] sm:$0xf0] }
  0x9b   :  { %2696 = vmatpush.bf16.msrb.mxu2 %v7244_v3  ;;  %v8998_v19 = vld [vmem:[#allocation5 + $0xac4] sm:$0xf]  ;;  %v6924_v22 = vor.u32 %v8934_v14, %v6921_v15  ;;  %v5999_v14 = vld [vmem:[#allocation5 + $0x188] sm:$0xf] }
  0x9c   :  { %2671 = vmatpush.bf16.msra.mxu1 %v6700_v5  ;;  %v7177_v20 = vld [vmem:[#allocation5 + $0xae0] sm:$0xf0]  ;;  %v8811_v60 = vld [vmem:[#allocation5 + $0x4e4] sm:$0xf0] }
  0x9d   :  { %v8798_v21 = vld [vmem:[#allocation5 + $0x484] sm:$0xf]  ;;  %v7180_v28 = vor.u32 %v8998_v19, %v7177_v20  ;;  %2685 = vmatpush.bf16.msra.mxu3 %v6924_v22  ;;  %v6800_v19 = vor.u32 %v8907_v9, %v6799_v7  ;;  %v6288_v20 = vor.u32 %v8779_v13, %v6287_v12  ;;  %v8899_v22 = vld [vmem:[#allocation5 + $0x7a4] sm:$0xf0] }
  0x9e   :  { %v6377_v23 = vld [vmem:[#allocation5 + $0x4a0] sm:$0xf0]  ;;  %2659 = vmatpush.bf16.msra.mxu0 %v6412_v17  ;;  %v6511_v17 = vld [vmem:[#allocation5 + $0x588] sm:$0xf] }
  0x9f   :  { %v8862_v24 = vld [vmem:[#allocation5 + $0x684] sm:$0xf]  ;;  %2697 = vmatpush.bf16.msrb.mxu2 %v7212_v16  ;;  %v6380_v29 = vor.u32 %v8798_v21, %v6377_v23  ;;  %v8707_v16 = vld [vmem:[#allocation5 + $0x1a4] sm:$0xf0] }
  0xa0   :  { %v6633_v25 = vld [vmem:[#allocation5 + $0x6a0] sm:$0xf0]  ;;  %2672 = vmatpush.bf16.msra.mxu1 %v6668_v18  ;;  %v8835_v18 = vld [vmem:[#allocation5 + $0x5a4] sm:$0xf0]  ;;  %v6000_v23 = vor.u32 %v8707_v16, %v5999_v14 }
  0xa1   :  { %v8926_v26 = vld [vmem:[#allocation5 + $0x884] sm:$0xf]  ;;  %v6636_v30 = vor.u32 %v8862_v24, %v6633_v25  ;;  %v6767_v21 = vld [vmem:[#allocation5 + $0x788] sm:$0xf]  ;;  %v6512_v24 = vor.u32 %v8835_v18, %v6511_v17 }
  0xa2   :  { %v6889_v27 = vld [vmem:[#allocation5 + $0x8a0] sm:$0xf0]  ;;  %2660 = vmatpush.bf16.msra.mxu0 %v6380_v29  ;;  %v6255_v25 = vld [vmem:[#allocation5 + $0x388] sm:$0xf] }
  0xa3   :  { %v8990_v32 = vld [vmem:[#allocation5 + $0xa84] sm:$0xf]  ;;  %v6892_v35 = vor.u32 %v8926_v26, %v6889_v27  ;;  %2698 = vmatpush.bf16.msrb.mxu2 %v7180_v28  ;;  %v8771_v26 = vld [vmem:[#allocation5 + $0x3a4] sm:$0xf0] }
  0xa4   :  { %v7145_v33 = vld [vmem:[#allocation5 + $0xaa0] sm:$0xf0]  ;;  %2673 = vmatpush.bf16.msra.mxu1 %v6636_v30  ;;  %v5967_v27 = vld [vmem:[#allocation5 + $0x148] sm:$0xf] }
  0xa5   :  { %v8790_v34 = vld [vmem:[#allocation5 + $0x444] sm:$0xf]  ;;  %v7148_v42 = vor.u32 %v8990_v32, %v7145_v33  ;;  %2686 = vmatpush.bf16.msra.mxu3 %v6892_v35  ;;  %v8699_v28 = vld [vmem:[#allocation5 + $0x164] sm:$0xf0]  ;;  %v6768_v32 = vor.u32 %v8899_v22, %v6767_v21  ;;  %v6256_v33 = vor.u32 %v8771_v26, %v6255_v25 }
  0xa6   :  { %v6345_v37 = vld [vmem:[#allocation5 + $0x460] sm:$0xf0]  ;;  %v6479_v29 = vld [vmem:[#allocation5 + $0x548] sm:$0xf] }
  0xa7   :  { %v8854_v38 = vld [vmem:[#allocation5 + $0x644] sm:$0xf]  ;;  %v6348_v45 = vor.u32 %v8790_v34, %v6345_v37  ;;  %2699 = vmatpush.bf16.msrb.mxu2 %v7148_v42  ;;  %v8827_v30 = vld [vmem:[#allocation5 + $0x564] sm:$0xf0]  ;;  %v5968_v37 = vor.u32 %v8699_v28, %v5967_v27 }
  0xa8   :  { %v6601_v39 = vld [vmem:[#allocation5 + $0x660] sm:$0xf0]  ;;  %v6735_v34 = vld [vmem:[#allocation5 + $0x748] sm:$0xf] }
  0xa9   :  { %v8918_v40 = vld [vmem:[#allocation5 + $0x844] sm:$0xf]  ;;  %v6604_v47 = vor.u32 %v8854_v38, %v6601_v39  ;;  %2661 = vmatpush.bf16.msra.mxu0 %v6348_v45  ;;  %v8891_v35 = vld [vmem:[#allocation5 + $0x764] sm:$0xf0]  ;;  %v6480_v38 = vor.u32 %v8827_v30, %v6479_v29 }
  0xaa   :  { %v6857_v41 = vld [vmem:[#allocation5 + $0x860] sm:$0xf0]  ;;  %v6223_v39 = vld [vmem:[#allocation5 + $0x348] sm:$0xf]  ;;  %v6736_v45 = vor.u32 %v8891_v35, %v6735_v34 }
  0xab   :  { %v8982_v43 = vld [vmem:[#allocation5 + $0xa44] sm:$0xf]  ;;  %v6860_v51 = vor.u32 %v8918_v40, %v6857_v41  ;;  %2674 = vmatpush.bf16.msra.mxu1 %v6604_v47  ;;  %v8763_v40 = vld [vmem:[#allocation5 + $0x364] sm:$0xf0] }
  0xac   :  { %v7113_v44 = vld [vmem:[#allocation5 + $0xa60] sm:$0xf0]  ;;  %v5935_v41 = vld [vmem:[#allocation5 + $0x108] sm:$0xf]  ;;  %v6224_v47 = vor.u32 %v8763_v40, %v6223_v39 }
  0xad   :  { %v8782_v48 = vld [vmem:[#allocation5 + $0x404] sm:$0xf]  ;;  %v7116_v61 = vor.u32 %v8982_v43, %v7113_v44  ;;  %2687 = vmatpush.bf16.msra.mxu3 %v6860_v51  ;;  %v8691_v42 = vld [vmem:[#allocation5 + $0x124] sm:$0xf0] }
  0xae   :  { %v6313_v49 = vld [vmem:[#allocation5 + $0x420] sm:$0xf0]  ;;  %v6447_v43 = vld [vmem:[#allocation5 + $0x508] sm:$0xf] }
  0xaf   :  { %v8846_v50 = vld [vmem:[#allocation5 + $0x604] sm:$0xf]  ;;  %v6316_v1 = vor.u32 %v8782_v48, %v6313_v49  ;;  %2700 = vmatpush.bf16.msrb.mxu2 %v7116_v61  ;;  %v8819_v44 = vld [vmem:[#allocation5 + $0x524] sm:$0xf0] }
  0xb0   :  { %v6569_v53 = vld [vmem:[#allocation5 + $0x620] sm:$0xf0]  ;;  %v6703_v48 = vld [vmem:[#allocation5 + $0x708] sm:$0xf]  ;;  %v6448_v51 = vor.u32 %v8819_v44, %v6447_v43 }
  0xb1   :  { %v8910_v54 = vld [vmem:[#allocation5 + $0x804] sm:$0xf]  ;;  %v6572_v2 = vor.u32 %v8846_v50, %v6569_v53  ;;  %2662 = vmatpush.bf16.msra.mxu0 %v6316_v1  ;;  %v8883_v49 = vld [vmem:[#allocation5 + $0x724] sm:$0xf0]  ;;  %v5936_v50 = vor.u32 %v8691_v42, %v5935_v41 }
  0xb2   :  { %v6825_v55 = vld [vmem:[#allocation5 + $0x820] sm:$0xf0]  ;;  %v6191_v53 = vld [vmem:[#allocation5 + $0x308] sm:$0xf]  ;;  %v6704_v61 = vor.u32 %v8883_v49, %v6703_v48 }
  0xb3   :  { %v9038_v63 = vld [vmem:[#allocation5 + $0xc04] sm:$0xf]  ;;  %v6828_v5 = vor.u32 %v8910_v54, %v6825_v55  ;;  %2675 = vmatpush.bf16.msra.mxu1 %v6572_v2  ;;  %v8755_v54 = vld [vmem:[#allocation5 + $0x324] sm:$0xf0]  ;;  %v6416_v2 = vor.u32 %v8811_v60, %v6415_v59  ;;  %v6289_v60 = vld [vmem:[#allocation5 + $0x3e8] sm:$0xf0] }
  0xb4   :  { %v7337_v0 = vld [vmem:[#allocation5 + $0xc20] sm:$0xf0]  ;;  %2663 = vmatmul.bf16.vlgmr.msra.gmra.mxu0 %v9681_v52  ;;  %v5903_v55 = vld [vmem:[#allocation5 + $0xc8] sm:$0xf]  ;;  %v6192_v62 = vor.u32 %v8755_v54, %v6191_v53  ;;  %v8711_v54 = vld [vmem:[#allocation5 + $0x1cc] sm:$0xf] }
  0xb5   :  { %v8974_v3 = vld [vmem:[#allocation5 + $0xa04] sm:$0xf]  ;;  %v7340_v11 = vor.u32 %v9038_v63, %v7337_v0  ;;  %2688 = vmatpush.bf16.msra.mxu3 %v6828_v5  ;;  %2746 = vmatpush.bf16.msrb.mxu0 %v6544_v10  ;;  %v6671_v63 = vld [vmem:[#allocation5 + $0x6c8] sm:$0xf]  ;;  %v5904_v1 = vor.u32 %v8683_v57, %v5903_v55  ;;  %v6033_v55 = vld [vmem:[#allocation5 + $0x1e8] sm:$0xf0] }
  0xb6   :  { %v7081_v4 = vld [vmem:[#allocation5 + $0xa20] sm:$0xf0]  ;;  %2676 = vmatmul.bf16.vlgmr.msra.gmra.mxu1 %v9685_v58  ;;  %v8875_v0 = vld [vmem:[#allocation5 + $0x6e4] sm:$0xf0]  ;;  %v8775_v57 = vld [vmem:[#allocation5 + $0x3cc] sm:$0xf] }
  0xb7   :  { %v7084_v15 = vor.u32 %v8974_v3, %v7081_v4  ;;  %2720 = vmatpush.bf16.msrb.mxu1 %v6032_v6  ;;  %v6159_v3 = vld [vmem:[#allocation5 + $0x2c8] sm:$0xf]  ;;  %v6672_v10 = vor.u32 %v8875_v0, %v6671_v63 }
  0xb8   :  { %2689 = vmatmul.bf16.vlgmr.msra.gmra.mxu3 %v9697_v31  ;;  %v8747_v4 = vld [vmem:[#allocation5 + $0x2e4] sm:$0xf0] }
  0xb9   :  { %2714 = vmatpush.bf16.msrb.mxu3 %v7340_v11  ;;  %2701 = vmatpush.bf16.msrb.mxu2 %v7084_v15  ;;  %v5871_v5 = vld [vmem:[#allocation5 + $0x88] sm:$0xf]  ;;  %v6160_v11 = vor.u32 %v8747_v4, %v6159_v3  ;;  %v6292_v4 = vor.u32 %v8775_v57, %v6289_v60 }
  0xba   :  { %2747 = vmatpush.bf16.msrb.mxu0 %v6512_v24  ;;  %v8675_v6 = vld [vmem:[#allocation5 + $0xa4] sm:$0xf0] }
  0xbb   :  { %2721 = vmatpush.bf16.msrb.mxu1 %v6000_v23  ;;  %v6383_v7 = vld [vmem:[#allocation5 + $0x488] sm:$0xf]  ;;  %v5872_v14 = vor.u32 %v8675_v6, %v5871_v5  ;;  %v8703_v6 = vld [vmem:[#allocation5 + $0x18c] sm:$0xf] }
  0xbc   :  { %2702 = vmatmul.bf16.vlgmr.msrb.gmra.mxu2 %v9699_v36  ;;  %v8803_v9 = vld [vmem:[#allocation5 + $0x4a4] sm:$0xf0] }
  0xbd   :  { %2759 = vmatpush.bf16.msra.mxu2 %v6800_v19  ;;  %2733 = vmatpush.bf16.msra.mxu3 %v6288_v20  ;;  %v6639_v12 = vld [vmem:[#allocation5 + $0x688] sm:$0xf]  ;;  %v6384_v15 = vor.u32 %v8803_v9, %v6383_v7  ;;  %v6001_v7 = vld [vmem:[#allocation5 + $0x1a8] sm:$0xf0] }
  0xbe   :  { %2748 = vmatpush.bf16.msrb.mxu0 %v6480_v38  ;;  %v8867_v13 = vld [vmem:[#allocation5 + $0x6a4] sm:$0xf0]  ;;  %v8767_v9 = vld [vmem:[#allocation5 + $0x38c] sm:$0xf] }
  0xbf   :  { %2722 = vmatpush.bf16.msrb.mxu1 %v5968_v37  ;;  %v6127_v16 = vld [vmem:[#allocation5 + $0x288] sm:$0xf]  ;;  %v6640_v22 = vor.u32 %v8867_v13, %v6639_v12 }
  0xc0   :  { %v8739_v17 = vld [vmem:[#allocation5 + $0x2a4] sm:$0xf0] }
  0xc1   :  { %2760 = vmatpush.bf16.msra.mxu2 %v6768_v32  ;;  %2734 = vmatpush.bf16.msra.mxu3 %v6256_v33  ;;  %v5839_v18 = vld [vmem:[#allocation5 + $0x48] sm:$0xf]  ;;  %v6128_v23 = vor.u32 %v8739_v17, %v6127_v16 }
  0xc2   :  { %2749 = vmatpush.bf16.msrb.mxu0 %v6448_v51  ;;  %v8667_v19 = vld [vmem:[#allocation5 + $0x64] sm:$0xf0] }
  0xc3   :  { %2723 = vmatpush.bf16.msrb.mxu1 %v5936_v50  ;;  %v6351_v20 = vld [vmem:[#allocation5 + $0x448] sm:$0xf]  ;;  %v5840_v27 = vor.u32 %v8667_v19, %v5839_v18  ;;  %v8695_v19 = vld [vmem:[#allocation5 + $0x14c] sm:$0xf] }
  0xc4   :  { %v8795_v21 = vld [vmem:[#allocation5 + $0x464] sm:$0xf0] }
  0xc5   :  { %2761 = vmatpush.bf16.msra.mxu2 %v6736_v45  ;;  %2735 = vmatpush.bf16.msra.mxu3 %v6224_v47  ;;  %v6095_v24 = vld [vmem:[#allocation5 + $0x248] sm:$0xf]  ;;  %v6352_v28 = vor.u32 %v8795_v21, %v6351_v20  ;;  %v5969_v20 = vld [vmem:[#allocation5 + $0x168] sm:$0xf0] }
  0xc6   :  { %2750 = vmatpush.bf16.msrb.mxu0 %v6416_v2  ;;  %v6607_v25 = vld [vmem:[#allocation5 + $0x648] sm:$0xf]  ;;  %v8759_v21 = vld [vmem:[#allocation5 + $0x34c] sm:$0xf] }
  0xc7   :  { %2724 = vmatpush.bf16.msrb.mxu1 %v5904_v1  ;;  %v8859_v26 = vld [vmem:[#allocation5 + $0x664] sm:$0xf0]  ;;  %v6036_v1 = vor.u32 %v8711_v54, %v6033_v55 }
  0xc8   :  { %7366 = vmatmul.msk.bf16.vlgmr.msrb.gmra.mxu3 %vm2534_vm0, %v9693_v46  ;;  %v8731_v29 = vld [vmem:[#allocation5 + $0x264] sm:$0xf0]  ;;  %v6608_v37 = vor.u32 %v8859_v26, %v6607_v25  ;;  %v5972_v26 = vor.u32 %v8695_v19, %v5969_v20 }
  0xc9   :  { %2762 = vmatpush.bf16.msra.mxu2 %v6704_v61  ;;  %2736 = vmatpush.bf16.msra.mxu3 %v6192_v62  ;;  %v5807_v30 = vld [vmem:[#allocation5 + $0x8] sm:$0xf]  ;;  %v6096_v41 = vor.u32 %v8731_v29, %v6095_v24 }
  0xca   :  { %2751 = vmatpush.bf16.msrb.mxu0 %v6384_v15  ;;  %v8659_v32 = vld [vmem:[#allocation5 + $0x24] sm:$0xf0] }
  0xcb   :  { %2725 = vmatpush.bf16.msrb.mxu1 %v5872_v14  ;;  %v6319_v33 = vld [vmem:[#allocation5 + $0x408] sm:$0xf]  ;;  %v5808_v45 = vor.u32 %v8659_v32, %v5807_v30  ;;  %v6004_v14 = vor.u32 %v8703_v6, %v6001_v7  ;;  %v8687_v32 = vld [vmem:[#allocation5 + $0x10c] sm:$0xf] }
  0xcc   :  { %v8787_v34 = vld [vmem:[#allocation5 + $0x424] sm:$0xf0] }
  0xcd   :  { %2763 = vmatpush.bf16.msra.mxu2 %v6672_v10  ;;  %2737 = vmatpush.bf16.msra.mxu3 %v6160_v11  ;;  %v7055_v35 = vld [vmem:[#allocation5 + $0x9c8] sm:$0xf]  ;;  %v6320_v47 = vor.u32 %v8787_v34, %v6319_v33  ;;  %v6257_v10 = vld [vmem:[#allocation5 + $0x3a8] sm:$0xf0] }
  0xce   :  { %v8971_v38 = vld [vmem:[#allocation5 + $0x9e4] sm:$0xf0]  ;;  %2752 = vmatpush.bf16.msrb.mxu0 %v6352_v28  ;;  %v6260_v17 = vor.u32 %v8767_v9, %v6257_v10  ;;  %v5937_v33 = vld [vmem:[#allocation5 + $0x128] sm:$0xf0] }
  0xcf   :  { %v7343_v39 = vld [vmem:[#allocation5 + $0xc08] sm:$0xf]  ;;  %2726 = vmatpush.bf16.msrb.mxu1 %v5840_v27  ;;  %v7056_v51 = vor.u32 %v8971_v38, %v7055_v35  ;;  %v8751_v34 = vld [vmem:[#allocation5 + $0x30c] sm:$0xf] }
  0xd0   :  { %v9043_v40 = vld [vmem:[#allocation5 + $0xc24] sm:$0xf0]  ;;  %v6193_v35 = vld [vmem:[#allocation5 + $0x328] sm:$0xf0] }
  0xd1   :  { %2764 = vmatpush.bf16.msra.mxu2 %v6640_v22  ;;  %2738 = vmatpush.bf16.msra.mxu3 %v6128_v23  ;;  %v6063_v42 = vld [vmem:[#allocation5 + $0x208] sm:$0xf]  ;;  %v7344_v53 = vor.u32 %v9043_v40, %v7343_v39  ;;  %v6225_v22 = vld [vmem:[#allocation5 + $0x368] sm:$0xf0]  ;;  %v5940_v40 = vor.u32 %v8687_v32, %v5937_v33 }
  0xd2   :  { %v6575_v43 = vld [vmem:[#allocation5 + $0x608] sm:$0xf]  ;;  %2753 = vmatpush.bf16.msrb.mxu0 %v6320_v47  ;;  %v6228_v29 = vor.u32 %v8759_v21, %v6225_v22  ;;  %v5905_v47 = vld [vmem:[#allocation5 + $0xe8] sm:$0xf0] }
  0xd3   :  { %v8851_v44 = vld [vmem:[#allocation5 + $0x624] sm:$0xf0]  ;;  %2727 = vmatpush.bf16.msrb.mxu1 %v5808_v45  ;;  %v8679_v45 = vld [vmem:[#allocation5 + $0xcc] sm:$0xf] }
  0xd4   :  { %v8723_v48 = vld [vmem:[#allocation5 + $0x224] sm:$0xf0]  ;;  %v6576_v59 = vor.u32 %v8851_v44, %v6575_v43  ;;  %v6196_v43 = vor.u32 %v8751_v34, %v6193_v35  ;;  %v5908_v54 = vor.u32 %v8679_v45, %v5905_v47  ;;  %v8663_v10 = vld [vmem:[#allocation5 + $0x4c] sm:$0xf] }
  0xd5   :  { %v7311_v49 = vld [vmem:[#allocation5 + $0xbc8] sm:$0xf]  ;;  %2765 = vmatpush.bf16.msra.mxu2 %v6608_v37  ;;  %2739 = vmatpush.bf16.msra.mxu3 %v6096_v41  ;;  %v6064_v63 = vor.u32 %v8723_v48, %v6063_v42  ;;  %v8743_v48 = vld [vmem:[#allocation5 + $0x2cc] sm:$0xf] }
  0xd6   :  { %v9035_v50 = vld [vmem:[#allocation5 + $0xbe4] sm:$0xf0]  ;;  %2805 = vmatpush.bf16.msra.mxu0 %v7344_v53  ;;  %2728 = vmatmul.bf16.vlgmr.msrb.gmra.mxu1 %v9683_v56  ;;  %v8967_v32 = vld [vmem:[#allocation5 + $0x9cc] sm:$0xf] }
  0xd7   :  { %v7023_v61 = vld [vmem:[#allocation5 + $0x988] sm:$0xf]  ;;  %v7312_v0 = vor.u32 %v9035_v50, %v7311_v49  ;;  %2772 = vmatpush.bf16.msra.mxu1 %v7056_v51  ;;  %2754 = vmatmul.bf16.vlgmr.msrb.gmra.mxu0 %v9681_v52  ;;  %v6161_v49 = vld [vmem:[#allocation5 + $0x2e8] sm:$0xf0] }
  0xd8   :  { %v8963_v62 = vld [vmem:[#allocation5 + $0x9a4] sm:$0xf0]  ;;  %v7057_v33 = vld [vmem:[#allocation5 + $0x9e8] sm:$0xf0] }
  0xd9   :  { %v7279_v2 = vld [vmem:[#allocation5 + $0xb88] sm:$0xf]  ;;  %v7024_v5 = vor.u32 %v8963_v62, %v7023_v61  ;;  %2766 = vmatpush.bf16.msra.mxu2 %v6576_v59  ;;  %2740 = vmatpush.bf16.msra.mxu3 %v6064_v63  ;;  %v6164_v59 = vor.u32 %v8743_v48, %v6161_v49  ;;  %v8671_v61 = vld [vmem:[#allocation5 + $0x8c] sm:$0xf] }
  0xda   :  { %v9027_v3 = vld [vmem:[#allocation5 + $0xba4] sm:$0xf0]  ;;  %2824 = vmatpush.bf16.msrb.mxu0 %v6292_v4  ;;  %v5873_v62 = vld [vmem:[#allocation5 + $0xa8] sm:$0xf0] }
  0xdb   :  { %v6991_v11 = vld [vmem:[#allocation5 + $0x948] sm:$0xf]  ;;  %v7280_v13 = vor.u32 %v9027_v3, %v7279_v2  ;;  %2773 = vmatpush.bf16.msra.mxu1 %v7024_v5  ;;  %v8735_v63 = vld [vmem:[#allocation5 + $0x28c] sm:$0xf]  ;;  %v5876_v4 = vor.u32 %v8671_v61, %v5873_v62 }
  0xdc   :  { %v8955_v12 = vld [vmem:[#allocation5 + $0x964] sm:$0xf0]  ;;  %2741 = vmatmul.bf16.vlgmr.msra.gmra.mxu3 %v9689_v8  ;;  %2767 = vmatmul.bf16.vlgmr.msra.gmra.mxu2 %v9685_v58  ;;  %v9031_v34 = vld [vmem:[#allocation5 + $0xbcc] sm:$0xf] }
  0xdd   :  { %2785 = vmatpush.bf16.msrb.mxu3 %v7312_v0  ;;  %2811 = vmatpush.bf16.msrb.mxu2 %v6036_v1  ;;  %v7247_v15 = vld [vmem:[#allocation5 + $0xb48] sm:$0xf]  ;;  %v6992_v18 = vor.u32 %v8955_v12, %v6991_v11  ;;  %v6129_v0 = vld [vmem:[#allocation5 + $0x2a8] sm:$0xf0] }
  0xde   :  { %v9019_v16 = vld [vmem:[#allocation5 + $0xb64] sm:$0xf0]  ;;  %2825 = vmatpush.bf16.msrb.mxu0 %v6260_v17  ;;  %v6132_v7 = vor.u32 %v8735_v63, %v6129_v0  ;;  %v5841_v11 = vld [vmem:[#allocation5 + $0x68] sm:$0xf0] }
  0xdf   :  { %v6959_v23 = vld [vmem:[#allocation5 + $0x908] sm:$0xf]  ;;  %v7248_v25 = vor.u32 %v9019_v16, %v7247_v15  ;;  %2774 = vmatpush.bf16.msra.mxu1 %v6992_v18  ;;  %v8727_v12 = vld [vmem:[#allocation5 + $0x24c] sm:$0xf]  ;;  %v5844_v19 = vor.u32 %v8663_v10, %v5841_v11 }
  0xe0   :  { %v8947_v24 = vld [vmem:[#allocation5 + $0x924] sm:$0xf0]  ;;  %v8839_v16 = vld [vmem:[#allocation5 + $0x5cc] sm:$0xf] }
  0xe1   :  { %2786 = vmatpush.bf16.msrb.mxu3 %v7280_v13  ;;  %2812 = vmatpush.bf16.msrb.mxu2 %v6004_v14  ;;  %v7215_v27 = vld [vmem:[#allocation5 + $0xb08] sm:$0xf]  ;;  %v6960_v30 = vor.u32 %v8947_v24, %v6959_v23  ;;  %v6097_v13 = vld [vmem:[#allocation5 + $0x268] sm:$0xf0] }
  0xe2   :  { %v9011_v28 = vld [vmem:[#allocation5 + $0xb24] sm:$0xf0]  ;;  %2826 = vmatpush.bf16.msrb.mxu0 %v6228_v29  ;;  %v6545_v17 = vld [vmem:[#allocation5 + $0x5e8] sm:$0xf0]  ;;  %v6100_v22 = vor.u32 %v8727_v12, %v6097_v13 }
  0xe3   :  { %v6927_v37 = vld [vmem:[#allocation5 + $0x8c8] sm:$0xf]  ;;  %v7216_v39 = vor.u32 %v9011_v28, %v7215_v27  ;;  %2775 = vmatpush.bf16.msra.mxu1 %v6960_v30  ;;  %v8655_v24 = vld [vmem:[#allocation5 + $0xc] sm:$0xf]  ;;  %v6548_v27 = vor.u32 %v8839_v16, %v6545_v17 }
  0xe4   :  { %v8939_v38 = vld [vmem:[#allocation5 + $0x8e4] sm:$0xf0]  ;;  %v6065_v28 = vld [vmem:[#allocation5 + $0x228] sm:$0xf0] }
  0xe5   :  { %2787 = vmatpush.bf16.msrb.mxu3 %v7248_v25  ;;  %2813 = vmatpush.bf16.msrb.mxu2 %v5972_v26  ;;  %v7183_v41 = vld [vmem:[#allocation5 + $0xac8] sm:$0xf]  ;;  %v6928_v44 = vor.u32 %v8939_v38, %v6927_v37  ;;  %v5809_v25 = vld [vmem:[#allocation5 + $0x28] sm:$0xf0] }
  0xe6   :  { %v9003_v42 = vld [vmem:[#allocation5 + $0xae4] sm:$0xf0]  ;;  %2827 = vmatpush.bf16.msrb.mxu0 %v6196_v43  ;;  %v8719_v26 = vld [vmem:[#allocation5 + $0x20c] sm:$0xf]  ;;  %v7060_v43 = vor.u32 %v8967_v32, %v7057_v33 }
  0xe7   :  { %v6895_v50 = vld [vmem:[#allocation5 + $0x888] sm:$0xf]  ;;  %v7184_v53 = vor.u32 %v9003_v42, %v7183_v41  ;;  %2776 = vmatpush.bf16.msra.mxu1 %v6928_v44  ;;  %7367 = vmatmul.msk.bf16.vlgmr.msra.gmra.mxu0 %vm2534_vm0, %v9693_v46  ;;  %v8903_v29 = vld [vmem:[#allocation5 + $0x7cc] sm:$0xf]  ;;  %v6068_v41 = vor.u32 %v8719_v26, %v6065_v28 }
  0xe8   :  { %v8931_v51 = vld [vmem:[#allocation5 + $0x8a4] sm:$0xf0]  ;;  %v6801_v30 = vld [vmem:[#allocation5 + $0x7e8] sm:$0xf0] }
  0xe9   :  { %2788 = vmatpush.bf16.msrb.mxu3 %v7216_v39  ;;  %2814 = vmatpush.bf16.msrb.mxu2 %v5940_v40  ;;  %v7151_v55 = vld [vmem:[#allocation5 + $0xa88] sm:$0xf]  ;;  %v6896_v60 = vor.u32 %v8931_v51, %v6895_v50  ;;  %v7313_v37 = vld [vmem:[#allocation5 + $0xbe8] sm:$0xf0]  ;;  %v5812_v40 = vor.u32 %v8655_v24, %v5809_v25  ;;  %v6804_v42 = vor.u32 %v8903_v29, %v6801_v30  ;;  %v2560_v29 = vpop.f32.mrf.mxu1 }
  0xea   :  { %v8995_v57 = vld [vmem:[#allocation5 + $0xaa4] sm:$0xf0]  ;;  %2828 = vmatpush.bf16.msrb.mxu0 %v6164_v59  ;;  %v8831_v38 = vld [vmem:[#allocation5 + $0x58c] sm:$0xf]  ;;  %v7316_v47 = vor.u32 %v9031_v34, %v7313_v37 }
  0xeb   :  { %v6863_v1 = vld [vmem:[#allocation5 + $0x848] sm:$0xf]  ;;  %v7152_v3 = vor.u32 %v8995_v57, %v7151_v55  ;;  %2777 = vmatpush.bf16.msra.mxu1 %v6896_v60  ;;  %v6513_v39 = vld [vmem:[#allocation5 + $0x5a8] sm:$0xf0]  ;;  %v9718_v57 = vld [vmem:[#allocation7] sm:$0xff] }
  0xec   :  { %v8923_v2 = vld [vmem:[#allocation5 + $0x864] sm:$0xf0]  ;;  %v8895_v44 = vld [vmem:[#allocation5 + $0x78c] sm:$0xf]  ;;  %v6516_v48 = vor.u32 %v8831_v38, %v6513_v39 }
  0xed   :  { %2789 = vmatpush.bf16.msrb.mxu3 %v7184_v53  ;;  %2815 = vmatpush.bf16.msrb.mxu2 %v5908_v54  ;;  %v7119_v5 = vld [vmem:[#allocation5 + $0xa48] sm:$0xf]  ;;  %v6864_v9 = vor.u32 %v8923_v2, %v6863_v1  ;;  %v6769_v45 = vld [vmem:[#allocation5 + $0x7a8] sm:$0xf0]  ;;  %v2573_v39 = vpop.f32.mrf.mxu2 }
  0xee   :  { %v8987_v6 = vld [vmem:[#allocation5 + $0xa64] sm:$0xf0]  ;;  %2829 = vmatpush.bf16.msrb.mxu0 %v6132_v7  ;;  %v8959_v49 = vld [vmem:[#allocation5 + $0x98c] sm:$0xf]  ;;  %v6772_v59 = vor.u32 %v8895_v44, %v6769_v45  ;;  %v558_v7 = vperm.slane %v9718_v57, 0 }
  0xef   :  { %v6831_v14 = vld [vmem:[#allocation5 + $0x808] sm:$0xf]  ;;  %v7120_v18 = vor.u32 %v8987_v6, %v7119_v5  ;;  %2778 = vmatpush.bf16.msra.mxu1 %v6864_v9  ;;  %v7025_v50 = vld [vmem:[#allocation5 + $0x9a8] sm:$0xf0] }
  0xf0   :  { %v8915_v15 = vld [vmem:[#allocation5 + $0x824] sm:$0xf0]  ;;  %v9023_v51 = vld [vmem:[#allocation5 + $0xb8c] sm:$0xf]  ;;  %v7028_v60 = vor.u32 %v8959_v49, %v7025_v50 }
  0xf1   :  { %2790 = vmatpush.bf16.msrb.mxu3 %v7152_v3  ;;  %2816 = vmatpush.bf16.msrb.mxu2 %v5876_v4  ;;  %v7087_v20 = vld [vmem:[#allocation5 + $0xa08] sm:$0xf]  ;;  %v6832_v23 = vor.u32 %v8915_v15, %v6831_v14  ;;  %v7281_v53 = vld [vmem:[#allocation5 + $0xba8] sm:$0xf0] }
  0xf2   :  { %v8979_v21 = vld [vmem:[#allocation5 + $0xa24] sm:$0xf0]  ;;  %2830 = vmatpush.bf16.msrb.mxu0 %v6100_v22  ;;  %v8823_v54 = vld [vmem:[#allocation5 + $0x54c] sm:$0xf]  ;;  %v7284_v0 = vor.u32 %v9023_v51, %v7281_v53 }
  0xf3   :  { %v7088_v35 = vor.u32 %v8979_v21, %v7087_v20  ;;  %2779 = vmatpush.bf16.msra.mxu1 %v6832_v23  ;;  %v6481_v55 = vld [vmem:[#allocation5 + $0x568] sm:$0xf0] }
  0xf4   :  { %v8887_v61 = vld [vmem:[#allocation5 + $0x74c] sm:$0xf]  ;;  %v6484_v1 = vor.u32 %v8823_v54, %v6481_v55 }
  0xf5   :  { %2791 = vmatpush.bf16.msrb.mxu3 %v7120_v18  ;;  %2817 = vmatpush.bf16.msrb.mxu2 %v5844_v19  ;;  %v6737_v62 = vld [vmem:[#allocation5 + $0x768] sm:$0xf0]  ;;  %v2547_v18 = vpop.f32.mrf.mxu0 }
  0xf6   :  { %2780 = vmatmul.bf16.vlgmr.msra.gmra.mxu1 %v9697_v31  ;;  %2831 = vmatpush.bf16.msrb.mxu0 %v6068_v41  ;;  %v8951_v63 = vld [vmem:[#allocation5 + $0x94c] sm:$0xf]  ;;  %v6740_v9 = vor.u32 %v8887_v61, %v6737_v62  ;;  %v2548_v22 = vadd.f32 %v2547_v18, %v558_v7 }
  0xf7   :  { %2837 = vmatpush.bf16.msrb.mxu1 %v6548_v27  ;;  %v6993_v2 = vld [vmem:[#allocation5 + $0x968] sm:$0xf0] }
  0xf8   :  { %v9015_v3 = vld [vmem:[#allocation5 + $0xb4c] sm:$0xf]  ;;  %v6996_v10 = vor.u32 %v8951_v63, %v6993_v2  ;;  %v2561_v34 = vadd.f32 %v2560_v29, %v2548_v22  ;;  %v8780_v29 = vld [vmem:[#allocation5 + $0x3ec] sm:$0xf0] }
  0xf9   :  { %2792 = vmatpush.bf16.msrb.mxu3 %v7088_v35  ;;  %2818 = vmatpush.bf16.msrb.mxu2 %v5812_v40  ;;  %v7249_v4 = vld [vmem:[#allocation5 + $0xb68] sm:$0xf0] }
  0xfa   :  { %2876 = vmatpush.bf16.msra.mxu0 %v7316_v47  ;;  %v8815_v5 = vld [vmem:[#allocation5 + $0x50c] sm:$0xf]  ;;  %v7252_v13 = vor.u32 %v9015_v3, %v7249_v4 }
  0xfb   :  { %2838 = vmatpush.bf16.msrb.mxu1 %v6516_v48  ;;  %v6449_v6 = vld [vmem:[#allocation5 + $0x528] sm:$0xf0]  ;;  %2832 = vmatmul.bf16.vlgmr.msrb.gmra.mxu0 %v9689_v8 }
  0xfc   :  { %2793 = vmatmul.bf16.vlgmr.msrb.gmra.mxu3 %v9699_v36  ;;  %2819 = vmatmul.bf16.vlgmr.msrb.gmra.mxu2 %v9683_v56  ;;  %v8879_v11 = vld [vmem:[#allocation5 + $0x70c] sm:$0xf]  ;;  %v6452_v14 = vor.u32 %v8815_v5, %v6449_v6  ;;  %v2562_v6 = vpop.f32.mrf.mxu1 }
  0xfd   :  { %2850 = vmatpush.bf16.msra.mxu3 %v6804_v42  ;;  %2863 = vmatpush.bf16.msra.mxu2 %v7060_v43  ;;  %v6705_v12 = vld [vmem:[#allocation5 + $0x728] sm:$0xf0]  ;;  %v2574_v42 = vadd.f32 %v2573_v39, %v2561_v34  ;;  %v2586_v43 = vpop.f32.mrf.mxu3  ;;  %v2549_v53 = vpop.f32.mrf.mxu0  ;;  %v6807_v34 = vld [vmem:[#allocation5 + $0x7d0] sm:$0xf] }
  0xfe   :  { %2877 = vmatpush.bf16.msra.mxu0 %v7284_v0  ;;  %v8943_v15 = vld [vmem:[#allocation5 + $0x90c] sm:$0xf]  ;;  %v6708_v23 = vor.u32 %v8879_v11, %v6705_v12  ;;  %v2575_v11 = vpop.f32.mrf.mxu2  ;;  %v8900_v53 = vld [vmem:[#allocation5 + $0x7ac] sm:$0xf0] }
  0xff   :  { %2839 = vmatpush.bf16.msrb.mxu1 %v6484_v1  ;;  %v6961_v16 = vld [vmem:[#allocation5 + $0x928] sm:$0xf0]  ;;  %v9724_v54 = vadd.f32 %v2586_v43, %v2574_v42  ;;  %v8708_v42 = vld [vmem:[#allocation5 + $0x1ac] sm:$0xf0] }
 0x100   :  { %v9007_v17 = vld [vmem:[#allocation5 + $0xb0c] sm:$0xf]  ;;  %v6964_v24 = vor.u32 %v8943_v15, %v6961_v16  ;;  %v8692_v11 = vld [vmem:[#allocation5 + $0x12c] sm:$0xf0] }
 0x101   :  { %2851 = vmatpush.bf16.msra.mxu3 %v6772_v59  ;;  %2864 = vmatpush.bf16.msra.mxu2 %v7028_v60  ;;  %v7217_v19 = vld [vmem:[#allocation5 + $0xb28] sm:$0xf0] }
 0x102   :  { %v8807_v20 = vld [vmem:[#allocation5 + $0x4cc] sm:$0xf]  ;;  %2878 = vmatpush.bf16.msra.mxu0 %v7252_v13  ;;  %v7220_v27 = vor.u32 %v9007_v17, %v7217_v19 }
 0x103   :  { %v6417_v21 = vld [vmem:[#allocation5 + $0x4e8] sm:$0xf0]  ;;  %2840 = vmatpush.bf16.msrb.mxu1 %v6452_v14 }
 0x104   :  { %v8871_v25 = vld [vmem:[#allocation5 + $0x6cc] sm:$0xf]  ;;  %v6420_v28 = vor.u32 %v8807_v20, %v6417_v21 }
 0x105   :  { %2852 = vmatpush.bf16.msra.mxu3 %v6740_v9  ;;  %2865 = vmatpush.bf16.msra.mxu2 %v6996_v10  ;;  %v6673_v26 = vld [vmem:[#allocation5 + $0x6e8] sm:$0xf0]  ;;  %v2588_v18 = vpop.f32.mrf.mxu3 }
 0x106   :  { %v8935_v30 = vld [vmem:[#allocation5 + $0x8cc] sm:$0xf]  ;;  %v6676_v40 = vor.u32 %v8871_v25, %v6673_v26  ;;  %2879 = vmatpush.bf16.msra.mxu0 %v7220_v27  ;;  %v6039_v26 = vld [vmem:[#allocation5 + $0x1d0] sm:$0xf] }
 0x107   :  { %v6929_v32 = vld [vmem:[#allocation5 + $0x8e8] sm:$0xf0]  ;;  %2841 = vmatpush.bf16.msrb.mxu1 %v6420_v28  ;;  %v8716_v27 = vld [vmem:[#allocation5 + $0x1ec] sm:$0xf0] }
 0x108   :  { %v8999_v33 = vld [vmem:[#allocation5 + $0xacc] sm:$0xf]  ;;  %v6932_v41 = vor.u32 %v8935_v30, %v6929_v32  ;;  %v6295_v28 = vld [vmem:[#allocation5 + $0x3d0] sm:$0xf]  ;;  %v6040_v39 = vor.u32 %v8716_v27, %v6039_v26 }
 0x109   :  { %v7185_v35 = vld [vmem:[#allocation5 + $0xae8] sm:$0xf0]  ;;  %2853 = vmatpush.bf16.msra.mxu3 %v6708_v23  ;;  %2866 = vmatpush.bf16.msra.mxu2 %v6964_v24  ;;  %v6551_v30 = vld [vmem:[#allocation5 + $0x5d0] sm:$0xf] }
 0x10a   :  { %v8799_v37 = vld [vmem:[#allocation5 + $0x48c] sm:$0xf]  ;;  %v7188_v47 = vor.u32 %v8999_v33, %v7185_v35  ;;  %v8844_v33 = vld [vmem:[#allocation5 + $0x5ec] sm:$0xf0]  ;;  %v2599_v6 = vpop.f32.mrf.mxu0 }
 0x10b   :  { %v6385_v38 = vld [vmem:[#allocation5 + $0x4a8] sm:$0xf0]  ;;  %v8908_v35 = vld [vmem:[#allocation5 + $0x7ec] sm:$0xf0]  ;;  %v6552_v43 = vor.u32 %v8844_v33, %v6551_v30 }
 0x10c   :  { %v8863_v44 = vld [vmem:[#allocation5 + $0x68c] sm:$0xf]  ;;  %v6388_v48 = vor.u32 %v8799_v37, %v6385_v38  ;;  %2880 = vmatpush.bf16.msra.mxu0 %v7188_v47  ;;  %v8772_v47 = vld [vmem:[#allocation5 + $0x3ac] sm:$0xf0] }
 0x10d   :  { %v6641_v45 = vld [vmem:[#allocation5 + $0x6a8] sm:$0xf0]  ;;  %2854 = vmatpush.bf16.msra.mxu3 %v6676_v40  ;;  %2867 = vmatpush.bf16.msra.mxu2 %v6932_v41  ;;  %v6296_v40 = vor.u32 %v8780_v29, %v6295_v28  ;;  %v6007_v41 = vld [vmem:[#allocation5 + $0x190] sm:$0xf] }
 0x10e   :  { %v8927_v49 = vld [vmem:[#allocation5 + $0x88c] sm:$0xf]  ;;  %v6644_v61 = vor.u32 %v8863_v44, %v6641_v45  ;;  %2842 = vmatpush.bf16.msrb.mxu1 %v6388_v48  ;;  %v6808_v44 = vor.u32 %v8908_v35, %v6807_v34  ;;  %v6263_v45 = vld [vmem:[#allocation5 + $0x390] sm:$0xf]  ;;  %v559_v34 = vperm.slane %v9718_v57, 1 }
 0x10f   :  { %v6897_v50 = vld [vmem:[#allocation5 + $0x8a8] sm:$0xf0]  ;;  %v6519_v48 = vld [vmem:[#allocation5 + $0x590] sm:$0xf] }
 0x110   :  { %v8991_v51 = vld [vmem:[#allocation5 + $0xa8c] sm:$0xf]  ;;  %v6900_v62 = vor.u32 %v8927_v49, %v6897_v50  ;;  %v2625_v49 = vpop.f32.mrf.mxu2  ;;  %v8836_v50 = vld [vmem:[#allocation5 + $0x5ac] sm:$0xf0] }
 0x111   :  { %v7153_v55 = vld [vmem:[#allocation5 + $0xaa8] sm:$0xf0]  ;;  %2855 = vmatpush.bf16.msra.mxu3 %v6644_v61  ;;  %v8700_v61 = vld [vmem:[#allocation5 + $0x16c] sm:$0xf0] }
 0x112   :  { %v8791_v59 = vld [vmem:[#allocation5 + $0x44c] sm:$0xf]  ;;  %v7156_v1 = vor.u32 %v8991_v51, %v7153_v55  ;;  %2868 = vmatpush.bf16.msra.mxu2 %v6900_v62  ;;  %v6775_v51 = vld [vmem:[#allocation5 + $0x790] sm:$0xf]  ;;  %v6008_v55 = vor.u32 %v8708_v42, %v6007_v41  ;;  %v6520_v62 = vor.u32 %v8836_v50, %v6519_v48 }
 0x113   :  { %v6353_v60 = vld [vmem:[#allocation5 + $0x468] sm:$0xf0]  ;;  %v6455_v18 = vld [vmem:[#allocation5 + $0x510] sm:$0xf] }
 0x114   :  { %v8855_v63 = vld [vmem:[#allocation5 + $0x64c] sm:$0xf]  ;;  %v6356_v2 = vor.u32 %v8791_v59, %v6353_v60  ;;  %2881 = vmatpush.bf16.msra.mxu0 %v7156_v1  ;;  %v6264_v59 = vor.u32 %v8772_v47, %v6263_v45  ;;  %v5975_v60 = vld [vmem:[#allocation5 + $0x150] sm:$0xf] }
 0x115   :  { %v6609_v0 = vld [vmem:[#allocation5 + $0x668] sm:$0xf0]  ;;  %v8764_v1 = vld [vmem:[#allocation5 + $0x36c] sm:$0xf0] }
 0x116   :  { %v8919_v3 = vld [vmem:[#allocation5 + $0x84c] sm:$0xf]  ;;  %v6612_v14 = vor.u32 %v8855_v63, %v6609_v0  ;;  %2843 = vmatpush.bf16.msrb.mxu1 %v6356_v2  ;;  %v6776_v63 = vor.u32 %v8900_v53, %v6775_v51  ;;  %v6231_v0 = vld [vmem:[#allocation5 + $0x350] sm:$0xf] }
 0x117   :  { %v6865_v4 = vld [vmem:[#allocation5 + $0x868] sm:$0xf0]  ;;  %v6487_v2 = vld [vmem:[#allocation5 + $0x550] sm:$0xf] }
 0x118   :  { %v8983_v5 = vld [vmem:[#allocation5 + $0xa4c] sm:$0xf]  ;;  %v6868_v15 = vor.u32 %v8919_v3, %v6865_v4  ;;  %2856 = vmatpush.bf16.msra.mxu3 %v6612_v14  ;;  %v8828_v3 = vld [vmem:[#allocation5 + $0x56c] sm:$0xf0] }
 0x119   :  { %v7121_v7 = vld [vmem:[#allocation5 + $0xa68] sm:$0xf0]  ;;  %v6743_v4 = vld [vmem:[#allocation5 + $0x750] sm:$0xf] }
 0x11a   :  { %v8783_v9 = vld [vmem:[#allocation5 + $0x40c] sm:$0xf]  ;;  %v7124_v19 = vor.u32 %v8983_v5, %v7121_v7  ;;  %2869 = vmatpush.bf16.msra.mxu2 %v6868_v15  ;;  %v8892_v5 = vld [vmem:[#allocation5 + $0x76c] sm:$0xf0]  ;;  %v5976_v7 = vor.u32 %v8700_v61, %v5975_v60  ;;  %v2612_v15 = vpop.f32.mrf.mxu1 }
 0x11b   :  { %v6321_v10 = vld [vmem:[#allocation5 + $0x428] sm:$0xf0]  ;;  %v6744_v14 = vor.u32 %v8892_v5, %v6743_v4  ;;  %v5911_v26 = vld [vmem:[#allocation5 + $0xd0] sm:$0xf] }
 0x11c   :  { %v9039_v12 = vld [vmem:[#allocation5 + $0xc0c] sm:$0xf]  ;;  %v6324_v20 = vor.u32 %v8783_v9, %v6321_v10  ;;  %2882 = vmatpush.bf16.msra.mxu0 %v7124_v19  ;;  %v6232_v9 = vor.u32 %v8764_v1, %v6231_v0  ;;  %v5943_v10 = vld [vmem:[#allocation5 + $0x110] sm:$0xf]  ;;  %v2627_v19 = vpop.f32.mrf.mxu2 }
 0x11d   :  { %v7345_v13 = vld [vmem:[#allocation5 + $0xc28] sm:$0xf0]  ;;  %v8684_v27 = vld [vmem:[#allocation5 + $0xec] sm:$0xf0] }
 0x11e   :  { %v8847_v16 = vld [vmem:[#allocation5 + $0x60c] sm:$0xf]  ;;  %v7348_v25 = vor.u32 %v9039_v12, %v7345_v13  ;;  %2844 = vmatpush.bf16.msrb.mxu1 %v6324_v20  ;;  %v2600_v12 = vadd.f32 %v2599_v6, %v9724_v54  ;;  %v6488_v13 = vor.u32 %v8828_v3, %v6487_v2  ;;  %v8820_v20 = vld [vmem:[#allocation5 + $0x52c] sm:$0xf0] }
 0x11f   :  { %v6577_v17 = vld [vmem:[#allocation5 + $0x628] sm:$0xf0]  ;;  %v6167_v28 = vld [vmem:[#allocation5 + $0x2d0] sm:$0xf]  ;;  %v6456_v29 = vor.u32 %v8820_v20, %v6455_v18 }
 0x120   :  { %v8911_v21 = vld [vmem:[#allocation5 + $0x80c] sm:$0xf]  ;;  %v6580_v32 = vor.u32 %v8847_v16, %v6577_v17  ;;  %v6199_v16 = vld [vmem:[#allocation5 + $0x310] sm:$0xf] }
 0x121   :  { %v6833_v22 = vld [vmem:[#allocation5 + $0x828] sm:$0xf0]  ;;  %2845 = vmatmul.bf16.vlgmr.msrb.gmra.mxu1 %v9681_v52  ;;  %v8756_v17 = vld [vmem:[#allocation5 + $0x32c] sm:$0xf0] }
 0x122   :  { %v8975_v23 = vld [vmem:[#allocation5 + $0xa0c] sm:$0xf]  ;;  %v6836_v37 = vor.u32 %v8911_v21, %v6833_v22  ;;  %2896 = vmatpush.bf16.msra.mxu1 %v7348_v25  ;;  %2857 = vmatpush.bf16.msra.mxu3 %v6580_v32  ;;  %v6711_v21 = vld [vmem:[#allocation5 + $0x710] sm:$0xf]  ;;  %v6200_v25 = vor.u32 %v8756_v17, %v6199_v16  ;;  %v2614_v53 = vpop.f32.mrf.mxu1 }
 0x123   :  { %v7089_v24 = vld [vmem:[#allocation5 + $0xa28] sm:$0xf0]  ;;  %v8884_v22 = vld [vmem:[#allocation5 + $0x72c] sm:$0xf0] }
 0x124   :  { %v7092_v38 = vor.u32 %v8975_v23, %v7089_v24  ;;  %2870 = vmatpush.bf16.msra.mxu2 %v6836_v37  ;;  %v2613_v23 = vadd.f32 %v2612_v15, %v2600_v12  ;;  %v5944_v24 = vor.u32 %v8692_v11, %v5943_v10  ;;  %v6712_v30 = vor.u32 %v8884_v22, %v6711_v21  ;;  %v8748_v32 = vld [vmem:[#allocation5 + $0x2ec] sm:$0xf0]  ;;  %v2651_v61 = vpop.f32.mrf.mxu2 }
 0x125   :  { %2858 = vmatmul.bf16.vlgmr.msra.gmra.mxu3 %v9685_v58  ;;  %v6423_v33 = vld [vmem:[#allocation5 + $0x4d0] sm:$0xf] }
 0x126   :  { %2883 = vmatpush.bf16.msra.mxu0 %v7092_v38  ;;  %2902 = vmatpush.bf16.msrb.mxu3 %v6040_v39  ;;  %v9731_v54 = vadd.f32 %v2625_v49, %v2613_v23  ;;  %v8812_v35 = vld [vmem:[#allocation5 + $0x4ec] sm:$0xf0]  ;;  %v5912_v39 = vor.u32 %v8684_v27, %v5911_v26 }
 0x127   :  { %2915 = vmatpush.bf16.msrb.mxu1 %v6296_v40  ;;  %2871 = vmatmul.bf16.vlgmr.msra.gmra.mxu2 %v9697_v31  ;;  %v6679_v37 = vld [vmem:[#allocation5 + $0x6d0] sm:$0xf]  ;;  %v6168_v40 = vor.u32 %v8748_v32, %v6167_v28  ;;  %v6424_v45 = vor.u32 %v8812_v35, %v6423_v33  ;;  %v8712_v33 = vld [vmem:[#allocation5 + $0x1d4] sm:$0xf] }
 0x128   :  { %2928 = vmatpush.bf16.msrb.mxu2 %v6552_v43  ;;  %v8876_v38 = vld [vmem:[#allocation5 + $0x6ec] sm:$0xf0]  ;;  %v2638_v43 = vpop.f32.mrf.mxu3 }
 0x129   :  { %2884 = vmatmul.bf16.vlgmr.msra.gmra.mxu0 %v9699_v36  ;;  %v5879_v41 = vld [vmem:[#allocation5 + $0x90] sm:$0xf]  ;;  %v6680_v47 = vor.u32 %v8876_v38, %v6679_v37  ;;  %v2639_v51 = vadd.f32 %v2638_v43, %v559_v34  ;;  %v6041_v34 = vld [vmem:[#allocation5 + $0x1f0] sm:$0xf0] }
 0x12a   :  { %2941 = vmatpush.bf16.msrb.mxu0 %v6808_v44  ;;  %2903 = vmatpush.bf16.msrb.mxu3 %v6008_v55  ;;  %v8676_v42 = vld [vmem:[#allocation5 + $0xac] sm:$0xf0]  ;;  %v2601_v44 = vpop.f32.mrf.mxu0  ;;  %v6297_v43 = vld [vmem:[#allocation5 + $0x3f0] sm:$0xf0] }
 0x12b   :  { %2916 = vmatpush.bf16.msrb.mxu1 %v6264_v59  ;;  %v6135_v48 = vld [vmem:[#allocation5 + $0x290] sm:$0xf]  ;;  %v6044_v44 = vor.u32 %v8712_v33, %v6041_v34  ;;  %v8680_v34 = vld [vmem:[#allocation5 + $0xd4] sm:$0xf] }
 0x12c   :  { %2929 = vmatpush.bf16.msrb.mxu2 %v6520_v62  ;;  %v8740_v49 = vld [vmem:[#allocation5 + $0x2ac] sm:$0xf0]  ;;  %v9736_v62 = vadd.f32 %v2651_v61, %v2639_v51  ;;  %v2653_v26 = vpop.f32.mrf.mxu2  ;;  %v6009_v51 = vld [vmem:[#allocation5 + $0x1b0] sm:$0xf0] }
 0x12d   :  { %v6391_v50 = vld [vmem:[#allocation5 + $0x490] sm:$0xf]  ;;  %v6136_v0 = vor.u32 %v8740_v49, %v6135_v48  ;;  %v6265_v61 = vld [vmem:[#allocation5 + $0x3b0] sm:$0xf0] }
 0x12e   :  { %2942 = vmatpush.bf16.msrb.mxu0 %v6776_v63  ;;  %2904 = vmatpush.bf16.msrb.mxu3 %v5976_v7  ;;  %v8804_v55 = vld [vmem:[#allocation5 + $0x4ac] sm:$0xf0]  ;;  %v5880_v63 = vor.u32 %v8676_v42, %v5879_v41  ;;  %v8776_v42 = vld [vmem:[#allocation5 + $0x3d4] sm:$0xf] }
 0x12f   :  { %2917 = vmatpush.bf16.msrb.mxu1 %v6232_v9  ;;  %v6647_v59 = vld [vmem:[#allocation5 + $0x690] sm:$0xf]  ;;  %v6392_v3 = vor.u32 %v8804_v55, %v6391_v50  ;;  %v8704_v50 = vld [vmem:[#allocation5 + $0x194] sm:$0xf]  ;;  %v6300_v55 = vor.u32 %v8776_v42, %v6297_v43 }
 0x130   :  { %2930 = vmatpush.bf16.msrb.mxu2 %v6488_v13  ;;  %v8868_v60 = vld [vmem:[#allocation5 + $0x6ac] sm:$0xf0]  ;;  %v2640_v17 = vpop.f32.mrf.mxu3  ;;  %v8752_v26 = vld [vmem:[#allocation5 + $0x314] sm:$0xf] }
 0x131   :  { %7368 = vmatmul.msk.bf16.vlgmr.msra.gmra.mxu1 %vm2534_vm0, %v9693_v46  ;;  %v5847_v1 = vld [vmem:[#allocation5 + $0x50] sm:$0xf]  ;;  %v6648_v4 = vor.u32 %v8868_v60, %v6647_v59  ;;  %v8768_v60 = vld [vmem:[#allocation5 + $0x394] sm:$0xf] }
 0x132   :  { %2943 = vmatpush.bf16.msrb.mxu0 %v6744_v14  ;;  %2905 = vmatpush.bf16.msrb.mxu3 %v5944_v24  ;;  %v8668_v2 = vld [vmem:[#allocation5 + $0x6c] sm:$0xf0]  ;;  %v6169_v42 = vld [vmem:[#allocation5 + $0x2f0] sm:$0xf0] }
 0x133   :  { %2918 = vmatpush.bf16.msrb.mxu1 %v6200_v25  ;;  %v6103_v5 = vld [vmem:[#allocation5 + $0x250] sm:$0xf]  ;;  %v5848_v12 = vor.u32 %v8668_v2, %v5847_v1 }
 0x134   :  { %2931 = vmatpush.bf16.msrb.mxu2 %v6456_v29  ;;  %v8732_v6 = vld [vmem:[#allocation5 + $0x26c] sm:$0xf0] }
 0x135   :  { %v6359_v7 = vld [vmem:[#allocation5 + $0x450] sm:$0xf]  ;;  %v6104_v13 = vor.u32 %v8732_v6, %v6103_v5  ;;  %v8696_v5 = vld [vmem:[#allocation5 + $0x154] sm:$0xf] }
 0x136   :  { %2944 = vmatpush.bf16.msrb.mxu0 %v6712_v30  ;;  %2906 = vmatpush.bf16.msrb.mxu3 %v5912_v39  ;;  %v8796_v9 = vld [vmem:[#allocation5 + $0x46c] sm:$0xf0]  ;;  %v5977_v6 = vld [vmem:[#allocation5 + $0x170] sm:$0xf0] }
 0x137   :  { %2919 = vmatpush.bf16.msrb.mxu1 %v6168_v40  ;;  %v6615_v10 = vld [vmem:[#allocation5 + $0x650] sm:$0xf]  ;;  %v6360_v18 = vor.u32 %v8796_v9, %v6359_v7  ;;  %v6268_v7 = vor.u32 %v8768_v60, %v6265_v61  ;;  %v2664_v9 = vpop.f32.mrf.mxu0 }
 0x138   :  { %2932 = vmatpush.bf16.msrb.mxu2 %v6424_v45  ;;  %v8860_v11 = vld [vmem:[#allocation5 + $0x66c] sm:$0xf0] }
 0x139   :  { %v5815_v14 = vld [vmem:[#allocation5 + $0x10] sm:$0xf]  ;;  %v6616_v19 = vor.u32 %v8860_v11, %v6615_v10  ;;  %v8760_v11 = vld [vmem:[#allocation5 + $0x354] sm:$0xf] }
 0x13a   :  { %2945 = vmatpush.bf16.msrb.mxu0 %v6680_v47  ;;  %2907 = vmatpush.bf16.msrb.mxu3 %v5880_v63  ;;  %v8660_v15 = vld [vmem:[#allocation5 + $0x2c] sm:$0xf0] }
 0x13b   :  { %2920 = vmatpush.bf16.msrb.mxu1 %v6136_v0  ;;  %v6071_v16 = vld [vmem:[#allocation5 + $0x210] sm:$0xf]  ;;  %v5816_v30 = vor.u32 %v8660_v15, %v5815_v14  ;;  %v6012_v0 = vor.u32 %v8704_v50, %v6009_v51  ;;  %v5980_v15 = vor.u32 %v8696_v5, %v5977_v6 }
 0x13c   :  { %2933 = vmatpush.bf16.msrb.mxu2 %v6392_v3  ;;  %v8724_v20 = vld [vmem:[#allocation5 + $0x22c] sm:$0xf0] }
 0x13d   :  { %v6327_v21 = vld [vmem:[#allocation5 + $0x410] sm:$0xf]  ;;  %v6072_v32 = vor.u32 %v8724_v20, %v6071_v16 }
 0x13e   :  { %2946 = vmatpush.bf16.msrb.mxu0 %v6648_v4  ;;  %v8788_v22 = vld [vmem:[#allocation5 + $0x42c] sm:$0xf0]  ;;  %2908 = vmatpush.bf16.msrb.mxu3 %v5848_v12  ;;  %v6233_v12 = vld [vmem:[#allocation5 + $0x370] sm:$0xf0] }
 0x13f   :  { %v6583_v23 = vld [vmem:[#allocation5 + $0x610] sm:$0xf]  ;;  %2921 = vmatpush.bf16.msrb.mxu1 %v6104_v13  ;;  %v6328_v35 = vor.u32 %v8788_v22, %v6327_v21  ;;  %v2665_v13 = vadd.f32 %v2664_v9, %v9736_v62  ;;  %v8688_v21 = vld [vmem:[#allocation5 + $0x114] sm:$0xf]  ;;  %v2666_v43 = vpop.f32.mrf.mxu0  ;;  %v2703_v50 = vpop.f32.mrf.mxu2 }
 0x140   :  { %v8852_v24 = vld [vmem:[#allocation5 + $0x62c] sm:$0xf0]  ;;  %2934 = vmatpush.bf16.msrb.mxu2 %v6360_v18  ;;  %v5945_v22 = vld [vmem:[#allocation5 + $0x130] sm:$0xf0] }
 0x141   :  { %v7063_v25 = vld [vmem:[#allocation5 + $0x9d0] sm:$0xf]  ;;  %v6584_v37 = vor.u32 %v8852_v24, %v6583_v23  ;;  %v6236_v24 = vor.u32 %v8760_v11, %v6233_v12  ;;  %v5948_v62 = vor.u32 %v8688_v21, %v5945_v22  ;;  %v8664_v9 = vld [vmem:[#allocation5 + $0x54] sm:$0xf] }
 0x142   :  { %v8972_v27 = vld [vmem:[#allocation5 + $0x9ec] sm:$0xf0]  ;;  %2947 = vmatpush.bf16.msrb.mxu0 %v6616_v19  ;;  %2909 = vmatpush.bf16.msrb.mxu3 %v5816_v30  ;;  %v2677_v19 = vpop.f32.mrf.mxu1  ;;  %v8656_v22 = vld [vmem:[#allocation5 + $0x14] sm:$0xf] }
 0x143   :  { %v7319_v28 = vld [vmem:[#allocation5 + $0xbd0] sm:$0xf]  ;;  %v7064_v39 = vor.u32 %v8972_v27, %v7063_v25  ;;  %2922 = vmatpush.bf16.msrb.mxu1 %v6072_v32  ;;  %v2678_v23 = vadd.f32 %v2677_v19, %v2665_v13  ;;  %v6201_v27 = vld [vmem:[#allocation5 + $0x330] sm:$0xf0] }
 0x144   :  { %v9036_v29 = vld [vmem:[#allocation5 + $0xbec] sm:$0xf0]  ;;  %2935 = vmatpush.bf16.msrb.mxu2 %v6328_v35  ;;  %v5913_v35 = vld [vmem:[#allocation5 + $0xf0] sm:$0xf0] }
 0x145   :  { %v7351_v38 = vld [vmem:[#allocation5 + $0xc10] sm:$0xf]  ;;  %v7320_v40 = vor.u32 %v9036_v29, %v7319_v28  ;;  %2910 = vmatmul.bf16.vlgmr.msrb.gmra.mxu3 %v9683_v56 }
 0x146   :  { %v9044_v41 = vld [vmem:[#allocation5 + $0xc2c] sm:$0xf0]  ;;  %2948 = vmatpush.bf16.msrb.mxu0 %v6584_v37  ;;  %2954 = vmatpush.bf16.msra.mxu3 %v7064_v39  ;;  %v2690_v37 = vpop.f32.mrf.mxu3  ;;  %v6204_v39 = vor.u32 %v8752_v26, %v6201_v27  ;;  %v6553_v26 = vld [vmem:[#allocation5 + $0x5f0] sm:$0xf0] }
 0x147   :  { %v7031_v45 = vld [vmem:[#allocation5 + $0x990] sm:$0xf]  ;;  %v7352_v53 = vor.u32 %v9044_v41, %v7351_v38  ;;  %2967 = vmatpush.bf16.msra.mxu1 %v7320_v40  ;;  %2936 = vmatmul.bf16.vlgmr.msrb.gmra.mxu2 %v9681_v52  ;;  %v2691_v38 = vadd.f32 %v2690_v37, %v2678_v23  ;;  %v8744_v41 = vld [vmem:[#allocation5 + $0x2d4] sm:$0xf] }
 0x148   :  { %v8964_v47 = vld [vmem:[#allocation5 + $0x9ac] sm:$0xf0]  ;;  %2923 = vmatmul.bf16.vlgmr.msrb.gmra.mxu1 %v9689_v8  ;;  %v6172_v61 = vor.u32 %v8744_v41, %v6169_v42  ;;  %v5817_v23 = vld [vmem:[#allocation5 + $0x30] sm:$0xf0] }
 0x149   :  { %v7287_v48 = vld [vmem:[#allocation5 + $0xb90] sm:$0xf]  ;;  %v7032_v59 = vor.u32 %v8964_v47, %v7031_v45  ;;  %2987 = vmatpush.bf16.msra.mxu2 %v7352_v53  ;;  %2949 = vmatmul.bf16.vlgmr.msrb.gmra.mxu0 %v9685_v58  ;;  %v5916_v45 = vor.u32 %v8680_v34, %v5913_v35  ;;  %v8672_v53 = vld [vmem:[#allocation5 + $0x94] sm:$0xf]  ;;  %v9743_v60 = vadd.f32 %v2703_v50, %v2691_v38 }
 0x14a   :  { %v9028_v49 = vld [vmem:[#allocation5 + $0xbac] sm:$0xf0]  ;;  %2993 = vmatpush.bf16.msra.mxu0 %v6044_v44  ;;  %v8904_v27 = vld [vmem:[#allocation5 + $0x7d4] sm:$0xf]  ;;  %v5820_v34 = vor.u32 %v8656_v22, %v5817_v23  ;;  %v560_v22 = vperm.slane %v9718_v57, 2 }
 0x14b   :  { %v7288_v63 = vor.u32 %v9028_v49, %v7287_v48  ;;  %v6999_v1 = vld [vmem:[#allocation5 + $0x950] sm:$0xf]  ;;  %2955 = vmatpush.bf16.msra.mxu3 %v7032_v59  ;;  %v2679_v59 = vpop.f32.mrf.mxu1  ;;  %v8720_v35 = vld [vmem:[#allocation5 + $0x214] sm:$0xf] }
 0x14c   :  { %v8956_v2 = vld [vmem:[#allocation5 + $0x96c] sm:$0xf0]  ;;  %v6073_v37 = vld [vmem:[#allocation5 + $0x230] sm:$0xf0] }
 0x14d   :  { %v7255_v3 = vld [vmem:[#allocation5 + $0xb50] sm:$0xf]  ;;  %3006 = vmatpush.bf16.msrb.mxu2 %v6300_v55  ;;  %v7000_v10 = vor.u32 %v8956_v2, %v6999_v1  ;;  %2968 = vmatpush.bf16.msra.mxu1 %v7288_v63  ;;  %v5881_v55 = vld [vmem:[#allocation5 + $0xb0] sm:$0xf0]  ;;  %v6076_v50 = vor.u32 %v8720_v35, %v6073_v37 }
 0x14e   :  { %v9020_v4 = vld [vmem:[#allocation5 + $0xb6c] sm:$0xf0]  ;;  %2994 = vmatpush.bf16.msra.mxu0 %v6012_v0  ;;  %v8736_v0 = vld [vmem:[#allocation5 + $0x294] sm:$0xf]  ;;  %v2692_v11 = vpop.f32.mrf.mxu3 }
 0x14f   :  { %v7256_v14 = vor.u32 %v9020_v4, %v7255_v3  ;;  %v6967_v16 = vld [vmem:[#allocation5 + $0x910] sm:$0xf]  ;;  %2956 = vmatpush.bf16.msra.mxu3 %v7000_v10  ;;  %v6137_v1 = vld [vmem:[#allocation5 + $0x2b0] sm:$0xf0]  ;;  %v5884_v3 = vor.u32 %v8672_v53, %v5881_v55 }
 0x150   :  { %v8948_v17 = vld [vmem:[#allocation5 + $0x92c] sm:$0xf0]  ;;  %v5849_v10 = vld [vmem:[#allocation5 + $0x70] sm:$0xf0]  ;;  %v6140_v12 = vor.u32 %v8736_v0, %v6137_v1 }
 0x151   :  { %v7223_v18 = vld [vmem:[#allocation5 + $0xb10] sm:$0xf]  ;;  %3007 = vmatpush.bf16.msrb.mxu2 %v6268_v7  ;;  %v6968_v25 = vor.u32 %v8948_v17, %v6967_v16  ;;  %2969 = vmatpush.bf16.msra.mxu1 %v7256_v14  ;;  %v8728_v14 = vld [vmem:[#allocation5 + $0x254] sm:$0xf] }
 0x152   :  { %v9012_v20 = vld [vmem:[#allocation5 + $0xb2c] sm:$0xf0]  ;;  %2995 = vmatpush.bf16.msra.mxu0 %v5980_v15  ;;  %v6105_v15 = vld [vmem:[#allocation5 + $0x270] sm:$0xf0] }
 0x153   :  { %v7224_v28 = vor.u32 %v9012_v20, %v7223_v18  ;;  %v6935_v29 = vld [vmem:[#allocation5 + $0x8d0] sm:$0xf]  ;;  %2957 = vmatpush.bf16.msra.mxu3 %v6968_v25  ;;  %v5852_v18 = vor.u32 %v8664_v9, %v5849_v10  ;;  %v2705_v25 = vpop.f32.mrf.mxu2  ;;  %v7321_v41 = vld [vmem:[#allocation5 + $0xbf0] sm:$0xf0] }
 0x154   :  { %v8940_v30 = vld [vmem:[#allocation5 + $0x8ec] sm:$0xf0]  ;;  %v8832_v42 = vld [vmem:[#allocation5 + $0x594] sm:$0xf] }
 0x155   :  { %v7191_v32 = vld [vmem:[#allocation5 + $0xad0] sm:$0xf]  ;;  %3008 = vmatpush.bf16.msrb.mxu2 %v6236_v24  ;;  %v6936_v40 = vor.u32 %v8940_v30, %v6935_v29  ;;  %2970 = vmatpush.bf16.msra.mxu1 %v7224_v28  ;;  %v8840_v24 = vld [vmem:[#allocation5 + $0x5d4] sm:$0xf] }
 0x156   :  { %v9004_v33 = vld [vmem:[#allocation5 + $0xaec] sm:$0xf0]  ;;  %2996 = vmatpush.bf16.msra.mxu0 %v5948_v62  ;;  %v6809_v28 = vld [vmem:[#allocation5 + $0x7f0] sm:$0xf0]  ;;  %v6108_v62 = vor.u32 %v8728_v14, %v6105_v15  ;;  %v6556_v38 = vor.u32 %v8840_v24, %v6553_v26  ;;  %v2729_v24 = vpop.f32.mrf.mxu1 }
 0x157   :  { %v7192_v44 = vor.u32 %v9004_v33, %v7191_v32  ;;  %v6903_v47 = vld [vmem:[#allocation5 + $0x890] sm:$0xf]  ;;  %2958 = vmatpush.bf16.msra.mxu3 %v6936_v40  ;;  %7369 = vmatmul.msk.bf16.vlgmr.msra.gmra.mxu2 %vm2534_vm0, %v9693_v46  ;;  %v8968_v30 = vld [vmem:[#allocation5 + $0x9d4] sm:$0xf] }
 0x158   :  { %v8932_v48 = vld [vmem:[#allocation5 + $0x8ac] sm:$0xf0]  ;;  %v7065_v32 = vld [vmem:[#allocation5 + $0x9f0] sm:$0xf0] }
 0x159   :  { %v7159_v49 = vld [vmem:[#allocation5 + $0xa90] sm:$0xf]  ;;  %3009 = vmatpush.bf16.msrb.mxu2 %v6204_v39  ;;  %v6904_v63 = vor.u32 %v8932_v48, %v6903_v47  ;;  %2971 = vmatpush.bf16.msra.mxu1 %v7192_v44  ;;  %v6812_v39 = vor.u32 %v8904_v27, %v6809_v28  ;;  %v9032_v40 = vld [vmem:[#allocation5 + $0xbd4] sm:$0xf]  ;;  %v7068_v43 = vor.u32 %v8968_v30, %v7065_v32  ;;  %v2716_v44 = vpop.f32.mrf.mxu3 }
 0x15a   :  { %v8996_v51 = vld [vmem:[#allocation5 + $0xaac] sm:$0xf0]  ;;  %2997 = vmatpush.bf16.msra.mxu0 %v5916_v45  ;;  %v6521_v45 = vld [vmem:[#allocation5 + $0x5b0] sm:$0xf0]  ;;  %v7324_v55 = vor.u32 %v9032_v40, %v7321_v41 }
 0x15b   :  { %v7160_v2 = vor.u32 %v8996_v51, %v7159_v49  ;;  %v6871_v4 = vld [vmem:[#allocation5 + $0x850] sm:$0xf]  ;;  %2959 = vmatpush.bf16.msra.mxu3 %v6904_v63  ;;  %v8896_v47 = vld [vmem:[#allocation5 + $0x794] sm:$0xf]  ;;  %v9748_v49 = vadd.f32 %v2716_v44, %v9743_v60  ;;  %v6524_v59 = vor.u32 %v8832_v42, %v6521_v45 }
 0x15c   :  { %v8924_v5 = vld [vmem:[#allocation5 + $0x86c] sm:$0xf0]  ;;  %v6777_v48 = vld [vmem:[#allocation5 + $0x7b0] sm:$0xf0] }
 0x15d   :  { %v7127_v6 = vld [vmem:[#allocation5 + $0xa50] sm:$0xf]  ;;  %3010 = vmatpush.bf16.msrb.mxu2 %v6172_v61  ;;  %v6872_v13 = vor.u32 %v8924_v5, %v6871_v4  ;;  %2972 = vmatpush.bf16.msra.mxu1 %v7160_v2  ;;  %v8960_v51 = vld [vmem:[#allocation5 + $0x994] sm:$0xf]  ;;  %v6780_v61 = vor.u32 %v8896_v47, %v6777_v48 }
 0x15e   :  { %v8988_v7 = vld [vmem:[#allocation5 + $0xa6c] sm:$0xf0]  ;;  %2998 = vmatpush.bf16.msra.mxu0 %v5884_v3  ;;  %v7033_v53 = vld [vmem:[#allocation5 + $0x9b0] sm:$0xf0] }
 0x15f   :  { %v6839_v16 = vld [vmem:[#allocation5 + $0x810] sm:$0xf]  ;;  %v7128_v17 = vor.u32 %v8988_v7, %v7127_v6  ;;  %2960 = vmatpush.bf16.msra.mxu3 %v6872_v13  ;;  %v9024_v63 = vld [vmem:[#allocation5 + $0xb94] sm:$0xf]  ;;  %v7036_v2 = vor.u32 %v8960_v51, %v7033_v53  ;;  %v2755_v13 = vpop.f32.mrf.mxu0 }
 0x160   :  { %v8916_v19 = vld [vmem:[#allocation5 + $0x82c] sm:$0xf0]  ;;  %v7289_v0 = vld [vmem:[#allocation5 + $0xbb0] sm:$0xf0] }
 0x161   :  { %v7095_v20 = vld [vmem:[#allocation5 + $0xa10] sm:$0xf]  ;;  %3011 = vmatpush.bf16.msrb.mxu2 %v6140_v12  ;;  %v6840_v29 = vor.u32 %v8916_v19, %v6839_v16  ;;  %2973 = vmatpush.bf16.msra.mxu1 %v7128_v17  ;;  %v8824_v1 = vld [vmem:[#allocation5 + $0x554] sm:$0xf]  ;;  %v7292_v7 = vor.u32 %v9024_v63, %v7289_v0  ;;  %v2718_v16 = vpop.f32.mrf.mxu3  ;;  %v2731_v63 = vpop.f32.mrf.mxu1 }
 0x162   :  { %v8980_v21 = vld [vmem:[#allocation5 + $0xa2c] sm:$0xf0]  ;;  %2999 = vmatpush.bf16.msra.mxu0 %v5852_v18  ;;  %v6489_v3 = vld [vmem:[#allocation5 + $0x570] sm:$0xf0]  ;;  %v6271_v63 = vld [vmem:[#allocation5 + $0x398] sm:$0xf] }
 0x163   :  { %v7096_v33 = vor.u32 %v8980_v21, %v7095_v20  ;;  %2961 = vmatpush.bf16.msra.mxu3 %v6840_v29  ;;  %v8888_v60 = vld [vmem:[#allocation5 + $0x754] sm:$0xf]  ;;  %v6492_v9 = vor.u32 %v8824_v1, %v6489_v3 }
 0x164   :  { %v6745_v4 = vld [vmem:[#allocation5 + $0x770] sm:$0xf0] }
 0x165   :  { %3012 = vmatpush.bf16.msrb.mxu2 %v6108_v62  ;;  %2974 = vmatpush.bf16.msra.mxu1 %v7096_v33  ;;  %v8952_v5 = vld [vmem:[#allocation5 + $0x954] sm:$0xf]  ;;  %v6748_v10 = vor.u32 %v8888_v60, %v6745_v4 }
 0x166   :  { %3000 = vmatpush.bf16.msra.mxu0 %v5820_v34  ;;  %2962 = vmatmul.bf16.vlgmr.msra.gmra.mxu3 %v9697_v31  ;;  %v7001_v6 = vld [vmem:[#allocation5 + $0x970] sm:$0xf0]  ;;  %v2730_v34 = vadd.f32 %v2729_v24, %v560_v22 }
 0x167   :  { %3019 = vmatpush.bf16.msrb.mxu3 %v6556_v38  ;;  %v9016_v11 = vld [vmem:[#allocation5 + $0xb54] sm:$0xf]  ;;  %v7004_v15 = vor.u32 %v8952_v5, %v7001_v6  ;;  %v2757_v42 = vpop.f32.mrf.mxu0 }
 0x168   :  { %2975 = vmatmul.bf16.vlgmr.msra.gmra.mxu1 %v9699_v36  ;;  %v7257_v12 = vld [vmem:[#allocation5 + $0xb70] sm:$0xf0]  ;;  %v8781_v42 = vld [vmem:[#allocation5 + $0x3f4] sm:$0xf0] }
 0x169   :  { %3032 = vmatpush.bf16.msrb.mxu1 %v6812_v39  ;;  %3013 = vmatpush.bf16.msrb.mxu2 %v6076_v50  ;;  %v8816_v14 = vld [vmem:[#allocation5 + $0x514] sm:$0xf]  ;;  %v7260_v23 = vor.u32 %v9016_v11, %v7257_v12  ;;  %v2742_v45 = vpop.f32.mrf.mxu3 }
 0x16a   :  { %3045 = vmatpush.bf16.msrb.mxu0 %v7068_v43  ;;  %v6457_v17 = vld [vmem:[#allocation5 + $0x530] sm:$0xf0]  ;;  %v2743_v51 = vadd.f32 %v2742_v45, %v2730_v34 }
 0x16b   :  { %3001 = vmatmul.bf16.vlgmr.msra.gmra.mxu0 %v9683_v56  ;;  %3020 = vmatpush.bf16.msrb.mxu3 %v6524_v59  ;;  %v8880_v18 = vld [vmem:[#allocation5 + $0x714] sm:$0xf]  ;;  %v6460_v25 = vor.u32 %v8816_v14, %v6457_v17  ;;  %v2768_v59 = vpop.f32.mrf.mxu2 }
 0x16c   :  { %v6713_v19 = vld [vmem:[#allocation5 + $0x730] sm:$0xf0]  ;;  %3014 = vmatmul.bf16.vlgmr.msrb.gmra.mxu2 %v9689_v8 }
 0x16d   :  { %3058 = vmatpush.bf16.msra.mxu2 %v7324_v55  ;;  %3033 = vmatpush.bf16.msrb.mxu1 %v6780_v61  ;;  %v8944_v20 = vld [vmem:[#allocation5 + $0x914] sm:$0xf]  ;;  %v6716_v26 = vor.u32 %v8880_v18, %v6713_v19 }
 0x16e   :  { %3046 = vmatpush.bf16.msrb.mxu0 %v7036_v2  ;;  %v6969_v21 = vld [vmem:[#allocation5 + $0x930] sm:$0xf0]  ;;  %v2756_v2 = vadd.f32 %v2755_v13, %v2743_v51 }
 0x16f   :  { %3021 = vmatpush.bf16.msrb.mxu3 %v6492_v9  ;;  %v9008_v27 = vld [vmem:[#allocation5 + $0xb14] sm:$0xf]  ;;  %v6972_v29 = vor.u32 %v8944_v20, %v6969_v21  ;;  %v9757_v21 = vpop.f32.mrf.mxu0 }
 0x170   :  { %v7225_v28 = vld [vmem:[#allocation5 + $0xb30] sm:$0xf0] }
 0x171   :  { %3059 = vmatpush.bf16.msra.mxu2 %v7292_v7  ;;  %3034 = vmatpush.bf16.msrb.mxu1 %v6748_v10  ;;  %v8808_v62 = vld [vmem:[#allocation5 + $0x4d4] sm:$0xf]  ;;  %v7228_v57 = vor.u32 %v9008_v27, %v7225_v28  ;;  %v9755_v10 = vadd.f32 %v2768_v59, %v2756_v2  ;;  %v6047_v27 = vld [vmem:[#allocation5 + $0x1d8] sm:$0xf] }
 0x172   :  { %3047 = vmatpush.bf16.msrb.mxu0 %v7004_v15  ;;  %v6425_v30 = vld [vmem:[#allocation5 + $0x4f0] sm:$0xf0]  ;;  %v8717_v28 = vld [vmem:[#allocation5 + $0x1f4] sm:$0xf0] }
 0x173   :  { %v8872_v32 = vld [vmem:[#allocation5 + $0x6d4] sm:$0xf]  ;;  %3022 = vmatpush.bf16.msrb.mxu3 %v6460_v25  ;;  %v6428_v38 = vor.u32 %v8808_v62, %v6425_v30  ;;  %v6559_v62 = vld [vmem:[#allocation5 + $0x5d8] sm:$0xf] }
 0x174   :  { %v6681_v33 = vld [vmem:[#allocation5 + $0x6f0] sm:$0xf0]  ;;  %v8773_v2 = vld [vmem:[#allocation5 + $0x3b4] sm:$0xf0] }
 0x175   :  { %v8936_v35 = vld [vmem:[#allocation5 + $0x8d4] sm:$0xf]  ;;  %3060 = vmatpush.bf16.msra.mxu2 %v7260_v23  ;;  %3035 = vmatpush.bf16.msrb.mxu1 %v6716_v26  ;;  %v6684_v39 = vor.u32 %v8872_v32, %v6681_v33  ;;  %v2744_v26 = vpop.f32.mrf.mxu3  ;;  %v8845_v32 = vld [vmem:[#allocation5 + $0x5f4] sm:$0xf0] }
 0x176   :  { %v6937_v37 = vld [vmem:[#allocation5 + $0x8f0] sm:$0xf0]  ;;  %3048 = vmatpush.bf16.msrb.mxu0 %v6972_v29  ;;  %v2770_v29 = vpop.f32.mrf.mxu2  ;;  %v6560_v45 = vor.u32 %v8845_v32, %v6559_v62  ;;  %v8885_v32 = vld [vmem:[#allocation5 + $0x734] sm:$0xf0] }
 0x177   :  { %v9000_v40 = vld [vmem:[#allocation5 + $0xad4] sm:$0xf]  ;;  %v6940_v44 = vor.u32 %v8936_v35, %v6937_v37  ;;  %3023 = vmatpush.bf16.msrb.mxu3 %v6428_v38  ;;  %v8757_v29 = vld [vmem:[#allocation5 + $0x334] sm:$0xf0] }
 0x178   :  { %v7193_v41 = vld [vmem:[#allocation5 + $0xaf0] sm:$0xf0] }
 0x179   :  { %v8800_v43 = vld [vmem:[#allocation5 + $0x494] sm:$0xf]  ;;  %3061 = vmatpush.bf16.msra.mxu2 %v7228_v57  ;;  %v7196_v61 = vor.u32 %v9000_v40, %v7193_v41  ;;  %3036 = vmatpush.bf16.msrb.mxu1 %v6684_v39  ;;  %v6303_v39 = vld [vmem:[#allocation5 + $0x3d8] sm:$0xf]  ;;  %v6048_v41 = vor.u32 %v8717_v28, %v6047_v27 }
 0x17a   :  { %v6393_v47 = vld [vmem:[#allocation5 + $0x4b0] sm:$0xf0]  ;;  %3049 = vmatpush.bf16.msrb.mxu0 %v6940_v44  ;;  %v8909_v44 = vld [vmem:[#allocation5 + $0x7f4] sm:$0xf0]  ;;  %v6304_v59 = vor.u32 %v8781_v42, %v6303_v39  ;;  %v9764_v42 = vld [vmem:[#allocation7] sm:$0xff] }
 0x17b   :  { %v8864_v48 = vld [vmem:[#allocation5 + $0x694] sm:$0xf]  ;;  %v6396_v0 = vor.u32 %v8800_v43, %v6393_v47  ;;  %v6815_v43 = vld [vmem:[#allocation5 + $0x7d8] sm:$0xf] }
 0x17c   :  { %v6649_v50 = vld [vmem:[#allocation5 + $0x6b0] sm:$0xf0]  ;;  %v6207_v28 = vld [vmem:[#allocation5 + $0x318] sm:$0xf] }
 0x17d   :  { %v8928_v53 = vld [vmem:[#allocation5 + $0x894] sm:$0xf]  ;;  %v6652_v1 = vor.u32 %v8864_v48, %v6649_v50  ;;  %3062 = vmatpush.bf16.msra.mxu2 %v7196_v61  ;;  %3024 = vmatpush.bf16.msrb.mxu3 %v6396_v0  ;;  %v6015_v48 = vld [vmem:[#allocation5 + $0x198] sm:$0xf]  ;;  %v6816_v61 = vor.u32 %v8909_v44, %v6815_v43  ;;  %v2809_v0 = vpop.f32.mrf.mxu0  ;;  %v561_v43 = vperm.slane %v9764_v42, 3 }
 0x17e   :  { %v6905_v55 = vld [vmem:[#allocation5 + $0x8b0] sm:$0xf0]  ;;  %v8709_v50 = vld [vmem:[#allocation5 + $0x1b4] sm:$0xf0] }
 0x17f   :  { %v8992_v3 = vld [vmem:[#allocation5 + $0xa94] sm:$0xf]  ;;  %v6908_v5 = vor.u32 %v8928_v53, %v6905_v55  ;;  %3037 = vmatpush.bf16.msrb.mxu1 %v6652_v1  ;;  %v6527_v53 = vld [vmem:[#allocation5 + $0x598] sm:$0xf]  ;;  %v6016_v1 = vor.u32 %v8709_v50, %v6015_v48  ;;  %v2820_v0 = vpop.f32.mrf.mxu2 }
 0x180   :  { %v7161_v60 = vld [vmem:[#allocation5 + $0xab0] sm:$0xf0]  ;;  %v8837_v55 = vld [vmem:[#allocation5 + $0x5b4] sm:$0xf0] }
 0x181   :  { %v8792_v4 = vld [vmem:[#allocation5 + $0x454] sm:$0xf]  ;;  %v7164_v14 = vor.u32 %v8992_v3, %v7161_v60  ;;  %3050 = vmatpush.bf16.msrb.mxu0 %v6908_v5  ;;  %v6783_v3 = vld [vmem:[#allocation5 + $0x798] sm:$0xf] }
 0x182   :  { %v6361_v6 = vld [vmem:[#allocation5 + $0x470] sm:$0xf0]  ;;  %v8901_v60 = vld [vmem:[#allocation5 + $0x7b4] sm:$0xf0] }
 0x183   :  { %v8856_v7 = vld [vmem:[#allocation5 + $0x654] sm:$0xf]  ;;  %v6364_v17 = vor.u32 %v8792_v4, %v6361_v6  ;;  %3063 = vmatpush.bf16.msra.mxu2 %v7164_v14  ;;  %v6528_v4 = vor.u32 %v8837_v55, %v6527_v53  ;;  %v5983_v5 = vld [vmem:[#allocation5 + $0x158] sm:$0xf]  ;;  %v2794_v55 = vpop.f32.mrf.mxu3 }
 0x184   :  { %v6617_v9 = vld [vmem:[#allocation5 + $0x670] sm:$0xf0]  ;;  %v8701_v6 = vld [vmem:[#allocation5 + $0x174] sm:$0xf0] }
 0x185   :  { %v8920_v11 = vld [vmem:[#allocation5 + $0x854] sm:$0xf]  ;;  %v6620_v13 = vor.u32 %v8856_v7, %v6617_v9  ;;  %3025 = vmatpush.bf16.msrb.mxu3 %v6364_v17  ;;  %v6495_v7 = vld [vmem:[#allocation5 + $0x558] sm:$0xf] }
 0x186   :  { %v6873_v12 = vld [vmem:[#allocation5 + $0x870] sm:$0xf0]  ;;  %v8829_v9 = vld [vmem:[#allocation5 + $0x574] sm:$0xf0] }
 0x187   :  { %v8984_v15 = vld [vmem:[#allocation5 + $0xa54] sm:$0xf]  ;;  %v6876_v22 = vor.u32 %v8920_v11, %v6873_v12  ;;  %3038 = vmatpush.bf16.msrb.mxu1 %v6620_v13  ;;  %v6272_v11 = vor.u32 %v8773_v2, %v6271_v63  ;;  %v6784_v12 = vor.u32 %v8901_v60, %v6783_v3  ;;  %v6239_v14 = vld [vmem:[#allocation5 + $0x358] sm:$0xf]  ;;  %v2821_v60 = vadd.f32 %v2820_v0, %v561_v43 }
 0x188   :  { %v7129_v16 = vld [vmem:[#allocation5 + $0xa70] sm:$0xf0]  ;;  %v8765_v17 = vld [vmem:[#allocation5 + $0x374] sm:$0xf0] }
 0x189   :  { %v8784_v18 = vld [vmem:[#allocation5 + $0x414] sm:$0xf]  ;;  %v7132_v30 = vor.u32 %v8984_v15, %v7129_v16  ;;  %3051 = vmatpush.bf16.msrb.mxu0 %v6876_v22  ;;  %v2781_v15 = vpop.f32.mrf.mxu1  ;;  %v5984_v16 = vor.u32 %v8701_v6, %v5983_v5  ;;  %v6751_v13 = vld [vmem:[#allocation5 + $0x758] sm:$0xf]  ;;  %v6240_v26 = vor.u32 %v8765_v17, %v6239_v14 }
 0x18a   :  { %v6329_v19 = vld [vmem:[#allocation5 + $0x430] sm:$0xf0]  ;;  %v5951_v22 = vld [vmem:[#allocation5 + $0x118] sm:$0xf] }
 0x18b   :  { %v8848_v20 = vld [vmem:[#allocation5 + $0x614] sm:$0xf]  ;;  %v6332_v35 = vor.u32 %v8784_v18, %v6329_v19  ;;  %3064 = vmatpush.bf16.msra.mxu2 %v7132_v30  ;;  %v8893_v18 = vld [vmem:[#allocation5 + $0x774] sm:$0xf0]  ;;  %v2782_v19 = vadd.f32 %v2781_v15, %v9755_v10 }
 0x18c   :  { %v6585_v23 = vld [vmem:[#allocation5 + $0x630] sm:$0xf0]  ;;  %v6752_v27 = vor.u32 %v8893_v18, %v6751_v13  ;;  %v6719_v30 = vld [vmem:[#allocation5 + $0x718] sm:$0xf] }
 0x18d   :  { %v8912_v24 = vld [vmem:[#allocation5 + $0x814] sm:$0xf]  ;;  %v6588_v37 = vor.u32 %v8848_v20, %v6585_v23  ;;  %3026 = vmatpush.bf16.msrb.mxu3 %v6332_v35  ;;  %v6496_v20 = vor.u32 %v8829_v9, %v6495_v7  ;;  %v8693_v23 = vld [vmem:[#allocation5 + $0x134] sm:$0xf0]  ;;  %v2833_v35 = vpop.f32.mrf.mxu0  ;;  %v6720_v39 = vor.u32 %v8885_v32, %v6719_v30  ;;  %v2796_v32 = vpop.f32.mrf.mxu3 }
 0x18e   :  { %v6841_v25 = vld [vmem:[#allocation5 + $0x830] sm:$0xf0]  ;;  %v5952_v62 = vor.u32 %v8693_v23, %v5951_v22  ;;  %v8677_v53 = vld [vmem:[#allocation5 + $0xb4] sm:$0xf0]  ;;  %v9770_v15 = vadd.f32 %v2833_v35, %v2821_v60 }
 0x18f   :  { %v9040_v33 = vld [vmem:[#allocation5 + $0xc14] sm:$0xf]  ;;  %v6844_v40 = vor.u32 %v8912_v24, %v6841_v25  ;;  %3039 = vmatpush.bf16.msrb.mxu1 %v6588_v37  ;;  %v6463_v24 = vld [vmem:[#allocation5 + $0x518] sm:$0xf] }
 0x190   :  { %v7353_v34 = vld [vmem:[#allocation5 + $0xc30] sm:$0xf0]  ;;  %3027 = vmatmul.bf16.vlgmr.msrb.gmra.mxu3 %v9681_v52  ;;  %v8821_v25 = vld [vmem:[#allocation5 + $0x534] sm:$0xf0] }
 0x191   :  { %v8976_v57 = vld [vmem:[#allocation5 + $0xa14] sm:$0xf]  ;;  %v7356_v47 = vor.u32 %v9040_v33, %v7353_v34  ;;  %3052 = vmatpush.bf16.msrb.mxu0 %v6844_v40  ;;  %v6464_v10 = vor.u32 %v8821_v25, %v6463_v24  ;;  %v5919_v33 = vld [vmem:[#allocation5 + $0xd8] sm:$0xf]  ;;  %v2783_v48 = vpop.f32.mrf.mxu1 }
 0x192   :  { %v7097_v38 = vld [vmem:[#allocation5 + $0xa30] sm:$0xf0]  ;;  %3040 = vmatmul.bf16.vlgmr.msrb.gmra.mxu1 %v9685_v58  ;;  %v8685_v34 = vld [vmem:[#allocation5 + $0xf4] sm:$0xf0]  ;;  %v8713_v48 = vld [vmem:[#allocation5 + $0x1dc] sm:$0xf] }
 0x193   :  { %v7100_v51 = vor.u32 %v8976_v57, %v7097_v38  ;;  %3084 = vmatpush.bf16.msra.mxu1 %v6048_v41  ;;  %3078 = vmatpush.bf16.msra.mxu3 %v7356_v47  ;;  %v6431_v37 = vld [vmem:[#allocation5 + $0x4d8] sm:$0xf]  ;;  %v6208_v38 = vor.u32 %v8757_v29, %v6207_v28  ;;  %v5920_v44 = vor.u32 %v8685_v34, %v5919_v33 }
 0x194   :  { %3053 = vmatmul.bf16.vlgmr.msrb.gmra.mxu0 %v9697_v31  ;;  %v8813_v57 = vld [vmem:[#allocation5 + $0x4f4] sm:$0xf0] }
 0x195   :  { %3110 = vmatpush.bf16.msra.mxu0 %v6560_v45  ;;  %3065 = vmatpush.bf16.msra.mxu2 %v7100_v51  ;;  %v6175_v40 = vld [vmem:[#allocation5 + $0x2d8] sm:$0xf]  ;;  %v6432_v50 = vor.u32 %v8813_v57, %v6431_v37 }
 0x196   :  { %v8749_v41 = vld [vmem:[#allocation5 + $0x2f4] sm:$0xf0] }
 0x197   :  { %3097 = vmatpush.bf16.msrb.mxu3 %v6304_v59  ;;  %3085 = vmatpush.bf16.msra.mxu1 %v6016_v1  ;;  %v6687_v45 = vld [vmem:[#allocation5 + $0x6d8] sm:$0xf]  ;;  %v6176_v59 = vor.u32 %v8749_v41, %v6175_v40  ;;  %v2795_v1 = vadd.f32 %v2794_v55, %v2782_v19  ;;  %v6305_v55 = vld [vmem:[#allocation5 + $0x3f8] sm:$0xf0] }
 0x198   :  { %3066 = vmatmul.bf16.vlgmr.msra.gmra.mxu2 %v9699_v36  ;;  %v8877_v47 = vld [vmem:[#allocation5 + $0x6f4] sm:$0xf0] }
 0x199   :  { %3123 = vmatpush.bf16.msrb.mxu2 %v6816_v61  ;;  %3111 = vmatpush.bf16.msra.mxu0 %v6528_v4  ;;  %v5887_v51 = vld [vmem:[#allocation5 + $0x98] sm:$0xf]  ;;  %v6688_v2 = vor.u32 %v8877_v47, %v6687_v45  ;;  %v9768_v9 = vadd.f32 %v9757_v21, %v2795_v1 }
 0x19a   :  { %v6399_v61 = vld [vmem:[#allocation5 + $0x498] sm:$0xf]  ;;  %v5888_v4 = vor.u32 %v8677_v53, %v5887_v51  ;;  %v6049_v51 = vld [vmem:[#allocation5 + $0x1f8] sm:$0xf0] }
 0x19b   :  { %3098 = vmatpush.bf16.msrb.mxu3 %v6272_v11  ;;  %3086 = vmatpush.bf16.msra.mxu1 %v5984_v16  ;;  %v8805_v63 = vld [vmem:[#allocation5 + $0x4b4] sm:$0xf0]  ;;  %v2835_v16 = vpop.f32.mrf.mxu0  ;;  %v8777_v53 = vld [vmem:[#allocation5 + $0x3dc] sm:$0xf] }
 0x19c   :  { %v6143_v3 = vld [vmem:[#allocation5 + $0x298] sm:$0xf]  ;;  %v6400_v11 = vor.u32 %v8805_v63, %v6399_v61 }
 0x19d   :  { %3124 = vmatpush.bf16.msrb.mxu2 %v6784_v12  ;;  %3112 = vmatpush.bf16.msra.mxu0 %v6496_v20  ;;  %v8741_v5 = vld [vmem:[#allocation5 + $0x2b4] sm:$0xf0] }
 0x19e   :  { %v6655_v6 = vld [vmem:[#allocation5 + $0x698] sm:$0xf]  ;;  %v6144_v18 = vor.u32 %v8741_v5, %v6143_v3  ;;  %v6308_v3 = vor.u32 %v8777_v53, %v6305_v55  ;;  %v8705_v5 = vld [vmem:[#allocation5 + $0x19c] sm:$0xf] }
 0x19f   :  { %3099 = vmatpush.bf16.msrb.mxu3 %v6240_v26  ;;  %3087 = vmatpush.bf16.msra.mxu1 %v5952_v62  ;;  %v8869_v7 = vld [vmem:[#allocation5 + $0x6b4] sm:$0xf0]  ;;  %v5921_v53 = vld [vmem:[#allocation5 + $0xf8] sm:$0xf0] }
 0x1a0   :  { %v5855_v12 = vld [vmem:[#allocation5 + $0x58] sm:$0xf]  ;;  %7370 = vmatmul.msk.bf16.vlgmr.msra.gmra.mxu3 %vm2534_vm0, %v9693_v46  ;;  %v6656_v19 = vor.u32 %v8869_v7, %v6655_v6  ;;  %v6017_v7 = vld [vmem:[#allocation5 + $0x1b8] sm:$0xf0] }
 0x1a1   :  { %3125 = vmatpush.bf16.msrb.mxu2 %v6752_v27  ;;  %3113 = vmatpush.bf16.msra.mxu0 %v6464_v10  ;;  %v8669_v14 = vld [vmem:[#allocation5 + $0x74] sm:$0xf0]  ;;  %v2822_v10 = vpop.f32.mrf.mxu2  ;;  %v8745_v55 = vld [vmem:[#allocation5 + $0x2dc] sm:$0xf] }
 0x1a2   :  { %v6367_v17 = vld [vmem:[#allocation5 + $0x458] sm:$0xf]  ;;  %v5856_v22 = vor.u32 %v8669_v14, %v5855_v12  ;;  %v6273_v12 = vld [vmem:[#allocation5 + $0x3b8] sm:$0xf0] }
 0x1a3   :  { %3100 = vmatpush.bf16.msrb.mxu3 %v6208_v38  ;;  %3088 = vmatpush.bf16.msra.mxu1 %v5920_v44  ;;  %v8797_v13 = vld [vmem:[#allocation5 + $0x474] sm:$0xf0] }
 0x1a4   :  { %v6111_v20 = vld [vmem:[#allocation5 + $0x258] sm:$0xf]  ;;  %v6368_v25 = vor.u32 %v8797_v13, %v6367_v17  ;;  %v6020_v13 = vor.u32 %v8705_v5, %v6017_v7  ;;  %v8673_v7 = vld [vmem:[#allocation5 + $0x9c] sm:$0xf] }
 0x1a5   :  { %3126 = vmatpush.bf16.msrb.mxu2 %v6720_v39  ;;  %3114 = vmatpush.bf16.msra.mxu0 %v6432_v50  ;;  %v8733_v21 = vld [vmem:[#allocation5 + $0x274] sm:$0xf0] }
 0x1a6   :  { %v6623_v23 = vld [vmem:[#allocation5 + $0x658] sm:$0xf]  ;;  %v6112_v33 = vor.u32 %v8733_v21, %v6111_v20  ;;  %v2846_v21 = vpop.f32.mrf.mxu1 }
 0x1a7   :  { %3101 = vmatpush.bf16.msrb.mxu3 %v6176_v59  ;;  %3089 = vmatpush.bf16.msra.mxu1 %v5888_v4  ;;  %v8861_v24 = vld [vmem:[#allocation5 + $0x674] sm:$0xf0] }
 0x1a8   :  { %v5823_v26 = vld [vmem:[#allocation5 + $0x18] sm:$0xf]  ;;  %v6624_v34 = vor.u32 %v8861_v24, %v6623_v23  ;;  %v5985_v24 = vld [vmem:[#allocation5 + $0x178] sm:$0xf0] }
 0x1a9   :  { %3127 = vmatpush.bf16.msrb.mxu2 %v6688_v2  ;;  %3115 = vmatpush.bf16.msra.mxu0 %v6400_v11  ;;  %v8661_v27 = vld [vmem:[#allocation5 + $0x34] sm:$0xf0]  ;;  %v6052_v2 = vor.u32 %v8713_v48, %v6049_v51  ;;  %v8769_v11 = vld [vmem:[#allocation5 + $0x39c] sm:$0xf] }
 0x1aa   :  { %v6335_v28 = vld [vmem:[#allocation5 + $0x418] sm:$0xf]  ;;  %v5824_v38 = vor.u32 %v8661_v27, %v5823_v26  ;;  %v6241_v26 = vld [vmem:[#allocation5 + $0x378] sm:$0xf0]  ;;  %v2847_v27 = vadd.f32 %v2846_v21, %v9770_v15 }
 0x1ab   :  { %v8789_v62 = vld [vmem:[#allocation5 + $0x434] sm:$0xf0]  ;;  %3102 = vmatpush.bf16.msrb.mxu3 %v6144_v18  ;;  %3090 = vmatpush.bf16.msra.mxu1 %v5856_v22  ;;  %v6276_v18 = vor.u32 %v8769_v11, %v6273_v12  ;;  %v8697_v22 = vld [vmem:[#allocation5 + $0x15c] sm:$0xf] }
 0x1ac   :  { %v7071_v29 = vld [vmem:[#allocation5 + $0x9d8] sm:$0xf]  ;;  %v6336_v43 = vor.u32 %v8789_v62, %v6335_v28  ;;  %v6209_v15 = vld [vmem:[#allocation5 + $0x338] sm:$0xf0] }
 0x1ad   :  { %v8973_v30 = vld [vmem:[#allocation5 + $0x9f4] sm:$0xf0]  ;;  %3128 = vmatpush.bf16.msrb.mxu2 %v6656_v19  ;;  %3116 = vmatpush.bf16.msra.mxu0 %v6368_v25  ;;  %v8761_v25 = vld [vmem:[#allocation5 + $0x35c] sm:$0xf] }
 0x1ae   :  { %v6079_v35 = vld [vmem:[#allocation5 + $0x218] sm:$0xf]  ;;  %v7072_v44 = vor.u32 %v8973_v30, %v7071_v29  ;;  %v5988_v30 = vor.u32 %v8697_v22, %v5985_v24  ;;  %v6244_v32 = vor.u32 %v8761_v25, %v6241_v26  ;;  %v8681_v48 = vld [vmem:[#allocation5 + $0xdc] sm:$0xf] }
 0x1af   :  { %v7359_v37 = vld [vmem:[#allocation5 + $0xc18] sm:$0xf]  ;;  %3103 = vmatpush.bf16.msrb.mxu3 %v6112_v33  ;;  %3091 = vmatpush.bf16.msra.mxu1 %v5824_v38  ;;  %v5889_v12 = vld [vmem:[#allocation5 + $0xb8] sm:$0xf0] }
 0x1b0   :  { %v9045_v57 = vld [vmem:[#allocation5 + $0xc34] sm:$0xf0]  ;;  %v5892_v21 = vor.u32 %v8673_v7, %v5889_v12  ;;  %v8665_v26 = vld [vmem:[#allocation5 + $0x5c] sm:$0xf] }
 0x1b1   :  { %v8725_v39 = vld [vmem:[#allocation5 + $0x234] sm:$0xf0]  ;;  %v7360_v50 = vor.u32 %v9045_v57, %v7359_v37  ;;  %3129 = vmatpush.bf16.msrb.mxu2 %v6624_v34  ;;  %3117 = vmatpush.bf16.msra.mxu0 %v6336_v43  ;;  %v8689_v34 = vld [vmem:[#allocation5 + $0x11c] sm:$0xf] }
 0x1b2   :  { %v6591_v40 = vld [vmem:[#allocation5 + $0x618] sm:$0xf]  ;;  %v6080_v59 = vor.u32 %v8725_v39, %v6079_v35  ;;  %3092 = vmatmul.bf16.vlgmr.msra.gmra.mxu1 %v9683_v56  ;;  %v5953_v37 = vld [vmem:[#allocation5 + $0x138] sm:$0xf0] }
 0x1b3   :  { %v8853_v41 = vld [vmem:[#allocation5 + $0x634] sm:$0xf0]  ;;  %3136 = vmatpush.bf16.msrb.mxu1 %v7072_v44  ;;  %v8753_v57 = vld [vmem:[#allocation5 + $0x31c] sm:$0xf]  ;;  %v5956_v43 = vor.u32 %v8689_v34, %v5953_v37 }
 0x1b4   :  { %v7327_v45 = vld [vmem:[#allocation5 + $0xbd8] sm:$0xf]  ;;  %v6592_v61 = vor.u32 %v8853_v41, %v6591_v40  ;;  %3104 = vmatpush.bf16.msrb.mxu3 %v6080_v59  ;;  %3118 = vmatmul.bf16.vlgmr.msra.gmra.mxu0 %v9681_v52  ;;  %v2885_v40 = vpop.f32.mrf.mxu0  ;;  %v6212_v44 = vor.u32 %v8753_v57, %v6209_v15  ;;  %v6177_v59 = vld [vmem:[#allocation5 + $0x2f8] sm:$0xf0] }
 0x1b5   :  { %v9037_v47 = vld [vmem:[#allocation5 + $0xbf4] sm:$0xf0]  ;;  %3169 = vmatpush.bf16.msrb.mxu0 %v7360_v50  ;;  %v2848_v50 = vpop.f32.mrf.mxu1  ;;  %v6561_v37 = vld [vmem:[#allocation5 + $0x5f8] sm:$0xf0] }
 0x1b6   :  { %v7039_v63 = vld [vmem:[#allocation5 + $0x998] sm:$0xf]  ;;  %v7328_v1 = vor.u32 %v9037_v47, %v7327_v45  ;;  %3130 = vmatpush.bf16.msrb.mxu2 %v6592_v61  ;;  %v6785_v12 = vld [vmem:[#allocation5 + $0x7b8] sm:$0xf0] }
 0x1b7   :  { %v8965_v0 = vld [vmem:[#allocation5 + $0x9b4] sm:$0xf0]  ;;  %3105 = vmatmul.bf16.vlgmr.msrb.gmra.mxu3 %v9689_v8 }
 0x1b8   :  { %v7295_v60 = vld [vmem:[#allocation5 + $0xb98] sm:$0xf]  ;;  %v7040_v6 = vor.u32 %v8965_v0, %v7039_v63  ;;  %3149 = vmatpush.bf16.msra.mxu3 %v7328_v1  ;;  %v2859_v0 = vpop.f32.mrf.mxu3  ;;  %v2872_v1 = vpop.f32.mrf.mxu2 }
 0x1b9   :  { %v9029_v4 = vld [vmem:[#allocation5 + $0xbb4] sm:$0xf0]  ;;  %3188 = vmatpush.bf16.msra.mxu0 %v6308_v3  ;;  %3131 = vmatmul.bf16.vlgmr.msrb.gmra.mxu2 %v9685_v58  ;;  %v2860_v3 = vadd.f32 %v2859_v0, %v2847_v27  ;;  %v7329_v0 = vld [vmem:[#allocation5 + $0xbf8] sm:$0xf0] }
 0x1ba   :  { %v7007_v14 = vld [vmem:[#allocation5 + $0x958] sm:$0xf]  ;;  %v7296_v17 = vor.u32 %v9029_v4, %v7295_v60  ;;  %3175 = vmatpush.bf16.msra.mxu2 %v6052_v2  ;;  %3137 = vmatpush.bf16.msrb.mxu1 %v7040_v6  ;;  %v5924_v60 = vor.u32 %v8681_v48, %v5921_v53  ;;  %v6180_v4 = vor.u32 %v8745_v55, %v6177_v59  ;;  %v6081_v48 = vld [vmem:[#allocation5 + $0x238] sm:$0xf0] }
 0x1bb   :  { %v8957_v16 = vld [vmem:[#allocation5 + $0x974] sm:$0xf0]  ;;  %v6817_v53 = vld [vmem:[#allocation5 + $0x7f8] sm:$0xf0] }
 0x1bc   :  { %v7263_v19 = vld [vmem:[#allocation5 + $0xb58] sm:$0xf]  ;;  %v7008_v23 = vor.u32 %v8957_v16, %v7007_v14  ;;  %3150 = vmatpush.bf16.msra.mxu3 %v7296_v17  ;;  %v8737_v14 = vld [vmem:[#allocation5 + $0x29c] sm:$0xf]  ;;  %v2873_v17 = vadd.f32 %v2872_v1, %v2860_v3 }
 0x1bd   :  { %v9021_v20 = vld [vmem:[#allocation5 + $0xb74] sm:$0xf0]  ;;  %3189 = vmatpush.bf16.msra.mxu0 %v6276_v18  ;;  %v6145_v16 = vld [vmem:[#allocation5 + $0x2b8] sm:$0xf0]  ;;  %v2898_v27 = vpop.f32.mrf.mxu1 }
 0x1be   :  { %v6975_v28 = vld [vmem:[#allocation5 + $0x918] sm:$0xf]  ;;  %v7264_v29 = vor.u32 %v9021_v20, %v7263_v19  ;;  %3176 = vmatpush.bf16.msra.mxu2 %v6020_v13  ;;  %3138 = vmatpush.bf16.msrb.mxu1 %v7008_v23  ;;  %v2887_v19 = vpop.f32.mrf.mxu0  ;;  %v2886_v22 = vadd.f32 %v2885_v40, %v2873_v17  ;;  %v6148_v23 = vor.u32 %v8737_v14, %v6145_v16  ;;  %v8969_v55 = vld [vmem:[#allocation5 + $0x9dc] sm:$0xf] }
 0x1bf   :  { %v8949_v62 = vld [vmem:[#allocation5 + $0x934] sm:$0xf0]  ;;  %v6529_v3 = vld [vmem:[#allocation5 + $0x5b8] sm:$0xf0] }
 0x1c0   :  { %v7231_v10 = vld [vmem:[#allocation5 + $0xb18] sm:$0xf]  ;;  %v6976_v35 = vor.u32 %v8949_v62, %v6975_v28  ;;  %3151 = vmatpush.bf16.msra.mxu3 %v7264_v29  ;;  %v5857_v62 = vld [vmem:[#allocation5 + $0x78] sm:$0xf0]  ;;  %v2874_v57 = vpop.f32.mrf.mxu2  ;;  %v2861_v15 = vpop.f32.mrf.mxu3 }
 0x1c1   :  { %v9013_v33 = vld [vmem:[#allocation5 + $0xb34] sm:$0xf0]  ;;  %3190 = vmatpush.bf16.msra.mxu0 %v6244_v32  ;;  %v8729_v29 = vld [vmem:[#allocation5 + $0x25c] sm:$0xf]  ;;  %v9781_v32 = vadd.f32 %v2898_v27, %v2886_v22 }
 0x1c2   :  { %v6943_v38 = vld [vmem:[#allocation5 + $0x8d8] sm:$0xf]  ;;  %v7232_v41 = vor.u32 %v9013_v33, %v7231_v10  ;;  %3177 = vmatpush.bf16.msra.mxu2 %v5988_v30  ;;  %3139 = vmatpush.bf16.msrb.mxu1 %v6976_v35  ;;  %v6113_v30 = vld [vmem:[#allocation5 + $0x278] sm:$0xf0] }
 0x1c3   :  { %v8941_v39 = vld [vmem:[#allocation5 + $0x8f4] sm:$0xf0]  ;;  %v8841_v35 = vld [vmem:[#allocation5 + $0x5dc] sm:$0xf] }
 0x1c4   :  { %v7199_v45 = vld [vmem:[#allocation5 + $0xad8] sm:$0xf]  ;;  %v6944_v51 = vor.u32 %v8941_v39, %v6943_v38  ;;  %3152 = vmatpush.bf16.msra.mxu3 %v7232_v41  ;;  %7371 = vmatmul.msk.bf16.vlgmr.msrb.gmra.mxu0 %vm2534_vm0, %v9693_v46  ;;  %v5860_v38 = vor.u32 %v8665_v26, %v5857_v62  ;;  %v6116_v39 = vor.u32 %v8729_v29, %v6113_v30  ;;  %v8961_v14 = vld [vmem:[#allocation5 + $0x99c] sm:$0xf] }
 0x1c5   :  { %v9005_v47 = vld [vmem:[#allocation5 + $0xaf4] sm:$0xf0]  ;;  %3191 = vmatpush.bf16.msra.mxu0 %v6212_v44  ;;  %v6564_v50 = vor.u32 %v8841_v35, %v6561_v37  ;;  %v7041_v17 = vld [vmem:[#allocation5 + $0x9b8] sm:$0xf0] }
 0x1c6   :  { %v6911_v61 = vld [vmem:[#allocation5 + $0x898] sm:$0xf]  ;;  %v7200_v2 = vor.u32 %v9005_v47, %v7199_v45  ;;  %3178 = vmatpush.bf16.msra.mxu2 %v5956_v43  ;;  %3140 = vmatpush.bf16.msrb.mxu1 %v6944_v51  ;;  %v8657_v43 = vld [vmem:[#allocation5 + $0x1c] sm:$0xf] }
 0x1c7   :  { %v8933_v63 = vld [vmem:[#allocation5 + $0x8b4] sm:$0xf0]  ;;  %v5825_v45 = vld [vmem:[#allocation5 + $0x38] sm:$0xf0] }
 0x1c8   :  { %v7167_v5 = vld [vmem:[#allocation5 + $0xa98] sm:$0xf]  ;;  %v6912_v11 = vor.u32 %v8933_v63, %v6911_v61  ;;  %3153 = vmatpush.bf16.msra.mxu3 %v7200_v2  ;;  %v8721_v47 = vld [vmem:[#allocation5 + $0x21c] sm:$0xf]  ;;  %v5828_v1 = vor.u32 %v8657_v43, %v5825_v45 }
 0x1c9   :  { %v8997_v6 = vld [vmem:[#allocation5 + $0xab4] sm:$0xf0]  ;;  %3192 = vmatpush.bf16.msra.mxu0 %v6180_v4  ;;  %v8905_v51 = vld [vmem:[#allocation5 + $0x7dc] sm:$0xf] }
 0x1ca   :  { %v6879_v13 = vld [vmem:[#allocation5 + $0x858] sm:$0xf]  ;;  %v7168_v20 = vor.u32 %v8997_v6, %v7167_v5  ;;  %3179 = vmatpush.bf16.msra.mxu2 %v5924_v60  ;;  %3141 = vmatpush.bf16.msrb.mxu1 %v6912_v11  ;;  %v7073_v61 = vld [vmem:[#allocation5 + $0x9f8] sm:$0xf0]  ;;  %v6084_v60 = vor.u32 %v8721_v47, %v6081_v48  ;;  %v6820_v4 = vor.u32 %v8905_v51, %v6817_v53  ;;  %v2900_v5 = vpop.f32.mrf.mxu1  ;;  %v562_v47 = vperm.slane %v9764_v42, 4 }
 0x1cb   :  { %v8925_v18 = vld [vmem:[#allocation5 + $0x874] sm:$0xf0]  ;;  %v9033_v63 = vld [vmem:[#allocation5 + $0xbdc] sm:$0xf]  ;;  %v7076_v6 = vor.u32 %v8969_v55, %v7073_v61 }
 0x1cc   :  { %v7135_v24 = vld [vmem:[#allocation5 + $0xa58] sm:$0xf]  ;;  %v6880_v28 = vor.u32 %v8925_v18, %v6879_v13  ;;  %3154 = vmatpush.bf16.msra.mxu3 %v7168_v20  ;;  %v8833_v2 = vld [vmem:[#allocation5 + $0x59c] sm:$0xf]  ;;  %v7332_v7 = vor.u32 %v9033_v63, %v7329_v0 }
 0x1cd   :  { %v8989_v25 = vld [vmem:[#allocation5 + $0xa74] sm:$0xf0]  ;;  %3193 = vmatpush.bf16.msra.mxu0 %v6148_v23  ;;  %v8897_v11 = vld [vmem:[#allocation5 + $0x79c] sm:$0xf]  ;;  %v6532_v16 = vor.u32 %v8833_v2, %v6529_v3 }
 0x1ce   :  { %v6847_v10 = vld [vmem:[#allocation5 + $0x818] sm:$0xf]  ;;  %v7136_v34 = vor.u32 %v8989_v25, %v7135_v24  ;;  %3180 = vmatpush.bf16.msra.mxu2 %v5892_v21  ;;  %3142 = vmatpush.bf16.msrb.mxu1 %v6880_v28  ;;  %v9025_v13 = vld [vmem:[#allocation5 + $0xb9c] sm:$0xf]  ;;  %v6788_v22 = vor.u32 %v8897_v11, %v6785_v12  ;;  %v7044_v21 = vor.u32 %v8961_v14, %v7041_v17 }
 0x1cf   :  { %v8917_v33 = vld [vmem:[#allocation5 + $0x834] sm:$0xf0]  ;;  %v7297_v18 = vld [vmem:[#allocation5 + $0xbb8] sm:$0xf0] }
 0x1d0   :  { %v7103_v40 = vld [vmem:[#allocation5 + $0xa18] sm:$0xf]  ;;  %v6848_v44 = vor.u32 %v8917_v33, %v6847_v10  ;;  %3155 = vmatpush.bf16.msra.mxu3 %v7136_v34  ;;  %v8825_v19 = vld [vmem:[#allocation5 + $0x55c] sm:$0xf]  ;;  %v7300_v23 = vor.u32 %v9025_v13, %v7297_v18 }
 0x1d1   :  { %v8981_v41 = vld [vmem:[#allocation5 + $0xa34] sm:$0xf0]  ;;  %3194 = vmatpush.bf16.msra.mxu0 %v6116_v39  ;;  %v6497_v20 = vld [vmem:[#allocation5 + $0x578] sm:$0xf0] }
 0x1d2   :  { %v7104_v59 = vor.u32 %v8981_v41, %v7103_v40  ;;  %3181 = vmatpush.bf16.msra.mxu2 %v5860_v38  ;;  %3143 = vmatpush.bf16.msrb.mxu1 %v6848_v44  ;;  %v8889_v24 = vld [vmem:[#allocation5 + $0x75c] sm:$0xf]  ;;  %v6500_v27 = vor.u32 %v8825_v19, %v6497_v20  ;;  %v2924_v43 = vpop.f32.mrf.mxu1 }
 0x1d3   :  { %v6753_v25 = vld [vmem:[#allocation5 + $0x778] sm:$0xf0] }
 0x1d4   :  { %3156 = vmatpush.bf16.msra.mxu3 %v7104_v59  ;;  %v8953_v26 = vld [vmem:[#allocation5 + $0x95c] sm:$0xf]  ;;  %v6756_v33 = vor.u32 %v8889_v24, %v6753_v25 }
 0x1d5   :  { %3144 = vmatmul.bf16.vlgmr.msrb.gmra.mxu1 %v9697_v31  ;;  %3195 = vmatpush.bf16.msra.mxu0 %v6084_v60  ;;  %v7009_v28 = vld [vmem:[#allocation5 + $0x978] sm:$0xf0] }
 0x1d6   :  { %3201 = vmatpush.bf16.msra.mxu1 %v6564_v50  ;;  %3182 = vmatpush.bf16.msra.mxu2 %v5828_v1  ;;  %v9017_v62 = vld [vmem:[#allocation5 + $0xb5c] sm:$0xf]  ;;  %v7012_v34 = vor.u32 %v8953_v26, %v7009_v28  ;;  %v2911_v1 = vpop.f32.mrf.mxu3 }
 0x1d7   :  { %3157 = vmatmul.bf16.vlgmr.msra.gmra.mxu3 %v9699_v36  ;;  %v7265_v29 = vld [vmem:[#allocation5 + $0xb78] sm:$0xf0]  ;;  %v2912_v60 = vadd.f32 %v2911_v1, %v562_v47  ;;  %v9140_v1 = vld [vmem:[#allocation8 + $0x2ec] sm:$0xf0] }
 0x1d8   :  { %3214 = vmatpush.bf16.msrb.mxu3 %v6820_v4  ;;  %v8817_v30 = vld [vmem:[#allocation5 + $0x51c] sm:$0xf]  ;;  %3196 = vmatmul.bf16.vlgmr.msra.gmra.mxu0 %v9689_v8  ;;  %v7268_v35 = vor.u32 %v9017_v62, %v7265_v29  ;;  %v2937_v4 = vpop.f32.mrf.mxu2 }
 0x1d9   :  { %3240 = vmatpush.bf16.msrb.mxu0 %v7332_v7  ;;  %v6465_v10 = vld [vmem:[#allocation5 + $0x538] sm:$0xf0]  ;;  %3183 = vmatmul.bf16.vlgmr.msra.gmra.mxu2 %v9683_v56  ;;  %v2950_v56 = vpop.f32.mrf.mxu0  ;;  %v2925_v14 = vadd.f32 %v2924_v43, %v2912_v60  ;;  %v9172_v60 = vld [vmem:[#allocation8 + $0x3ec] sm:$0xf0] }
 0x1da   :  { %3227 = vmatpush.bf16.msrb.mxu2 %v7076_v6  ;;  %3202 = vmatpush.bf16.msra.mxu1 %v6532_v16  ;;  %v8881_v37 = vld [vmem:[#allocation5 + $0x71c] sm:$0xf]  ;;  %v6468_v38 = vor.u32 %v8817_v30, %v6465_v10  ;;  %v2926_v19 = vpop.f32.mrf.mxu1 }
 0x1db   :  { %v6721_v57 = vld [vmem:[#allocation5 + $0x738] sm:$0xf0]  ;;  %v7855_v19 = vld [vmem:[#allocation8 + $0x3c0] sm:$0xf] }
 0x1dc   :  { %3215 = vmatpush.bf16.msrb.mxu3 %v6788_v22  ;;  %v8945_v15 = vld [vmem:[#allocation5 + $0x91c] sm:$0xf]  ;;  %v6724_v8 = vor.u32 %v8881_v37, %v6721_v57 }
 0x1dd   :  { %3241 = vmatpush.bf16.msrb.mxu0 %v7300_v23  ;;  %v6977_v39 = vld [vmem:[#allocation5 + $0x938] sm:$0xf0]  ;;  %v2938_v23 = vadd.f32 %v2937_v4, %v2925_v14 }
 0x1de   :  { %3228 = vmatpush.bf16.msrb.mxu2 %v7044_v21  ;;  %3203 = vmatpush.bf16.msra.mxu1 %v6500_v27  ;;  %v9009_v40 = vld [vmem:[#allocation5 + $0xb1c] sm:$0xf]  ;;  %v6980_v48 = vor.u32 %v8945_v15, %v6977_v39  ;;  %v2913_v57 = vpop.f32.mrf.mxu3 }
 0x1df   :  { %v7233_v41 = vld [vmem:[#allocation5 + $0xb38] sm:$0xf0]  ;;  %v9788_v29 = vadd.f32 %v2950_v56, %v2938_v23  ;;  %v9064_v57 = vld [vmem:[#allocation8 + $0x8c] sm:$0xf0] }
 0x1e0   :  { %v8809_v44 = vld [vmem:[#allocation5 + $0x4dc] sm:$0xf]  ;;  %3216 = vmatpush.bf16.msrb.mxu3 %v6756_v33  ;;  %v7236_v50 = vor.u32 %v9009_v40, %v7233_v41  ;;  %v2939_v15 = vpop.f32.mrf.mxu2 }
 0x1e1   :  { %v6433_v45 = vld [vmem:[#allocation5 + $0x4f8] sm:$0xf0]  ;;  %3242 = vmatpush.bf16.msrb.mxu0 %v7268_v35  ;;  %v2952_v21 = vpop.f32.mrf.mxu0  ;;  %v7567_v15 = vld [vmem:[#allocation8 + $0x180] sm:$0xf] }
 0x1e2   :  { %3229 = vmatpush.bf16.msrb.mxu2 %v7012_v34  ;;  %v8873_v51 = vld [vmem:[#allocation5 + $0x6dc] sm:$0xf]  ;;  %3204 = vmatpush.bf16.msra.mxu1 %v6468_v38  ;;  %v6436_v59 = vor.u32 %v8809_v44, %v6433_v45 }
 0x1e3   :  { %v6689_v53 = vld [vmem:[#allocation5 + $0x6f8] sm:$0xf0] }
 0x1e4   :  { %v8937_v55 = vld [vmem:[#allocation5 + $0x8dc] sm:$0xf]  ;;  %3217 = vmatpush.bf16.msrb.mxu3 %v6724_v8  ;;  %v6692_v5 = vor.u32 %v8873_v51, %v6689_v53  ;;  %v7487_v53 = vld [vmem:[#allocation8 + $0xe0] sm:$0xf] }
 0x1e5   :  { %v6945_v61 = vld [vmem:[#allocation5 + $0x8f8] sm:$0xf0]  ;;  %3243 = vmatpush.bf16.msrb.mxu0 %v7236_v50 }
 0x1e6   :  { %v9001_v63 = vld [vmem:[#allocation5 + $0xadc] sm:$0xf]  ;;  %3230 = vmatpush.bf16.msrb.mxu2 %v6980_v48  ;;  %v6948_v42 = vor.u32 %v8937_v55, %v6945_v61  ;;  %3205 = vmatpush.bf16.msra.mxu1 %v6436_v59  ;;  %v9076_v55 = vld [vmem:[#allocation8 + $0xec] sm:$0xf0]  ;;  %v7615_v59 = vld [vmem:[#allocation8 + $0x1e0] sm:$0xf] }
 0x1e7   :  { %v7201_v0 = vld [vmem:[#allocation5 + $0xaf8] sm:$0xf0] }
 0x1e8   :  { %v8801_v2 = vld [vmem:[#allocation5 + $0x49c] sm:$0xf]  ;;  %v7204_v6 = vor.u32 %v9001_v63, %v7201_v0  ;;  %3218 = vmatpush.bf16.msrb.mxu3 %v6692_v5  ;;  %v9108_v63 = vld [vmem:[#allocation8 + $0x1ec] sm:$0xf0]  ;;  %v7743_v0 = vld [vmem:[#allocation8 + $0x2e0] sm:$0xf]  ;;  %v7488_v5 = vor.u32 %v9076_v55, %v7487_v53 }
 0x1e9   :  { %v6401_v3 = vld [vmem:[#allocation5 + $0x4b8] sm:$0xf0]  ;;  %v9092_v53 = vld [vmem:[#allocation8 + $0x16c] sm:$0xf0]  ;;  %v7679_v55 = vld [vmem:[#allocation8 + $0x260] sm:$0xf] }
 0x1ea   :  { %v8865_v7 = vld [vmem:[#allocation5 + $0x69c] sm:$0xf]  ;;  %v6404_v16 = vor.u32 %v8801_v2, %v6401_v3  ;;  %3231 = vmatpush.bf16.msrb.mxu2 %v6948_v42  ;;  %3244 = vmatpush.bf16.msrb.mxu0 %v7204_v6  ;;  %v7871_v3 = vld [vmem:[#allocation8 + $0x3e0] sm:$0xf]  ;;  %v7616_v42 = vor.u32 %v9108_v63, %v7615_v59  ;;  %v7744_v6 = vor.u32 %v9140_v1, %v7743_v0  ;;  %v9124_v59 = vld [vmem:[#allocation8 + $0x26c] sm:$0xf0] }
 0x1eb   :  { %v6657_v11 = vld [vmem:[#allocation5 + $0x6b8] sm:$0xf0]  ;;  %v7872_v14 = vor.u32 %v9172_v60, %v7871_v3  ;;  %v7807_v63 = vld [vmem:[#allocation8 + $0x360] sm:$0xf]  ;;  %v9156_v0 = vld [vmem:[#allocation8 + $0x36c] sm:$0xf0]  ;;  %v7680_v3 = vor.u32 %v9124_v59, %v7679_v55 }
 0x1ec   :  { %v8929_v12 = vld [vmem:[#allocation5 + $0x89c] sm:$0xf]  ;;  %v6660_v24 = vor.u32 %v8865_v7, %v6657_v11  ;;  %3206 = vmatpush.bf16.msra.mxu1 %v6404_v16  ;;  %v7471_v7 = vld [vmem:[#allocation8 + $0xc0] sm:$0xf]  ;;  %v9072_v11 = vld [vmem:[#allocation8 + $0xcc] sm:$0xf0] }
 0x1ed   :  { %v6913_v17 = vld [vmem:[#allocation5 + $0x8b8] sm:$0xf0]  ;;  %v9104_v16 = vld [vmem:[#allocation8 + $0x1cc] sm:$0xf0]  ;;  %v7407_v60 = vld [vmem:[#allocation8 + $0x40] sm:$0xf] }
 0x1ee   :  { %v8993_v13 = vld [vmem:[#allocation5 + $0xa9c] sm:$0xf]  ;;  %v6916_v25 = vor.u32 %v8929_v12, %v6913_v17  ;;  %3219 = vmatpush.bf16.msrb.mxu3 %v6660_v24  ;;  %v7599_v12 = vld [vmem:[#allocation8 + $0x1c0] sm:$0xf] }
 0x1ef   :  { %v7169_v18 = vld [vmem:[#allocation5 + $0xab8] sm:$0xf0]  ;;  %v7727_v17 = vld [vmem:[#allocation8 + $0x2c0] sm:$0xf]  ;;  %v7600_v21 = vor.u32 %v9104_v16, %v7599_v12  ;;  %v9152_v16 = vld [vmem:[#allocation8 + $0x34c] sm:$0xf0] }
 0x1f0   :  { %v8793_v20 = vld [vmem:[#allocation5 + $0x45c] sm:$0xf]  ;;  %v7172_v26 = vor.u32 %v8993_v13, %v7169_v18  ;;  %3232 = vmatpush.bf16.msrb.mxu2 %v6916_v25  ;;  %v9136_v13 = vld [vmem:[#allocation8 + $0x2cc] sm:$0xf0]  ;;  %v9790_v18 = vpop.f32.mrf.mxu2  ;;  %v7455_v24 = vld [vmem:[#allocation8 + $0xa0] sm:$0xf] }
 0x1f1   :  { %v6369_v22 = vld [vmem:[#allocation5 + $0x478] sm:$0xf0]  ;;  %v7728_v23 = vor.u32 %v9136_v13, %v7727_v17  ;;  %v9068_v25 = vld [vmem:[#allocation8 + $0xac] sm:$0xf0] }
 0x1f2   :  { %v8857_v27 = vld [vmem:[#allocation5 + $0x65c] sm:$0xf]  ;;  %v6372_v30 = vor.u32 %v8793_v20, %v6369_v22  ;;  %3245 = vmatpush.bf16.msrb.mxu0 %v7172_v26  ;;  %v9168_v20 = vld [vmem:[#allocation8 + $0x3cc] sm:$0xf0]  ;;  %v7472_v22 = vor.u32 %v9072_v11, %v7471_v7  ;;  %v7583_v26 = vld [vmem:[#allocation8 + $0x1a0] sm:$0xf] }
 0x1f3   :  { %v6625_v28 = vld [vmem:[#allocation5 + $0x678] sm:$0xf0]  ;;  %v7663_v7 = vld [vmem:[#allocation8 + $0x240] sm:$0xf]  ;;  %v9120_v11 = vld [vmem:[#allocation8 + $0x24c] sm:$0xf0] }
 0x1f4   :  { %v8921_v62 = vld [vmem:[#allocation5 + $0x85c] sm:$0xf]  ;;  %v6628_v38 = vor.u32 %v8857_v27, %v6625_v28  ;;  %3207 = vmatpush.bf16.msra.mxu1 %v6372_v30  ;;  %v7856_v27 = vor.u32 %v9168_v20, %v7855_v19  ;;  %v9100_v28 = vld [vmem:[#allocation8 + $0x1ac] sm:$0xf0]  ;;  %v7839_v30 = vld [vmem:[#allocation8 + $0x3a0] sm:$0xf] }
 0x1f5   :  { %v6881_v10 = vld [vmem:[#allocation5 + $0x878] sm:$0xf0] }
 0x1f6   :  { %v8985_v33 = vld [vmem:[#allocation5 + $0xa5c] sm:$0xf]  ;;  %v6884_v41 = vor.u32 %v8921_v62, %v6881_v10  ;;  %3220 = vmatpush.bf16.msrb.mxu3 %v6628_v38  ;;  %v7711_v62 = vld [vmem:[#allocation8 + $0x2a0] sm:$0xf]  ;;  %v9164_v10 = vld [vmem:[#allocation8 + $0x3ac] sm:$0xf0] }
 0x1f7   :  { %v7137_v34 = vld [vmem:[#allocation5 + $0xa78] sm:$0xf0]  ;;  %v9096_v38 = vld [vmem:[#allocation8 + $0x18c] sm:$0xf0] }
 0x1f8   :  { %v8785_v35 = vld [vmem:[#allocation5 + $0x41c] sm:$0xf]  ;;  %v7140_v43 = vor.u32 %v8985_v33, %v7137_v34  ;;  %3233 = vmatpush.bf16.msrb.mxu2 %v6884_v41  ;;  %v7456_v33 = vor.u32 %v9068_v25, %v7455_v24  ;;  %v7584_v34 = vor.u32 %v9100_v28, %v7583_v26  ;;  %v9796_v41 = vpop.f32.mrf.mxu1  ;;  %v7519_v24 = vld [vmem:[#allocation8 + $0x120] sm:$0xf]  ;;  %v9084_v26 = vld [vmem:[#allocation8 + $0x12c] sm:$0xf0] }
 0x1f9   :  { %v6337_v37 = vld [vmem:[#allocation5 + $0x438] sm:$0xf0]  ;;  %v9116_v28 = vld [vmem:[#allocation8 + $0x22c] sm:$0xf0] }
 0x1fa   :  { %v9041_v39 = vld [vmem:[#allocation5 + $0xc1c] sm:$0xf]  ;;  %v6340_v8 = vor.u32 %v8785_v35, %v6337_v37  ;;  %3246 = vmatpush.bf16.msrb.mxu0 %v7140_v43  ;;  %v7439_v37 = vld [vmem:[#allocation8 + $0x80] sm:$0xf]  ;;  %v9160_v43 = vld [vmem:[#allocation8 + $0x38c] sm:$0xf0] }
 0x1fb   :  { %v7361_v40 = vld [vmem:[#allocation5 + $0xc38] sm:$0xf0] }
 0x1fc   :  { %v8849_v44 = vld [vmem:[#allocation5 + $0x61c] sm:$0xf]  ;;  %v7364_v51 = vor.u32 %v9041_v39, %v7361_v40  ;;  %3208 = vmatpush.bf16.msra.mxu1 %v6340_v8  ;;  %v7695_v39 = vld [vmem:[#allocation8 + $0x280] sm:$0xf]  ;;  %v9128_v40 = vld [vmem:[#allocation8 + $0x28c] sm:$0xf0] }
 0x1fd   :  { %v6593_v45 = vld [vmem:[#allocation5 + $0x638] sm:$0xf0]  ;;  %v7696_v8 = vor.u32 %v9128_v40, %v7695_v39  ;;  %v7759_v39 = vld [vmem:[#allocation8 + $0x300] sm:$0xf]  ;;  %v9144_v40 = vld [vmem:[#allocation8 + $0x30c] sm:$0xf0] }
 0x1fe   :  { %v8913_v56 = vld [vmem:[#allocation5 + $0x81c] sm:$0xf]  ;;  %v6596_v61 = vor.u32 %v8849_v44, %v6593_v45  ;;  %v9798_v44 = vpop.f32.mrf.mxu0  ;;  %v7440_v45 = vor.u32 %v9064_v57, %v7439_v37  ;;  %v7503_v37 = vld [vmem:[#allocation8 + $0x100] sm:$0xf]  ;;  %v9080_v57 = vld [vmem:[#allocation8 + $0x10c] sm:$0xf0]  ;;  %v7760_v55 = vor.u32 %v9144_v40, %v7759_v39 }
 0x1ff   :  { %v6849_v47 = vld [vmem:[#allocation5 + $0x838] sm:$0xf0]  ;;  %3209 = vmatmul.bf16.vlgmr.msra.gmra.mxu1 %v9681_v52  ;;  %v9132_v52 = vld [vmem:[#allocation8 + $0x2ac] sm:$0xf0]  ;;  %v8063_v39 = vld [vmem:[#allocation8 + $0x560] sm:$0xf] }
 0x200   :  { %v8977_v48 = vld [vmem:[#allocation5 + $0xa1c] sm:$0xf]  ;;  %v6852_v2 = vor.u32 %v8913_v56, %v6849_v47  ;;  %3260 = vmatpush.bf16.msrb.mxu1 %v7364_v51  ;;  %3221 = vmatpush.bf16.msrb.mxu3 %v6596_v61  ;;  %v7712_v35 = vor.u32 %v9132_v52, %v7711_v62  ;;  %v7568_v56 = vor.u32 %v9096_v38, %v7567_v15  ;;  %v7423_v47 = vld [vmem:[#allocation8 + $0x60] sm:$0xf]  ;;  %v9800_v61 = vpop.f32.mrf.mxu3  ;;  %v2978_v12 = vpop.f32.mrf.mxu1  ;;  %v9148_v62 = vld [vmem:[#allocation8 + $0x32c] sm:$0xf0] }
 0x201   :  { %v7105_v50 = vld [vmem:[#allocation5 + $0xa38] sm:$0xf0]  ;;  %v9112_v38 = vld [vmem:[#allocation8 + $0x20c] sm:$0xf0] }
 0x202   :  { %v7108_v4 = vor.u32 %v8977_v48, %v7105_v50  ;;  %3234 = vmatpush.bf16.msrb.mxu2 %v6852_v2  ;;  %v9060_v48 = vld [vmem:[#allocation8 + $0x6c] sm:$0xf0]  ;;  %v7551_v50 = vld [vmem:[#allocation8 + $0x160] sm:$0xf] }
 0x203   :  { %3222 = vmatmul.bf16.vlgmr.msrb.gmra.mxu3 %v9685_v58  ;;  %v7840_v58 = vor.u32 %v9164_v10, %v7839_v30  ;;  %v7424_v1 = vor.u32 %v9060_v48, %v7423_v47  ;;  %v7552_v2 = vor.u32 %v9092_v53, %v7551_v50  ;;  %v7375_v10 = vld [vmem:[#allocation8] sm:$0xf]  ;;  %v3266_v47 = vmax.f32 %v9731_v54, 0.0  ;;  %v9220_v40 = vld [vmem:[#allocation8 + $0x56c] sm:$0xf0] }
 0x204   :  { %3247 = vmatpush.bf16.msrb.mxu0 %v7108_v4  ;;  %4828 = vmatpush.bf16.msra.mxu3 %v7488_v5  ;;  %v9056_v4 = vld [vmem:[#allocation8 + $0x4c] sm:$0xf0]  ;;  %v7535_v5 = vld [vmem:[#allocation8 + $0x140] sm:$0xf]  ;;  %v7504_v48 = vor.u32 %v9080_v57, %v7503_v37  ;;  %v3268_v53 = vmax.f32 %v9768_v9, 0.0 }
 0x205   :  { %4841 = vmatpush.bf16.msra.mxu1 %v7616_v42  ;;  %3235 = vmatmul.bf16.vlgmr.msrb.gmra.mxu2 %v9697_v31  ;;  %v2991_v31 = vpop.f32.mrf.mxu2  ;;  %v7808_v42 = vor.u32 %v9156_v0, %v7807_v63  ;;  %v7408_v19 = vor.u32 %v9056_v4, %v7407_v60  ;;  %v8255_v63 = vld [vmem:[#allocation8 + $0x6e0] sm:$0xf]  ;;  %v9268_v0 = vld [vmem:[#allocation8 + $0x6ec] sm:$0xf0] }
 0x206   :  { %4854 = vmatpush.bf16.msra.mxu2 %v7744_v6  ;;  %v9088_v6 = vld [vmem:[#allocation8 + $0x14c] sm:$0xf0]  ;;  %v3004_v13 = vpop.f32.mrf.mxu0  ;;  %v7999_v31 = vld [vmem:[#allocation8 + $0x4e0] sm:$0xf]  ;;  %v9814_v9 = vpack.c.bf16 %v3268_v53, %v3268_v53 }
 0x207   :  { %3248 = vmatmul.bf16.vlgmr.msrb.gmra.mxu0 %v9699_v36  ;;  %v7823_v36 = vld [vmem:[#allocation8 + $0x380] sm:$0xf]  ;;  %v7536_v20 = vor.u32 %v9088_v6, %v7535_v5  ;;  %v9200_v60 = vld [vmem:[#allocation8 + $0x4cc] sm:$0xf0]  ;;  %v9810_v5 = vpack.c.bf16 %v3266_v47, %v3266_v47  ;;  %v9821_v13 = vld [vmem:[#allocation7] sm:$0xff] }
 0x208   :  { %4867 = vmatpush.bf16.msra.mxu0 %v7872_v14  ;;  %4829 = vmatpush.bf16.msra.mxu3 %v7472_v22  ;;  %v7824_v51 = vor.u32 %v9160_v43, %v7823_v36  ;;  %v7791_v14 = vld [vmem:[#allocation8 + $0x340] sm:$0xf]  ;;  %v7664_v22 = vor.u32 %v9120_v11, %v7663_v7  ;;  %v2965_v52 = vpop.f32.mrf.mxu3  ;;  %v9204_v36 = vld [vmem:[#allocation8 + $0x4ec] sm:$0xf0] }
 0x209   :  { %4842 = vmatpush.bf16.msra.mxu1 %v7600_v21  ;;  %v7391_v21 = vld [vmem:[#allocation8 + $0x20] sm:$0xf]  ;;  %v7792_v25 = vor.u32 %v9152_v16, %v7791_v14  ;;  %v8000_v59 = vor.u32 %v9204_v36, %v7999_v31  ;;  %v9232_v4 = vld [vmem:[#allocation8 + $0x5cc] sm:$0xf0]  ;;  %v2964_v36 = vadd.f32 %v9800_v61, %v9788_v29 }
 0x20a   :  { %4855 = vmatpush.bf16.msra.mxu2 %v7728_v23  ;;  %v9052_v23 = vld [vmem:[#allocation8 + $0x2c] sm:$0xf0]  ;;  %v8111_v54 = vld [vmem:[#allocation8 + $0x5c0] sm:$0xf] }
 0x20b   :  { %v7392_v30 = vor.u32 %v9052_v23, %v7391_v21  ;;  %v8239_v7 = vld [vmem:[#allocation8 + $0x6c0] sm:$0xf]  ;;  %v8112_v12 = vor.u32 %v9232_v4, %v8111_v54  ;;  %v9196_v16 = vld [vmem:[#allocation8 + $0x4ac] sm:$0xf0] }
 0x20c   :  { %4868 = vmatpush.bf16.msra.mxu0 %v7856_v27  ;;  %4830 = vmatpush.bf16.msra.mxu3 %v7456_v33  ;;  %v7647_v27 = vld [vmem:[#allocation8 + $0x220] sm:$0xf]  ;;  %v7520_v33 = vor.u32 %v9084_v26, %v7519_v24  ;;  %v9224_v52 = vld [vmem:[#allocation8 + $0x58c] sm:$0xf0] }
 0x20d   :  { %4843 = vmatpush.bf16.msra.mxu1 %v7584_v34  ;;  %v9804_v17 = vpop.f32.mrf.mxu2  ;;  %v7648_v34 = vor.u32 %v9116_v28, %v7647_v27  ;;  %v7967_v14 = vld [vmem:[#allocation8 + $0x4a0] sm:$0xf]  ;;  %v9192_v28 = vld [vmem:[#allocation8 + $0x48c] sm:$0xf0] }
 0x20e   :  { %4856 = vmatpush.bf16.msra.mxu2 %v7712_v35  ;;  %v9048_v35 = vld [vmem:[#allocation8 + $0xc] sm:$0xf0]  ;;  %v7968_v23 = vor.u32 %v9196_v16, %v7967_v14  ;;  %v8223_v24 = vld [vmem:[#allocation8 + $0x6a0] sm:$0xf] }
 0x20f   :  { %7372 = vmatmul.msk.bf16.vlgmr.msrb.gmra.mxu1 %vm2534_vm0, %v9693_v46  ;;  %v7775_v46 = vld [vmem:[#allocation8 + $0x320] sm:$0xf]  ;;  %v9216_v53 = vld [vmem:[#allocation8 + $0x54c] sm:$0xf0] }
 0x210   :  { %4869 = vmatpush.bf16.msra.mxu0 %v7840_v58  ;;  %4831 = vmatpush.bf16.msra.mxu3 %v7440_v45  ;;  %v7776_v15 = vor.u32 %v9148_v62, %v7775_v46  ;;  %v7631_v58 = vld [vmem:[#allocation8 + $0x200] sm:$0xf]  ;;  %v7376_v45 = vor.u32 %v9048_v35, %v7375_v10  ;;  %v9256_v35 = vld [vmem:[#allocation8 + $0x68c] sm:$0xf0] }
 0x211   :  { %4844 = vmatpush.bf16.msra.mxu1 %v7568_v56  ;;  %v8127_v56 = vld [vmem:[#allocation8 + $0x5e0] sm:$0xf]  ;;  %v7632_v50 = vor.u32 %v9112_v38, %v7631_v58  ;;  %v3041_v58 = vpop.f32.mrf.mxu1  ;;  %v9248_v61 = vld [vmem:[#allocation8 + $0x64c] sm:$0xf0] }
 0x212   :  { %4857 = vmatpush.bf16.msra.mxu2 %v7696_v8  ;;  %v9236_v8 = vld [vmem:[#allocation8 + $0x5ec] sm:$0xf0]  ;;  %v7951_v27 = vld [vmem:[#allocation8 + $0x480] sm:$0xf] }
 0x213   :  { %v8079_v62 = vld [vmem:[#allocation8 + $0x580] sm:$0xf]  ;;  %v3028_v31 = vpop.f32.mrf.mxu3  ;;  %v9244_v14 = vld [vmem:[#allocation8 + $0x62c] sm:$0xf0] }
 0x214   :  { %4870 = vmatpush.bf16.msra.mxu0 %v7824_v51  ;;  %4832 = vmatpush.bf16.msra.mxu3 %v7424_v1  ;;  %v3267_v51 = vmax.f32 %v9748_v49, 0.0  ;;  %v3269_v1 = vmax.f32 %v9781_v32, 0.0  ;;  %v8256_v49 = vor.u32 %v9268_v0, %v8255_v63  ;;  %v9264_v32 = vld [vmem:[#allocation8 + $0x6cc] sm:$0xf0]  ;;  %v8080_v37 = vor.u32 %v9224_v52, %v8079_v62  ;;  %v7935_v57 = vld [vmem:[#allocation8 + $0x460] sm:$0xf] }
 0x215   :  { %4845 = vmatpush.bf16.msra.mxu1 %v7552_v2  ;;  %v3017_v43 = vpop.f32.mrf.mxu2  ;;  %v8128_v2 = vor.u32 %v9236_v8, %v8127_v56  ;;  %v8240_v21 = vor.u32 %v9264_v32, %v8239_v7  ;;  %v9252_v56 = vld [vmem:[#allocation8 + $0x66c] sm:$0xf0]  ;;  %v8064_v8 = vor.u32 %v9220_v40, %v8063_v39  ;;  %v7919_v47 = vld [vmem:[#allocation8 + $0x440] sm:$0xf]  ;;  %v2977_v63 = vadd.f32 %v9796_v41, %v2964_v36 }
 0x216   :  { %4858 = vmatpush.bf16.msra.mxu2 %v7680_v3  ;;  %v7983_v3 = vld [vmem:[#allocation8 + $0x4c0] sm:$0xf]  ;;  %v9816_v11 = vpack.c.bf16 %v3269_v1, %v3269_v1  ;;  %v9300_v39 = vld [vmem:[#allocation8 + $0x7ec] sm:$0xf0] }
 0x217   :  { %v7984_v6 = vor.u32 %v9200_v60, %v7983_v3  ;;  %v8175_v29 = vld [vmem:[#allocation8 + $0x640] sm:$0xf]  ;;  %v9180_v3 = vld [vmem:[#allocation8 + $0x42c] sm:$0xf0]  ;;  %v2990_v32 = vadd.f32 %v9790_v18, %v2977_v63 }
 0x218   :  { %4871 = vmatpush.bf16.msra.mxu0 %v7808_v42  ;;  %4833 = vmatpush.bf16.msra.mxu3 %v7408_v19  ;;  %v9812_v42 = vpack.c.bf16 %v3267_v51, %v3267_v51  ;;  %v563_v19 = vperm.slane %v9821_v13, 5  ;;  %v8047_v51 = vld [vmem:[#allocation8 + $0x540] sm:$0xf]  ;;  %v8176_v7 = vor.u32 %v9248_v61, %v8175_v29  ;;  %v9296_v63 = vld [vmem:[#allocation8 + $0x7cc] sm:$0xf0] }
 0x219   :  { %4846 = vmatpush.bf16.msra.mxu1 %v7536_v20  ;;  %v8095_v20 = vld [vmem:[#allocation8 + $0x5a0] sm:$0xf]  ;;  %v8048_v1 = vor.u32 %v9216_v53, %v8047_v51  ;;  %v3043_v60 = vpop.f32.mrf.mxu1  ;;  %v3270_v62 = vmax.f32 %v2990_v32, 0.0  ;;  %v9134_v51 = vld [vmem:[#allocation8 + $0x2c4] sm:$0xf] }
 0x21a   :  { %4859 = vmatpush.bf16.msra.mxu2 %v7664_v22  ;;  %v9228_v22 = vld [vmem:[#allocation8 + $0x5ac] sm:$0xf0]  ;;  %v3003_v46 = vadd.f32 %v9798_v44, %v563_v19  ;;  %v8031_v4 = vld [vmem:[#allocation8 + $0x520] sm:$0xf]  ;;  %v7729_v53 = vld [vmem:[#allocation8 + $0x2d0] sm:$0xf0] }
 0x21b   :  { %v8096_v26 = vor.u32 %v9228_v22, %v8095_v20  ;;  %v8159_v41 = vld [vmem:[#allocation8 + $0x620] sm:$0xf]  ;;  %v9176_v20 = vld [vmem:[#allocation8 + $0x40c] sm:$0xf0]  ;;  %v7585_v29 = vld [vmem:[#allocation8 + $0x1b0] sm:$0xf0] }
 0x21c   :  { %4872 = vmatpush.bf16.msra.mxu0 %v7792_v25  ;;  %4834 = vmatpush.bf16.msra.mxu3 %v7392_v30  ;;  %v9260_v25 = vld [vmem:[#allocation8 + $0x6ac] sm:$0xf0]  ;;  %v3054_v30 = vpop.f32.mrf.mxu0  ;;  %v3016_v38 = vadd.f32 %v9804_v17, %v3003_v46  ;;  %v7887_v19 = vld [vmem:[#allocation8 + $0x400] sm:$0xf]  ;;  %v8160_v46 = vor.u32 %v9244_v14, %v8159_v41  ;;  %v9062_v60 = vld [vmem:[#allocation8 + $0x84] sm:$0xf] }
 0x21d   :  { %4847 = vmatpush.bf16.msra.mxu1 %v7520_v33  ;;  %v8224_v10 = vor.u32 %v9260_v25, %v8223_v24  ;;  %v7952_v33 = vor.u32 %v9192_v28, %v7951_v27  ;;  %v3067_v17 = vpop.f32.mrf.mxu2  ;;  %v8015_v22 = vld [vmem:[#allocation8 + $0x500] sm:$0xf]  ;;  %v9074_v24 = vld [vmem:[#allocation8 + $0xe4] sm:$0xf]  ;;  %v7489_v25 = vld [vmem:[#allocation8 + $0xf0] sm:$0xf0]  ;;  %v7888_v18 = vor.u32 %v9176_v20, %v7887_v19 }
 0x21e   :  { %4860 = vmatpush.bf16.msra.mxu2 %v7648_v34  ;;  %v8207_v34 = vld [vmem:[#allocation8 + $0x680] sm:$0xf]  ;;  %v9106_v27 = vld [vmem:[#allocation8 + $0x1e4] sm:$0xf]  ;;  %v7617_v28 = vld [vmem:[#allocation8 + $0x1f0] sm:$0xf0] }
 0x21f   :  { %v8208_v44 = vor.u32 %v9256_v35, %v8207_v34  ;;  %v8143_v52 = vld [vmem:[#allocation8 + $0x600] sm:$0xf]  ;;  %v7492_v34 = vor.u32 %v9074_v24, %v7489_v25  ;;  %v9070_v35 = vld [vmem:[#allocation8 + $0xc4] sm:$0xf]  ;;  %v9292_v32 = vld [vmem:[#allocation8 + $0x7ac] sm:$0xf0] }
 0x220   :  { %4873 = vmatpush.bf16.msra.mxu0 %v7776_v15  ;;  %4835 = vmatpush.bf16.msra.mxu3 %v7376_v45  ;;  %v9188_v15 = vld [vmem:[#allocation8 + $0x46c] sm:$0xf0]  ;;  %v8191_v45 = vld [vmem:[#allocation8 + $0x660] sm:$0xf]  ;;  %v9094_v14 = vld [vmem:[#allocation8 + $0x184] sm:$0xf] }
 0x221   :  { %4848 = vmatpush.bf16.msra.mxu1 %v7504_v48  ;;  %v7936_v43 = vor.u32 %v9188_v15, %v7935_v57  ;;  %v9184_v48 = vld [vmem:[#allocation8 + $0x44c] sm:$0xf0]  ;;  %v7745_v57 = vld [vmem:[#allocation8 + $0x2f0] sm:$0xf0]  ;;  %v7620_v15 = vor.u32 %v9106_v27, %v7617_v28  ;;  %v8335_v28 = vld [vmem:[#allocation8 + $0x780] sm:$0xf] }
 0x222   :  { %4861 = vmatpush.bf16.msra.mxu2 %v7632_v50  ;;  %v3029_v50 = vadd.f32 %v3028_v31, %v3016_v38  ;;  %v7920_v0 = vor.u32 %v9184_v48, %v7919_v47  ;;  %v8383_v38 = vld [vmem:[#allocation8 + $0x7e0] sm:$0xf]  ;;  %v9102_v31 = vld [vmem:[#allocation8 + $0x1c4] sm:$0xf]  ;;  %v9831_v47 = vpack.c.bf16 %v3270_v62, %v3270_v62  ;;  %v7697_v24 = vld [vmem:[#allocation8 + $0x290] sm:$0xf0] }
 0x223   :  { %4836 = vmatmul.bf16.vlgmr.msra.gmra.mxu3 %v9810_v5  ;;  %v7425_v27 = vld [vmem:[#allocation8 + $0x70] sm:$0xf0]  ;;  %v9090_v62 = vld [vmem:[#allocation8 + $0x164] sm:$0xf] }
 0x224   :  { %4874 = vmatpush.bf16.msra.mxu0 %v7760_v55  ;;  %4880 = vmatpush.bf16.msrb.mxu3 %v8000_v59  ;;  %v3056_v55 = vpop.f32.mrf.mxu0  ;;  %v8192_v59 = vor.u32 %v9252_v56, %v8191_v45  ;;  %v3042_v54 = vadd.f32 %v3041_v58, %v3029_v50  ;;  %v7473_v58 = vld [vmem:[#allocation8 + $0xd0] sm:$0xf0]  ;;  %v9066_v56 = vld [vmem:[#allocation8 + $0xa4] sm:$0xf] }
 0x225   :  { %4893 = vmatpush.bf16.msrb.mxu1 %v8128_v2  ;;  %4862 = vmatmul.bf16.vlgmr.msra.gmra.mxu2 %v9814_v9  ;;  %v7903_v2 = vld [vmem:[#allocation8 + $0x420] sm:$0xf]  ;;  %v7476_v48 = vor.u32 %v9070_v35, %v7473_v58  ;;  %v7457_v50 = vld [vmem:[#allocation8 + $0xb0] sm:$0xf0]  ;;  %v9122_v35 = vld [vmem:[#allocation8 + $0x264] sm:$0xf] }
 0x226   :  { %4849 = vmatmul.bf16.vlgmr.msra.gmra.mxu1 %v9812_v42  ;;  %4906 = vmatpush.bf16.msrb.mxu2 %v8256_v49  ;;  %v9212_v49 = vld [vmem:[#allocation8 + $0x52c] sm:$0xf0] }
 0x227   :  { %4875 = vmatmul.bf16.vlgmr.msra.gmra.mxu0 %v9816_v11  ;;  %v8032_v16 = vor.u32 %v9212_v49, %v8031_v4  ;;  %v7713_v4 = vld [vmem:[#allocation8 + $0x2b0] sm:$0xf0]  ;;  %v9284_v58 = vld [vmem:[#allocation8 + $0x76c] sm:$0xf0] }
 0x228   :  { %4881 = vmatpush.bf16.msrb.mxu3 %v7984_v6  ;;  %v3030_v6 = vpop.f32.mrf.mxu3 }
 0x229   :  { %4894 = vmatpush.bf16.msrb.mxu1 %v8112_v12  ;;  %v7904_v12 = vor.u32 %v9180_v3, %v7903_v2  ;;  %v7732_v2 = vor.u32 %v9134_v51, %v7729_v53  ;;  %v7460_v3 = vor.u32 %v9066_v56, %v7457_v50  ;;  %v7441_v6 = vld [vmem:[#allocation8 + $0x90] sm:$0xf0]  ;;  %v9050_v56 = vld [vmem:[#allocation8 + $0x24] sm:$0xf] }
 0x22a   :  { %4907 = vmatpush.bf16.msrb.mxu2 %v8240_v21  ;;  %v3055_v21 = vadd.f32 %v3054_v30, %v3042_v54  ;;  %v9130_v54 = vld [vmem:[#allocation8 + $0x2a4] sm:$0xf]  ;;  %v7393_v51 = vld [vmem:[#allocation8 + $0x30] sm:$0xf0] }
 0x22b   :  { %v7716_v20 = vor.u32 %v9130_v54, %v7713_v4  ;;  %v7649_v54 = vld [vmem:[#allocation8 + $0x230] sm:$0xf0] }
 0x22c   :  { %4882 = vmatpush.bf16.msrb.mxu3 %v7968_v23  ;;  %v9208_v23 = vld [vmem:[#allocation8 + $0x50c] sm:$0xf0]  ;;  %v3068_v30 = vadd.f32 %v3067_v17, %v3055_v21  ;;  %v9058_v21 = vld [vmem:[#allocation8 + $0x64] sm:$0xf] }
 0x22d   :  { %4895 = vmatpush.bf16.msrb.mxu1 %v8096_v26  ;;  %v3069_v26 = vpop.f32.mrf.mxu2 }
 0x22e   :  { %4908 = vmatpush.bf16.msrb.mxu2 %v8224_v10  ;;  %v9240_v10 = vld [vmem:[#allocation8 + $0x60c] sm:$0xf0] }
 0x22f   :  { %v8144_v36 = vor.u32 %v9240_v10, %v8143_v52  ;;  %v9839_v26 = vpop.f32.mrf.mxu1 }
 0x230   :  { %4883 = vmatpush.bf16.msrb.mxu3 %v7952_v33  ;;  %v8016_v33 = vor.u32 %v9208_v23, %v8015_v22  ;;  %v3080_v40 = vpop.f32.mrf.mxu3  ;;  %v7444_v22 = vor.u32 %v9062_v60, %v7441_v6  ;;  %v9126_v23 = vld [vmem:[#allocation8 + $0x284] sm:$0xf]  ;;  %v8287_v6 = vld [vmem:[#allocation8 + $0x720] sm:$0xf] }
 0x231   :  { %4896 = vmatpush.bf16.msrb.mxu1 %v8080_v37  ;;  %v9138_v37 = vld [vmem:[#allocation8 + $0x2e4] sm:$0xf]  ;;  %v3081_v45 = vadd.f32 %v3080_v40, %v3068_v30  ;;  %v9837_v41 = vpop.f32.mrf.mxu0  ;;  %v7700_v10 = vor.u32 %v9126_v23, %v7697_v24  ;;  %v7409_v30 = vld [vmem:[#allocation8 + $0x50] sm:$0xf0] }
 0x232   :  { %4909 = vmatpush.bf16.msrb.mxu2 %v8208_v44  ;;  %v7601_v44 = vld [vmem:[#allocation8 + $0x1d0] sm:$0xf0]  ;;  %v9086_v40 = vld [vmem:[#allocation8 + $0x144] sm:$0xf] }
 0x233   :  { %v3271_v17 = vmax.f32 %v3081_v45, 0.0  ;;  %v7604_v55 = vor.u32 %v9102_v31, %v7601_v44  ;;  %v7537_v31 = vld [vmem:[#allocation8 + $0x150] sm:$0xf0]  ;;  %v9114_v60 = vld [vmem:[#allocation8 + $0x224] sm:$0xf] }
 0x234   :  { %4884 = vmatpush.bf16.msrb.mxu3 %v7936_v43  ;;  %v8384_v43 = vor.u32 %v9300_v39, %v8383_v38  ;;  %v7540_v50 = vor.u32 %v9086_v40, %v7537_v31  ;;  %v7652_v24 = vor.u32 %v9114_v60, %v7649_v54  ;;  %v8081_v60 = vld [vmem:[#allocation8 + $0x590] sm:$0xf0] }
 0x235   :  { %4897 = vmatpush.bf16.msrb.mxu1 %v8064_v8  ;;  %v7748_v8 = vor.u32 %v9138_v37, %v7745_v57  ;;  %v7681_v37 = vld [vmem:[#allocation8 + $0x270] sm:$0xf0] }
 0x236   :  { %4910 = vmatpush.bf16.msrb.mxu2 %v8192_v59  ;;  %4919 = vmatpush.bf16.msrb.mxu0 %v8384_v43  ;;  %v8367_v59 = vld [vmem:[#allocation8 + $0x7c0] sm:$0xf]  ;;  %v7684_v43 = vor.u32 %v9122_v35, %v7681_v37  ;;  %v7985_v35 = vld [vmem:[#allocation8 + $0x4d0] sm:$0xf0] }
 0x237   :  { %v8368_v61 = vor.u32 %v9296_v63, %v8367_v59  ;;  %v3095_v53 = vpop.f32.mrf.mxu1  ;;  %v9082_v59 = vld [vmem:[#allocation8 + $0x124] sm:$0xf]  ;;  %v7521_v63 = vld [vmem:[#allocation8 + $0x130] sm:$0xf0] }
 0x238   :  { %4885 = vmatpush.bf16.msrb.mxu3 %v7920_v0  ;;  %v9098_v0 = vld [vmem:[#allocation8 + $0x1a4] sm:$0xf]  ;;  %v7524_v4 = vor.u32 %v9082_v59, %v7521_v63  ;;  %v8097_v53 = vld [vmem:[#allocation8 + $0x5b0] sm:$0xf0] }
 0x239   :  { %4898 = vmatpush.bf16.msrb.mxu1 %v8048_v1  ;;  %v9834_v1 = vpack.c.bf16 %v3271_v17, %v3271_v17  ;;  %v7588_v49 = vor.u32 %v9098_v0, %v7585_v29  ;;  %v3121_v39 = vpop.f32.mrf.mxu0  ;;  %v8303_v17 = vld [vmem:[#allocation8 + $0x740] sm:$0xf]  ;;  %v9046_v29 = vld [vmem:[#allocation8 + $0x4] sm:$0xf] }
 0x23a   :  { %4911 = vmatpush.bf16.msrb.mxu2 %v8176_v7  ;;  %4920 = vmatpush.bf16.msrb.mxu0 %v8368_v61  ;;  %v8351_v7 = vld [vmem:[#allocation8 + $0x7a0] sm:$0xf]  ;;  %v7873_v39 = vld [vmem:[#allocation8 + $0x3f0] sm:$0xf0]  ;;  %v9190_v59 = vld [vmem:[#allocation8 + $0x484] sm:$0xf] }
 0x23b   :  { %v8352_v19 = vor.u32 %v9292_v32, %v8351_v7  ;;  %v9276_v7 = vld [vmem:[#allocation8 + $0x72c] sm:$0xf0]  ;;  %v7505_v32 = vld [vmem:[#allocation8 + $0x110] sm:$0xf0] }
 0x23c   :  { %4886 = vmatpush.bf16.msrb.mxu3 %v7904_v12  ;;  %v3082_v12 = vpop.f32.mrf.mxu3 }
 0x23d   :  { %4899 = vmatpush.bf16.msrb.mxu1 %v8032_v16  ;;  %v7569_v16 = vld [vmem:[#allocation8 + $0x190] sm:$0xf0]  ;;  %v9202_v12 = vld [vmem:[#allocation8 + $0x4e4] sm:$0xf] }
 0x23e   :  { %4912 = vmatpush.bf16.msrb.mxu2 %v8160_v46  ;;  %v7572_v25 = vor.u32 %v9094_v14, %v7569_v16  ;;  %4921 = vmatpush.bf16.msrb.mxu0 %v8352_v19  ;;  %v9288_v46 = vld [vmem:[#allocation8 + $0x78c] sm:$0xf0]  ;;  %v8001_v14 = vld [vmem:[#allocation8 + $0x4f0] sm:$0xf0] }
 0x23f   :  { %v8336_v52 = vor.u32 %v9288_v46, %v8335_v28  ;;  %v7633_v28 = vld [vmem:[#allocation8 + $0x210] sm:$0xf0]  ;;  %v564_v46 = vperm.slane %v9821_v13, 6 }
 0x240   :  { %4887 = vmatpush.bf16.msrb.mxu3 %v7888_v18  ;;  %v7553_v18 = vld [vmem:[#allocation8 + $0x170] sm:$0xf0] }
 0x241   :  { %4900 = vmatpush.bf16.msrb.mxu1 %v8016_v33  ;;  %v7428_v33 = vor.u32 %v9058_v21, %v7425_v27  ;;  %v7556_v57 = vor.u32 %v9090_v62, %v7553_v18  ;;  %v9845_v19 = vpop.f32.mrf.mxu0  ;;  %v8129_v21 = vld [vmem:[#allocation8 + $0x5f0] sm:$0xf0]  ;;  %v9110_v27 = vld [vmem:[#allocation8 + $0x204] sm:$0xf]  ;;  %v8004_v18 = vor.u32 %v9202_v12, %v8001_v14  ;;  %v3094_v31 = vadd.f32 %v9839_v26, %v564_v46 }
 0x242   :  { %4913 = vmatpush.bf16.msrb.mxu2 %v8144_v36  ;;  %4922 = vmatpush.bf16.msrb.mxu0 %v8336_v52  ;;  %v9843_v36 = vpop.f32.mrf.mxu2  ;;  %v8271_v52 = vld [vmem:[#allocation8 + $0x700] sm:$0xf]  ;;  %v7825_v12 = vld [vmem:[#allocation8 + $0x390] sm:$0xf0]  ;;  %v9218_v14 = vld [vmem:[#allocation8 + $0x564] sm:$0xf] }
 0x243   :  { %4888 = vmatmul.bf16.vlgmr.msrb.gmra.mxu3 %v9831_v47 }
 0x244   :  { %4932 = vmatpush.bf16.msra.mxu3 %v7492_v34  ;;  %4901 = vmatmul.bf16.vlgmr.msrb.gmra.mxu1 %v9834_v1  ;;  %v9054_v34 = vld [vmem:[#allocation8 + $0x44] sm:$0xf]  ;;  %v9841_v38 = vpop.f32.mrf.mxu3 }
 0x245   :  { %4945 = vmatpush.bf16.msra.mxu1 %v7620_v15  ;;  %v8319_v15 = vld [vmem:[#allocation8 + $0x760] sm:$0xf]  ;;  %v7412_v45 = vor.u32 %v9054_v34, %v7409_v30  ;;  %v9198_v34 = vld [vmem:[#allocation8 + $0x4c4] sm:$0xf] }
 0x246   :  { %4958 = vmatpush.bf16.msra.mxu2 %v7748_v8  ;;  %v8320_v44 = vor.u32 %v9284_v58, %v8319_v15  ;;  %v9118_v8 = vld [vmem:[#allocation8 + $0x244] sm:$0xf]  ;;  %v8113_v15 = vld [vmem:[#allocation8 + $0x5d0] sm:$0xf0]  ;;  %v7636_v58 = vor.u32 %v9110_v27, %v7633_v28 }
 0x247   :  { %v9230_v30 = vld [vmem:[#allocation8 + $0x5c4] sm:$0xf]  ;;  %v7809_v28 = vld [vmem:[#allocation8 + $0x370] sm:$0xf0] }
 0x248   :  { %4933 = vmatpush.bf16.msra.mxu3 %v7476_v48  ;;  %v7665_v48 = vld [vmem:[#allocation8 + $0x250] sm:$0xf0]  ;;  %4923 = vmatpush.bf16.msrb.mxu0 %v8320_v44  ;;  %v7988_v44 = vor.u32 %v9198_v34, %v7985_v35  ;;  %v9154_v27 = vld [vmem:[#allocation8 + $0x364] sm:$0xf] }
 0x249   :  { %4946 = vmatpush.bf16.msra.mxu1 %v7604_v55  ;;  %v9280_v55 = vld [vmem:[#allocation8 + $0x74c] sm:$0xf0]  ;;  %v7668_v61 = vor.u32 %v9118_v8, %v7665_v48  ;;  %v3173_v8 = vpop.f32.mrf.mxu0  ;;  %v9166_v48 = vld [vmem:[#allocation8 + $0x3c4] sm:$0xf] }
 0x24a   :  { %4959 = vmatpush.bf16.msra.mxu2 %v7732_v2  ;;  %v8304_v0 = vor.u32 %v9280_v55, %v8303_v17  ;;  %v7396_v2 = vor.u32 %v9050_v56, %v7393_v51  ;;  %v3134_v23 = vpop.f32.mrf.mxu2  ;;  %v7969_v56 = vld [vmem:[#allocation8 + $0x4b0] sm:$0xf0]  ;;  %v9226_v51 = vld [vmem:[#allocation8 + $0x5a4] sm:$0xf]  ;;  %v3107_v17 = vadd.f32 %v9841_v38, %v3094_v31 }
 0x24b   :  { %v8100_v63 = vor.u32 %v9226_v51, %v8097_v53  ;;  %v8033_v31 = vld [vmem:[#allocation8 + $0x530] sm:$0xf0]  ;;  %v9206_v53 = vld [vmem:[#allocation8 + $0x504] sm:$0xf] }
 0x24c   :  { %4934 = vmatpush.bf16.msra.mxu3 %v7460_v3  ;;  %v7377_v3 = vld [vmem:[#allocation8 + $0x10] sm:$0xf0]  ;;  %4924 = vmatpush.bf16.msrb.mxu0 %v8304_v0  ;;  %v3108_v16 = vpop.f32.mrf.mxu3 }
 0x24d   :  { %4947 = vmatpush.bf16.msra.mxu1 %v7588_v49  ;;  %v9078_v49 = vld [vmem:[#allocation8 + $0x104] sm:$0xf]  ;;  %v7953_v0 = vld [vmem:[#allocation8 + $0x490] sm:$0xf0] }
 0x24e   :  { %4960 = vmatpush.bf16.msra.mxu2 %v7716_v20  ;;  %v8288_v20 = vor.u32 %v9276_v7, %v8287_v6  ;;  %v7508_v62 = vor.u32 %v9078_v49, %v7505_v32  ;;  %v7956_v49 = vor.u32 %v9190_v59, %v7953_v0  ;;  %v9186_v6 = vld [vmem:[#allocation8 + $0x464] sm:$0xf]  ;;  %v7937_v7 = vld [vmem:[#allocation8 + $0x470] sm:$0xf0] }
 0x24f   :  { %v9158_v32 = vld [vmem:[#allocation8 + $0x384] sm:$0xf]  ;;  %v8065_v16 = vld [vmem:[#allocation8 + $0x570] sm:$0xf0]  ;;  %v7940_v23 = vor.u32 %v9186_v6, %v7937_v7 }
 0x250   :  { %4935 = vmatpush.bf16.msra.mxu3 %v7444_v22  ;;  %v9234_v22 = vld [vmem:[#allocation8 + $0x5e4] sm:$0xf]  ;;  %4925 = vmatpush.bf16.msrb.mxu0 %v8288_v20  ;;  %v7889_v51 = vld [vmem:[#allocation8 + $0x410] sm:$0xf0] }
 0x251   :  { %4948 = vmatpush.bf16.msra.mxu1 %v7572_v25  ;;  %v7380_v25 = vor.u32 %v9046_v29, %v7377_v3  ;;  %v9162_v29 = vld [vmem:[#allocation8 + $0x3a4] sm:$0xf] }
 0x252   :  { %4961 = vmatpush.bf16.msra.mxu2 %v7700_v10  ;;  %v9272_v10 = vld [vmem:[#allocation8 + $0x70c] sm:$0xf0]  ;;  %v9222_v3 = vld [vmem:[#allocation8 + $0x584] sm:$0xf] }
 0x253   :  { %v8272_v37 = vor.u32 %v9272_v10, %v8271_v52  ;;  %v8084_v38 = vor.u32 %v9222_v3, %v8081_v60  ;;  %v9146_v59 = vld [vmem:[#allocation8 + $0x324] sm:$0xf]  ;;  %v8241_v60 = vld [vmem:[#allocation8 + $0x6d0] sm:$0xf0] }
 0x254   :  { %4936 = vmatpush.bf16.msra.mxu3 %v7428_v33  ;;  %v8132_v33 = vor.u32 %v9234_v22, %v8129_v21  ;;  %v7828_v22 = vor.u32 %v9158_v32, %v7825_v12  ;;  %v9262_v3 = vld [vmem:[#allocation8 + $0x6c4] sm:$0xf]  ;;  %v7479_v32 = vld [vmem:[#allocation8 + $0xc8] sm:$0xf] }
 0x255   :  { %4949 = vmatpush.bf16.msra.mxu1 %v7556_v57  ;;  %v9170_v57 = vld [vmem:[#allocation8 + $0x3e4] sm:$0xf]  ;;  %4926 = vmatpush.bf16.msrb.mxu0 %v8272_v37  ;;  %v9853_v20 = vpop.f32.mrf.mxu0 }
 0x256   :  { %4962 = vmatpush.bf16.msra.mxu2 %v7684_v43  ;;  %v7876_v40 = vor.u32 %v9170_v57, %v7873_v39  ;;  %v9194_v43 = vld [vmem:[#allocation8 + $0x4a4] sm:$0xf]  ;;  %v7793_v39 = vld [vmem:[#allocation8 + $0x350] sm:$0xf0] }
 0x257   :  { %v7972_v55 = vor.u32 %v9194_v43, %v7969_v56  ;;  %v9178_v37 = vld [vmem:[#allocation8 + $0x424] sm:$0xf]  ;;  %v8257_v43 = vld [vmem:[#allocation8 + $0x6f0] sm:$0xf0] }
 0x258   :  { %4937 = vmatpush.bf16.msra.mxu3 %v7412_v45  ;;  %v8116_v45 = vor.u32 %v9230_v30, %v8113_v15  ;;  %v9210_v15 = vld [vmem:[#allocation8 + $0x524] sm:$0xf] }
 0x259   :  { %4950 = vmatpush.bf16.msra.mxu1 %v7540_v50  ;;  %v7857_v50 = vld [vmem:[#allocation8 + $0x3d0] sm:$0xf0]  ;;  %4971 = vmatpush.bf16.msra.mxu0 %v7876_v40  ;;  %v9174_v56 = vld [vmem:[#allocation8 + $0x404] sm:$0xf] }
 0x25a   :  { %4963 = vmatpush.bf16.msra.mxu2 %v7668_v61  ;;  %v7860_v26 = vor.u32 %v9166_v48, %v7857_v50  ;;  %v7841_v61 = vld [vmem:[#allocation8 + $0x3b0] sm:$0xf0]  ;;  %v3158_v10 = vpop.f32.mrf.mxu3  ;;  %v9142_v12 = vld [vmem:[#allocation8 + $0x304] sm:$0xf] }
 0x25b   :  { %v7844_v54 = vor.u32 %v9162_v29, %v7841_v61  ;;  %v9077_v29 = vld [vmem:[#allocation8 + $0xf4] sm:$0xf0]  ;;  %v7623_v61 = vld [vmem:[#allocation8 + $0x1e8] sm:$0xf] }
 0x25c   :  { %4938 = vmatpush.bf16.msra.mxu3 %v7396_v2  ;;  %v3145_v2 = vpop.f32.mrf.mxu1  ;;  %v9856_v57 = vpop.f32.mrf.mxu2 }
 0x25d   :  { %4951 = vmatpush.bf16.msra.mxu1 %v7524_v4  ;;  %4972 = vmatpush.bf16.msra.mxu0 %v7860_v26  ;;  %v3120_v4 = vadd.f32 %v9837_v41, %v3107_v17  ;;  %v8068_v41 = vor.u32 %v9218_v14, %v8065_v16  ;;  %v8036_v26 = vor.u32 %v9210_v15, %v8033_v31  ;;  %v9097_v31 = vld [vmem:[#allocation8 + $0x194] sm:$0xf0] }
 0x25e   :  { %4964 = vmatpush.bf16.msra.mxu2 %v7652_v24  ;;  %v9182_v24 = vld [vmem:[#allocation8 + $0x444] sm:$0xf]  ;;  %v8244_v16 = vor.u32 %v9262_v3, %v8241_v60  ;;  %v7543_v3 = vld [vmem:[#allocation8 + $0x148] sm:$0xf]  ;;  %v9089_v60 = vld [vmem:[#allocation8 + $0x154] sm:$0xf0] }
 0x25f   :  { %v3133_v21 = vadd.f32 %v9843_v36, %v3120_v4  ;;  %v7905_v36 = vld [vmem:[#allocation8 + $0x430] sm:$0xf0] }
 0x260   :  { %4939 = vmatpush.bf16.msra.mxu3 %v7380_v25  ;;  %v7921_v25 = vld [vmem:[#allocation8 + $0x450] sm:$0xf0]  ;;  %v7908_v50 = vor.u32 %v9178_v37, %v7905_v36  ;;  %v565_v37 = vperm.slane %v9821_v13, 7 }
 0x261   :  { %4952 = vmatpush.bf16.msra.mxu1 %v7508_v62  ;;  %4973 = vmatpush.bf16.msra.mxu0 %v7844_v54  ;;  %v3146_v46 = vadd.f32 %v3145_v2, %v3133_v21  ;;  %v9214_v62 = vld [vmem:[#allocation8 + $0x544] sm:$0xf]  ;;  %v7924_v35 = vor.u32 %v9182_v24, %v7921_v25  ;;  %v9109_v2 = vld [vmem:[#allocation8 + $0x1f4] sm:$0xf0]  ;;  %v7607_v21 = vld [vmem:[#allocation8 + $0x1c8] sm:$0xf] }
 0x262   :  { %4965 = vmatpush.bf16.msra.mxu2 %v7636_v58  ;;  %v9150_v58 = vld [vmem:[#allocation8 + $0x344] sm:$0xf]  ;;  %v3160_v54 = vpop.f32.mrf.mxu3  ;;  %v7624_v14 = vor.u32 %v9109_v2, %v7623_v61  ;;  %v9105_v24 = vld [vmem:[#allocation8 + $0x1d4] sm:$0xf0]  ;;  %v8225_v25 = vld [vmem:[#allocation8 + $0x6b0] sm:$0xf0] }
 0x263   :  { %4940 = vmatmul.bf16.vlgmr.msra.gmra.mxu3 %v9810_v5  ;;  %v3159_v34 = vadd.f32 %v3158_v10, %v3146_v46  ;;  %v7796_v8 = vor.u32 %v9150_v58, %v7793_v39  ;;  %v7608_v46 = vor.u32 %v9105_v24, %v7607_v21  ;;  %v7591_v10 = vld [vmem:[#allocation8 + $0x1a8] sm:$0xf]  ;;  %v9065_v39 = vld [vmem:[#allocation8 + $0x94] sm:$0xf0]  ;;  %v9242_v54 = vld [vmem:[#allocation8 + $0x624] sm:$0xf] }
 0x264   :  { %4984 = vmatpush.bf16.msrb.mxu3 %v8004_v18  ;;  %4953 = vmatmul.bf16.vlgmr.msra.gmra.mxu1 %v9812_v42  ;;  %v8049_v18 = vld [vmem:[#allocation8 + $0x550] sm:$0xf0]  ;;  %v3147_v52 = vpop.f32.mrf.mxu1  ;;  %v3186_v6 = vpop.f32.mrf.mxu2  ;;  %v7447_v58 = vld [vmem:[#allocation8 + $0x88] sm:$0xf]  ;;  %v9057_v2 = vld [vmem:[#allocation8 + $0x54] sm:$0xf0] }
 0x265   :  { %4997 = vmatpush.bf16.msrb.mxu1 %v8132_v33  ;;  %4974 = vmatpush.bf16.msra.mxu0 %v7828_v22  ;;  %v7812_v33 = vor.u32 %v9154_v27, %v7809_v28  ;;  %v8052_v30 = vor.u32 %v9214_v62, %v8049_v18  ;;  %v3172_v40 = vadd.f32 %v9845_v19, %v3159_v34  ;;  %v7495_v19 = vld [vmem:[#allocation8 + $0xe8] sm:$0xf]  ;;  %v9073_v22 = vld [vmem:[#allocation8 + $0xd4] sm:$0xf0]  ;;  %v9254_v34 = vld [vmem:[#allocation8 + $0x684] sm:$0xf] }
 0x266   :  { %v7496_v7 = vor.u32 %v9077_v29, %v7495_v19  ;;  %v7480_v28 = vor.u32 %v9073_v22, %v7479_v32  ;;  %v7463_v18 = vld [vmem:[#allocation8 + $0xa8] sm:$0xf]  ;;  %v9069_v52 = vld [vmem:[#allocation8 + $0xb4] sm:$0xf0]  ;;  %v9238_v24 = vld [vmem:[#allocation8 + $0x604] sm:$0xf] }
 0x267   :  { %v3272_v48 = vmax.f32 %v3172_v40, 0.0  ;;  %v7464_v36 = vor.u32 %v9069_v52, %v7463_v18  ;;  %v7575_v40 = vld [vmem:[#allocation8 + $0x188] sm:$0xf]  ;;  %v9053_v22 = vld [vmem:[#allocation8 + $0x34] sm:$0xf0] }
 0x268   :  { %4985 = vmatpush.bf16.msrb.mxu3 %v7988_v44  ;;  %v9266_v44 = vld [vmem:[#allocation8 + $0x6e4] sm:$0xf]  ;;  %v7576_v13 = vor.u32 %v9097_v31, %v7575_v40  ;;  %v7415_v61 = vld [vmem:[#allocation8 + $0x48] sm:$0xf]  ;;  %v9237_v40 = vld [vmem:[#allocation8 + $0x5f4] sm:$0xf0] }
 0x269   :  { %4998 = vmatpush.bf16.msrb.mxu1 %v8116_v45  ;;  %v3199_v45 = vpop.f32.mrf.mxu0  ;;  %4975 = vmatpush.bf16.msra.mxu0 %v7812_v33  ;;  %v8260_v17 = vor.u32 %v9266_v44, %v8257_v43  ;;  %v9859_v0 = vpack.c.bf16 %v3272_v48, %v3272_v48  ;;  %v9101_v33 = vld [vmem:[#allocation8 + $0x1b4] sm:$0xf0]  ;;  %v9250_v44 = vld [vmem:[#allocation8 + $0x664] sm:$0xf]  ;;  %v8193_v43 = vld [vmem:[#allocation8 + $0x670] sm:$0xf0] }
 0x26a   :  { %v3185_v45 = vadd.f32 %v9856_v57, %v565_v37  ;;  %v8196_v48 = vor.u32 %v9250_v44, %v8193_v43  ;;  %v7527_v21 = vld [vmem:[#allocation8 + $0x128] sm:$0xf]  ;;  %v9081_v37 = vld [vmem:[#allocation8 + $0x114] sm:$0xf0] }
 0x26b   :  { %4914 = vmatmul.bf16.vlgmr.msrb.gmra.mxu2 %v9859_v0  ;;  %v7383_v18 = vld [vmem:[#allocation8 + $0x8] sm:$0xf]  ;;  %v9137_v44 = vld [vmem:[#allocation8 + $0x2d4] sm:$0xf0] }
 0x26c   :  { %4986 = vmatpush.bf16.msrb.mxu3 %v7972_v55  ;;  %v8017_v55 = vld [vmem:[#allocation8 + $0x510] sm:$0xf0]  ;;  %5010 = vmatpush.bf16.msrb.mxu2 %v8260_v17  ;;  %v9246_v17 = vld [vmem:[#allocation8 + $0x644] sm:$0xf]  ;;  %v7735_v31 = vld [vmem:[#allocation8 + $0x2c8] sm:$0xf] }
 0x26d   :  { %4999 = vmatpush.bf16.msrb.mxu1 %v8100_v63  ;;  %v7777_v63 = vld [vmem:[#allocation8 + $0x330] sm:$0xf0]  ;;  %4976 = vmatpush.bf16.msra.mxu0 %v7796_v8  ;;  %v7448_v8 = vor.u32 %v9065_v39, %v7447_v58  ;;  %v8135_v58 = vld [vmem:[#allocation8 + $0x5e8] sm:$0xf] }
 0x26e   :  { %v7780_v4 = vor.u32 %v9146_v59, %v7777_v63  ;;  %v3198_v59 = vadd.f32 %v9853_v20, %v3185_v45  ;;  %v7416_v20 = vor.u32 %v9057_v2, %v7415_v61 }
 0x270   :  { %4987 = vmatpush.bf16.msrb.mxu3 %v7956_v49  ;;  %v7892_v49 = vor.u32 %v9174_v56, %v7889_v51  ;;  %5011 = vmatpush.bf16.msrb.mxu2 %v8244_v16  ;;  %v9061_v51 = vld [vmem:[#allocation8 + $0x74] sm:$0xf0]  ;;  %v7399_v16 = vld [vmem:[#allocation8 + $0x28] sm:$0xf] }
 0x271   :  { %5000 = vmatpush.bf16.msrb.mxu1 %v8084_v38  ;;  %v8020_v38 = vor.u32 %v9206_v53, %v8017_v55  ;;  %4977 = vmatpush.bf16.msra.mxu0 %v7780_v4  ;;  %v7559_v53 = vld [vmem:[#allocation8 + $0x168] sm:$0xf]  ;;  %v8177_v55 = vld [vmem:[#allocation8 + $0x650] sm:$0xf0] }
 0x272   :  { %v8180_v29 = vor.u32 %v9246_v17, %v8177_v55  ;;  %v8161_v4 = vld [vmem:[#allocation8 + $0x630] sm:$0xf0]  ;;  %v8136_v17 = vor.u32 %v9237_v40, %v8135_v58  ;;  %v7736_v55 = vor.u32 %v9137_v44, %v7735_v31  ;;  %v9874_v58 = vld [vmem:[#allocation10] sm:$0xf]  ;;  %v7671_v40 = vld [vmem:[#allocation8 + $0x248] sm:$0xf] }
 0x273   :  { %v9121_v31 = vld [vmem:[#allocation8 + $0x254] sm:$0xf0] }
 0x274   :  { %4988 = vmatpush.bf16.msrb.mxu3 %v7940_v23  ;;  %v7761_v23 = vld [vmem:[#allocation8 + $0x310] sm:$0xf0] }
 0x275   :  { %5001 = vmatpush.bf16.msrb.mxu1 %v8068_v41  ;;  %v9258_v41 = vld [vmem:[#allocation8 + $0x6a4] sm:$0xf]  ;;  %v7764_v27 = vor.u32 %v9142_v12, %v7761_v23  ;;  %v7544_v12 = vor.u32 %v9089_v60, %v7543_v3  ;;  %v9085_v23 = vld [vmem:[#allocation8 + $0x134] sm:$0xf0] }
 0x276   :  { %v8228_v62 = vor.u32 %v9258_v41, %v8225_v25  ;;  %v8145_v41 = vld [vmem:[#allocation8 + $0x610] sm:$0xf0]  ;;  %v9294_v60 = vld [vmem:[#allocation8 + $0x7c4] sm:$0xf] }
 0x277   :  { %4978 = vmatpush.bf16.msra.mxu0 %v7764_v27 }
 0x278   :  { %4989 = vmatpush.bf16.msrb.mxu3 %v7924_v35  ;;  %v8209_v35 = vld [vmem:[#allocation8 + $0x690] sm:$0xf0]  ;;  %5012 = vmatpush.bf16.msrb.mxu2 %v8228_v62  ;;  %v7400_v62 = vor.u32 %v9053_v22, %v7399_v16 }
 0x279   :  { %5002 = vmatpush.bf16.msrb.mxu1 %v8052_v30  ;;  %v7592_v30 = vor.u32 %v9101_v33, %v7591_v10  ;;  %v8212_v15 = vor.u32 %v9254_v34, %v8209_v35  ;;  %v7528_v10 = vor.u32 %v9085_v23, %v7527_v21  ;;  %v8148_v33 = vor.u32 %v9238_v24, %v8145_v41  ;;  %v9049_v34 = vld [vmem:[#allocation8 + $0x14] sm:$0xf0]  ;;  %v7511_v35 = vld [vmem:[#allocation8 + $0x108] sm:$0xf]  ;;  %v9290_v21 = vld [vmem:[#allocation8 + $0x7a4] sm:$0xf] }
 0x27a   :  { %v8353_v23 = vld [vmem:[#allocation8 + $0x7b0] sm:$0xf0] }
 0x27b   :  { %4966 = vmatmul.bf16.vlgmr.msra.gmra.mxu2 %v9814_v9 }
 0x27c   :  { %4990 = vmatpush.bf16.msrb.mxu3 %v7908_v50  ;;  %v3210_v56 = vpop.f32.mrf.mxu1  ;;  %5013 = vmatpush.bf16.msrb.mxu2 %v8212_v15  ;;  %v7431_v50 = vld [vmem:[#allocation8 + $0x68] sm:$0xf]  ;;  %v9205_v15 = vld [vmem:[#allocation8 + $0x4f4] sm:$0xf0] }
 0x27d   :  { %5003 = vmatpush.bf16.msrb.mxu1 %v8036_v26  ;;  %v9093_v26 = vld [vmem:[#allocation8 + $0x174] sm:$0xf0]  ;;  %v7432_v57 = vor.u32 %v9061_v51, %v7431_v50  ;;  %v9298_v50 = vld [vmem:[#allocation8 + $0x7e4] sm:$0xf]  ;;  %v8385_v51 = vld [vmem:[#allocation8 + $0x7f0] sm:$0xf0] }
 0x27e   :  { %v7560_v19 = vor.u32 %v9093_v26, %v7559_v53  ;;  %v7991_v53 = vld [vmem:[#allocation8 + $0x4c8] sm:$0xf]  ;;  %v8388_v2 = vor.u32 %v9298_v50, %v8385_v51  ;;  %v7672_v51 = vor.u32 %v9121_v31, %v7671_v40  ;;  %v9265_v40 = vld [vmem:[#allocation8 + $0x6d4] sm:$0xf0] }
 0x280   :  { %4991 = vmatpush.bf16.msrb.mxu3 %v7892_v49  ;;  %5014 = vmatpush.bf16.msrb.mxu2 %v8196_v48  ;;  %v3211_v49 = vadd.f32 %v3210_v56, %v3198_v59  ;;  %v7384_v56 = vor.u32 %v9049_v34, %v7383_v18  ;;  %v9201_v59 = vld [vmem:[#allocation8 + $0x4d4] sm:$0xf0]  ;;  %v8337_v34 = vld [vmem:[#allocation8 + $0x790] sm:$0xf0] }
 0x281   :  { %5004 = vmatpush.bf16.msrb.mxu1 %v8020_v38  ;;  %v7992_v3 = vor.u32 %v9201_v59, %v7991_v53  ;;  %v9125_v18 = vld [vmem:[#allocation8 + $0x274] sm:$0xf0]  ;;  %v7927_v53 = vld [vmem:[#allocation8 + $0x448] sm:$0xf] }
 0x282   :  { %v7655_v59 = vld [vmem:[#allocation8 + $0x228] sm:$0xf] }
 0x283   :  { %4992 = vmatmul.bf16.vlgmr.msrb.gmra.mxu3 %v9831_v47 }
 0x284   :  { %5036 = vmatpush.bf16.msra.mxu3 %v7496_v7  ;;  %5005 = vmatmul.bf16.vlgmr.msrb.gmra.mxu1 %v9834_v1  ;;  %v3249_v63 = vpop.f32.mrf.mxu0  ;;  %v3212_v6 = vpop.f32.mrf.mxu1 }
 0x285   :  { %5049 = vmatpush.bf16.msra.mxu1 %v7624_v14  ;;  %5015 = vmatpush.bf16.msrb.mxu2 %v8180_v29  ;;  %v8164_v14 = vor.u32 %v9242_v54, %v8161_v4  ;;  %v9133_v29 = vld [vmem:[#allocation8 + $0x2b4] sm:$0xf0]  ;;  %v8369_v54 = vld [vmem:[#allocation8 + $0x7d0] sm:$0xf0]  ;;  %v7975_v6 = vld [vmem:[#allocation8 + $0x4a8] sm:$0xf] }
 0x286   :  { %v3223_v38 = vpop.f32.mrf.mxu3  ;;  %v8372_v16 = vor.u32 %v9294_v60, %v8369_v54 }
 0x287   :  { %v3224_v7 = vadd.f32 %v3223_v38, %v3211_v49  ;;  %v9197_v38 = vld [vmem:[#allocation8 + $0x4b4] sm:$0xf0] }
 0x288   :  { %5037 = vmatpush.bf16.msra.mxu3 %v7480_v28  ;;  %v3236_v32 = vpop.f32.mrf.mxu2  ;;  %v7751_v28 = vld [vmem:[#allocation8 + $0x2e8] sm:$0xf]  ;;  %v7976_v22 = vor.u32 %v9197_v38, %v7975_v6  ;;  %v9181_v38 = vld [vmem:[#allocation8 + $0x434] sm:$0xf0] }
 0x289   :  { %5050 = vmatpush.bf16.msra.mxu1 %v7608_v46  ;;  %v3237_v25 = vadd.f32 %v3236_v32, %v3224_v7  ;;  %v9141_v46 = vld [vmem:[#allocation8 + $0x2f4] sm:$0xf0]  ;;  %5016 = vmatpush.bf16.msrb.mxu2 %v8164_v14  ;;  %v7911_v6 = vld [vmem:[#allocation8 + $0x428] sm:$0xf] }
 0x28a   :  { %v9229_v32 = vld [vmem:[#allocation8 + $0x5b4] sm:$0xf0] }
 0x28b   :  { %v3250_v52 = vadd.f32 %v3249_v63, %v3237_v25  ;;  %v8119_v63 = vld [vmem:[#allocation8 + $0x5c8] sm:$0xf]  ;;  %v9129_v14 = vld [vmem:[#allocation8 + $0x294] sm:$0xf0] }
 0x28c   :  { %5038 = vmatpush.bf16.msra.mxu3 %v7464_v36  ;;  %v3251_v27 = vpop.f32.mrf.mxu0  ;;  %v7752_v36 = vor.u32 %v9141_v46, %v7751_v28  ;;  %v3262_v39 = vpop.f32.mrf.mxu1  ;;  %v7959_v25 = vld [vmem:[#allocation8 + $0x488] sm:$0xf]  ;;  %v9225_v46 = vld [vmem:[#allocation8 + $0x594] sm:$0xf0] }
 0x28d   :  { %5051 = vmatpush.bf16.msra.mxu1 %v7592_v30  ;;  %v8007_v30 = vld [vmem:[#allocation8 + $0x4e8] sm:$0xf]  ;;  %v3263_v43 = vadd.f32 %v3262_v39, %v3250_v52  ;;  %5017 = vmatpush.bf16.msrb.mxu2 %v8148_v33  ;;  %v9193_v27 = vld [vmem:[#allocation8 + $0x494] sm:$0xf0]  ;;  %v8356_v52 = vor.u32 %v9290_v21, %v8353_v23  ;;  %v9286_v33 = vld [vmem:[#allocation8 + $0x784] sm:$0xf] }
 0x28e   :  { %v3225_v45 = vpop.f32.mrf.mxu3  ;;  %v8008_v48 = vor.u32 %v9205_v15, %v8007_v30  ;;  %v8087_v28 = vld [vmem:[#allocation8 + $0x588] sm:$0xf]  ;;  %v9189_v30 = vld [vmem:[#allocation8 + $0x474] sm:$0xf0] }
 0x28f   :  { %v3273_v26 = vmax.f32 %v3263_v43, 0.0  ;;  %v8071_v15 = vld [vmem:[#allocation8 + $0x568] sm:$0xf]  ;;  %v9221_v39 = vld [vmem:[#allocation8 + $0x574] sm:$0xf0]  ;;  %v8340_v43 = vor.u32 %v9286_v33, %v8337_v34 }
 0x290   :  { %5039 = vmatpush.bf16.msra.mxu3 %v7448_v8  ;;  %v3238_v8 = vpop.f32.mrf.mxu2  ;;  %5018 = vmatmul.bf16.vlgmr.msrb.gmra.mxu2 %v9859_v0  ;;  %v8072_v50 = vor.u32 %v9221_v39, %v8071_v15  ;;  %v8263_v21 = vld [vmem:[#allocation8 + $0x6e8] sm:$0xf]  ;;  %v9269_v23 = vld [vmem:[#allocation8 + $0x6f4] sm:$0xf0]  ;;  %v7625_v15 = vld [vmem:[#allocation8 + $0x1f8] sm:$0xf0] }
 0x291   :  { %5052 = vmatpush.bf16.msra.mxu1 %v7576_v13  ;;  %v7512_v13 = vor.u32 %v9081_v37, %v7511_v35  ;;  %5062 = vmatpush.bf16.msra.mxu2 %v7752_v36  ;;  %v9868_v61 = vpack.c.bf16 %v3273_v26, %v3273_v26  ;;  %v7943_v35 = vld [vmem:[#allocation8 + $0x468] sm:$0xf]  ;;  %v8088_v37 = vor.u32 %v9225_v46, %v8087_v28  ;;  %v3540_v8 = vperm.slane %v9874_v58, 0  ;;  %v9185_v26 = vld [vmem:[#allocation8 + $0x454] sm:$0xf0] }
 0x292   :  { %v7895_v28 = vld [vmem:[#allocation8 + $0x408] sm:$0xf]  ;;  %v9209_v33 = vld [vmem:[#allocation8 + $0x514] sm:$0xf0]  ;;  %v8264_v34 = vor.u32 %v9269_v23, %v8263_v21 }
 0x293   :  { %4927 = vmatmul.bf16.vlgmr.msrb.gmra.mxu0 %v9868_v61  ;;  %v8247_v39 = vld [vmem:[#allocation8 + $0x6c8] sm:$0xf]  ;;  %v9165_v21 = vld [vmem:[#allocation8 + $0x3b4] sm:$0xf0] }
 0x294   :  { %5040 = vmatpush.bf16.msra.mxu3 %v7432_v57  ;;  %v9233_v57 = vld [vmem:[#allocation8 + $0x5d4] sm:$0xf0]  ;;  %v3264_v7 = vpop.f32.mrf.mxu1  ;;  %5023 = vmatpush.bf16.msrb.mxu0 %v8388_v2  ;;  %v9278_v2 = vld [vmem:[#allocation8 + $0x744] sm:$0xf] }
 0x295   :  { %5053 = vmatpush.bf16.msra.mxu1 %v7560_v19  ;;  %v7719_v19 = vld [vmem:[#allocation8 + $0x2a8] sm:$0xf]  ;;  %5063 = vmatpush.bf16.msra.mxu2 %v7736_v55  ;;  %v8120_v4 = vor.u32 %v9233_v57, %v8119_v63  ;;  %v9217_v55 = vld [vmem:[#allocation8 + $0x554] sm:$0xf0] }
 0x296   :  { %v7720_v49 = vor.u32 %v9133_v29, %v7719_v19  ;;  %v9117_v63 = vld [vmem:[#allocation8 + $0x234] sm:$0xf0]  ;;  %v7928_v29 = vor.u32 %v9185_v26, %v7927_v53 }
 0x297   :  { %v9213_v7 = vld [vmem:[#allocation8 + $0x534] sm:$0xf0] }
 0x298   :  { %5041 = vmatpush.bf16.msra.mxu3 %v7416_v20  ;;  %v8103_v20 = vld [vmem:[#allocation8 + $0x5a8] sm:$0xf]  ;;  %5024 = vmatpush.bf16.msrb.mxu0 %v8372_v16  ;;  %v9173_v53 = vld [vmem:[#allocation8 + $0x3f4] sm:$0xf0] }
 0x299   :  { %5054 = vmatpush.bf16.msra.mxu1 %v7544_v12  ;;  %v7703_v12 = vld [vmem:[#allocation8 + $0x288] sm:$0xf]  ;;  %5064 = vmatpush.bf16.msra.mxu2 %v7720_v49  ;;  %v8104_v24 = vor.u32 %v9229_v32, %v8103_v20  ;;  %v7656_v49 = vor.u32 %v9117_v63, %v7655_v59  ;;  %v7481_v59 = vld [vmem:[#allocation8 + $0xd8] sm:$0xf0]  ;;  %v9103_v63 = vld [vmem:[#allocation8 + $0x1cc] sm:$0xf] }
 0x29a   :  { %v7704_v41 = vor.u32 %v9129_v14, %v7703_v12  ;;  %v8039_v20 = vld [vmem:[#allocation8 + $0x528] sm:$0xf]  ;;  %v9113_v12 = vld [vmem:[#allocation8 + $0x214] sm:$0xf0] }
 0x29b   :  { %v7639_v32 = vld [vmem:[#allocation8 + $0x208] sm:$0xf] }
 0x29c   :  { %5042 = vmatpush.bf16.msra.mxu3 %v7400_v62  ;;  %v7687_v62 = vld [vmem:[#allocation8 + $0x268] sm:$0xf]  ;;  %5025 = vmatpush.bf16.msrb.mxu0 %v8356_v52  ;;  %v9177_v52 = vld [vmem:[#allocation8 + $0x414] sm:$0xf0] }
 0x29d   :  { %5055 = vmatpush.bf16.msra.mxu1 %v7528_v10  ;;  %v7960_v10 = vor.u32 %v9193_v27, %v7959_v25  ;;  %5065 = vmatpush.bf16.msra.mxu2 %v7704_v41  ;;  %v7688_v36 = vor.u32 %v9125_v18, %v7687_v62  ;;  %v7912_v41 = vor.u32 %v9181_v38, %v7911_v6  ;;  %v9274_v25 = vld [vmem:[#allocation8 + $0x724] sm:$0xf]  ;;  %v8289_v27 = vld [vmem:[#allocation8 + $0x730] sm:$0xf0]  ;;  %v7465_v6 = vld [vmem:[#allocation8 + $0xb8] sm:$0xf0] }
 0x29e   :  { %v8040_v62 = vor.u32 %v9213_v7, %v8039_v20  ;;  %v7640_v18 = vor.u32 %v9113_v12, %v7639_v32  ;;  %v9099_v20 = vld [vmem:[#allocation8 + $0x1ac] sm:$0xf]  ;;  %v7593_v7 = vld [vmem:[#allocation8 + $0x1b8] sm:$0xf0]  ;;  %v8215_v12 = vld [vmem:[#allocation8 + $0x688] sm:$0xf] }
 0x29f   :  { %v7596_v23 = vor.u32 %v9099_v20, %v7593_v7  ;;  %v8151_v20 = vld [vmem:[#allocation8 + $0x608] sm:$0xf]  ;;  %v9241_v7 = vld [vmem:[#allocation8 + $0x614] sm:$0xf0] }
 0x2a0   :  { %5043 = vmatpush.bf16.msra.mxu3 %v7384_v56  ;;  %v7944_v56 = vor.u32 %v9189_v30, %v7943_v35  ;;  %5026 = vmatpush.bf16.msrb.mxu0 %v8340_v43  ;;  %v9075_v35 = vld [vmem:[#allocation8 + $0xec] sm:$0xf]  ;;  %v8292_v30 = vor.u32 %v9274_v25, %v8289_v27  ;;  %v7896_v43 = vor.u32 %v9177_v52, %v7895_v28  ;;  %v7577_v28 = vld [vmem:[#allocation8 + $0x198] sm:$0xf0] }
 0x2a1   :  { %5056 = vmatpush.bf16.msra.mxu1 %v7512_v13  ;;  %v9282_v13 = vld [vmem:[#allocation8 + $0x764] sm:$0xf]  ;;  %5066 = vmatpush.bf16.msra.mxu2 %v7688_v36  ;;  %v9107_v36 = vld [vmem:[#allocation8 + $0x1ec] sm:$0xf] }
 0x2a2   :  { %v7628_v26 = vor.u32 %v9107_v36, %v7625_v15  ;;  %v9095_v27 = vld [vmem:[#allocation8 + $0x18c] sm:$0xf]  ;;  %v7561_v15 = vld [vmem:[#allocation8 + $0x178] sm:$0xf0] }
 0x2a3   :  { %5044 = vmatmul.bf16.vlgmr.msra.gmra.mxu3 %v9810_v5  ;;  %v4850_v44 = vpop.f32.mrf.mxu1  ;;  %4979 = vmatmul.bf16.vlgmr.msra.gmra.mxu0 %v9816_v11 }
 0x2a4   :  { %5088 = vmatpush.bf16.msrb.mxu3 %v8008_v48  ;;  %5057 = vmatmul.bf16.vlgmr.msra.gmra.mxu1 %v9812_v42  ;;  %v9876_v45 = vpop.f32.mrf.mxu0  ;;  %v8321_v48 = vld [vmem:[#allocation8 + $0x770] sm:$0xf0] }
 0x2a5   :  { %5101 = vmatpush.bf16.msrb.mxu1 %v8136_v17  ;;  %v8055_v17 = vld [vmem:[#allocation8 + $0x548] sm:$0xf]  ;;  %v8324_v57 = vor.u32 %v9282_v13, %v8321_v48  ;;  %5067 = vmatpush.bf16.msra.mxu2 %v7672_v51 }
 0x2a6   :  { %v4837_v19 = vpop.f32.mrf.mxu3  ;;  %v7879_v51 = vld [vmem:[#allocation8 + $0x3e8] sm:$0xf] }
 0x2a7   :  { %v4838_v60 = vadd.f32 %v4837_v19, %v3540_v8  ;;  %5027 = vmatpush.bf16.msrb.mxu0 %v8324_v57  ;;  %v8273_v8 = vld [vmem:[#allocation8 + $0x710] sm:$0xf0]  ;;  %v7609_v57 = vld [vmem:[#allocation8 + $0x1d8] sm:$0xf0]  ;;  %v7880_v19 = vor.u32 %v9173_v53, %v7879_v51  ;;  %v9087_v53 = vld [vmem:[#allocation8 + $0x14c] sm:$0xf] }
 0x2a8   :  { %5089 = vmatpush.bf16.msrb.mxu3 %v7992_v3  ;;  %v8305_v3 = vld [vmem:[#allocation8 + $0x750] sm:$0xf0]  ;;  %v4863_v54 = vpop.f32.mrf.mxu2 }
 0x2a9   :  { %5102 = vmatpush.bf16.msrb.mxu1 %v8120_v4  ;;  %v8056_v4 = vor.u32 %v9217_v55, %v8055_v17  ;;  %v4851_v14 = vadd.f32 %v4850_v44, %v4838_v60  ;;  %5068 = vmatpush.bf16.msra.mxu2 %v7656_v49  ;;  %v8248_v17 = vor.u32 %v9265_v40, %v8247_v39  ;;  %v9071_v55 = vld [vmem:[#allocation8 + $0xcc] sm:$0xf]  ;;  %v7863_v60 = vld [vmem:[#allocation8 + $0x3c8] sm:$0xf] }
 0x2aa   :  { %v9067_v49 = vld [vmem:[#allocation8 + $0xac] sm:$0xf]  ;;  %v8183_v40 = vld [vmem:[#allocation8 + $0x648] sm:$0xf] }
 0x2ab   :  { %v4852_v16 = vpop.f32.mrf.mxu1  ;;  %v4864_v46 = vadd.f32 %v4863_v54, %v4851_v14  ;;  %v9169_v54 = vld [vmem:[#allocation8 + $0x3d4] sm:$0xf0] }
 0x2ac   :  { %5090 = vmatpush.bf16.msrb.mxu3 %v7976_v22  ;;  %v8308_v22 = vor.u32 %v9278_v2, %v8305_v3  ;;  %v9261_v2 = vld [vmem:[#allocation8 + $0x6b4] sm:$0xf0]  ;;  %v7484_v3 = vor.u32 %v9071_v55, %v7481_v59  ;;  %v7864_v32 = vor.u32 %v9169_v54, %v7863_v60  ;;  %v7468_v16 = vor.u32 %v9067_v49, %v7465_v6  ;;  %v8167_v59 = vld [vmem:[#allocation8 + $0x628] sm:$0xf]  ;;  %v7401_v60 = vld [vmem:[#allocation8 + $0x38] sm:$0xf0] }
 0x2ad   :  { %5103 = vmatpush.bf16.msrb.mxu1 %v8104_v24  ;;  %v4878_v24 = vpop.f32.mrf.mxu0  ;;  %v9881_v31 = vadd.f32 %v9876_v45, %v4864_v46  ;;  %5069 = vmatpush.bf16.msra.mxu2 %v7640_v18  ;;  %v9257_v14 = vld [vmem:[#allocation8 + $0x694] sm:$0xf0]  ;;  %v9083_v49 = vld [vmem:[#allocation8 + $0x12c] sm:$0xf]  ;;  %v7529_v6 = vld [vmem:[#allocation8 + $0x138] sm:$0xf0] }
 0x2ae   :  { %5028 = vmatpush.bf16.msrb.mxu0 %v8308_v22  ;;  %v4839_v44 = vpop.f32.mrf.mxu3  ;;  %v7847_v22 = vld [vmem:[#allocation8 + $0x3a8] sm:$0xf]  ;;  %v9063_v24 = vld [vmem:[#allocation8 + $0x8c] sm:$0xf]  ;;  %v8216_v25 = vor.u32 %v9257_v14, %v8215_v12  ;;  %v9253_v18 = vld [vmem:[#allocation8 + $0x674] sm:$0xf0] }
 0x2af   :  { %v7848_v46 = vor.u32 %v9165_v21, %v7847_v22  ;;  %v9249_v44 = vld [vmem:[#allocation8 + $0x654] sm:$0xf0]  ;;  %v9139_v22 = vld [vmem:[#allocation8 + $0x2ec] sm:$0xf]  ;;  %v7753_v21 = vld [vmem:[#allocation8 + $0x2f8] sm:$0xf0] }
 0x2b0   :  { %5091 = vmatpush.bf16.msrb.mxu3 %v7960_v10  ;;  %v8023_v10 = vld [vmem:[#allocation8 + $0x508] sm:$0xf]  ;;  %v4865_v13 = vpop.f32.mrf.mxu2  ;;  %5070 = vmatmul.bf16.vlgmr.msra.gmra.mxu2 %v9814_v9  ;;  %v8184_v51 = vor.u32 %v9249_v44, %v8183_v40  ;;  %v9301_v44 = vld [vmem:[#allocation8 + $0x7f4] sm:$0xf0] }
 0x2b1   :  { %5104 = vmatpush.bf16.msrb.mxu1 %v8088_v37  ;;  %v7497_v37 = vld [vmem:[#allocation8 + $0xf8] sm:$0xf0]  ;;  %v8024_v48 = vor.u32 %v9209_v33, %v8023_v10  ;;  %5114 = vmatpush.bf16.msrb.mxu2 %v8264_v34  ;;  %v7831_v10 = vld [vmem:[#allocation8 + $0x388] sm:$0xf]  ;;  %v9161_v33 = vld [vmem:[#allocation8 + $0x394] sm:$0xf0]  ;;  %v7580_v34 = vor.u32 %v9095_v27, %v7577_v28 }
 0x2b2   :  { %5029 = vmatpush.bf16.msrb.mxu0 %v8292_v30  ;;  %v9091_v30 = vld [vmem:[#allocation8 + $0x16c] sm:$0xf]  ;;  %v7832_v39 = vor.u32 %v9161_v33, %v7831_v10  ;;  %v7513_v27 = vld [vmem:[#allocation8 + $0x118] sm:$0xf0]  ;;  %v8391_v40 = vld [vmem:[#allocation8 + $0x7e8] sm:$0xf] }
 0x2b3   :  { %v7564_v13 = vor.u32 %v9091_v30, %v7561_v15  ;;  %v9203_v28 = vld [vmem:[#allocation8 + $0x4ec] sm:$0xf]  ;;  %v8137_v33 = vld [vmem:[#allocation8 + $0x5f8] sm:$0xf0] }
 0x2b4   :  { %5092 = vmatpush.bf16.msrb.mxu3 %v7944_v56  ;;  %v9270_v56 = vld [vmem:[#allocation8 + $0x704] sm:$0xf]  ;;  %v9235_v10 = vld [vmem:[#allocation8 + $0x5ec] sm:$0xf]  ;;  %v7737_v30 = vld [vmem:[#allocation8 + $0x2d8] sm:$0xf0] }
 0x2b5   :  { %5105 = vmatpush.bf16.msrb.mxu1 %v8072_v50  ;;  %v7500_v50 = vor.u32 %v9075_v35, %v7497_v37  ;;  %v8276_v45 = vor.u32 %v9270_v56, %v8273_v8  ;;  %5115 = vmatpush.bf16.msrb.mxu2 %v8248_v17  ;;  %v9059_v35 = vld [vmem:[#allocation8 + $0x6c] sm:$0xf]  ;;  %v7433_v37 = vld [vmem:[#allocation8 + $0x78] sm:$0xf0]  ;;  %v7815_v56 = vld [vmem:[#allocation8 + $0x368] sm:$0xf] }
 0x2b6   :  { %v9157_v8 = vld [vmem:[#allocation8 + $0x374] sm:$0xf0] }
 0x2b7   :  { %5030 = vmatpush.bf16.msrb.mxu0 %v8276_v45  ;;  %v7816_v55 = vor.u32 %v9157_v8, %v7815_v56  ;;  %v9245_v45 = vld [vmem:[#allocation8 + $0x634] sm:$0xf0]  ;;  %v8140_v56 = vor.u32 %v9235_v10, %v8137_v33  ;;  %v9119_v10 = vld [vmem:[#allocation8 + $0x24c] sm:$0xf]  ;;  %v7673_v33 = vld [vmem:[#allocation8 + $0x258] sm:$0xf0] }
 0x2b8   :  { %5093 = vmatpush.bf16.msrb.mxu3 %v7928_v29  ;;  %v8231_v29 = vld [vmem:[#allocation8 + $0x6a8] sm:$0xf] }
 0x2b9   :  { %5106 = vmatpush.bf16.msrb.mxu1 %v8056_v4  ;;  %v7612_v4 = vor.u32 %v9103_v63, %v7609_v57  ;;  %v8232_v38 = vor.u32 %v9261_v2, %v8231_v29  ;;  %v7799_v57 = vld [vmem:[#allocation8 + $0x348] sm:$0xf] }
 0x2ba   :  { %5031 = vmatmul.bf16.vlgmr.msrb.gmra.mxu0 %v9868_v61 }
 0x2bb   :  { %5075 = vmatpush.bf16.msra.mxu0 %v7880_v19  ;;  %5116 = vmatpush.bf16.msrb.mxu2 %v8232_v38  ;;  %v9153_v19 = vld [vmem:[#allocation8 + $0x354] sm:$0xf0] }
 0x2bc   :  { %5094 = vmatpush.bf16.msrb.mxu3 %v7912_v41  ;;  %v7449_v41 = vld [vmem:[#allocation8 + $0x98] sm:$0xf0]  ;;  %v7800_v38 = vor.u32 %v9153_v19, %v7799_v57 }
 0x2bd   :  { %5107 = vmatpush.bf16.msrb.mxu1 %v8040_v62  ;;  %v8199_v62 = vld [vmem:[#allocation8 + $0x668] sm:$0xf]  ;;  %v7452_v52 = vor.u32 %v9063_v24, %v7449_v41  ;;  %v9047_v24 = vld [vmem:[#allocation8 + $0xc] sm:$0xf] }
 0x2be   :  { %v8200_v36 = vor.u32 %v9253_v18, %v8199_v62  ;;  %v9079_v41 = vld [vmem:[#allocation8 + $0x10c] sm:$0xf] }
 0x2bf   :  { %5076 = vmatpush.bf16.msra.mxu0 %v7864_v32  ;;  %5117 = vmatpush.bf16.msrb.mxu2 %v8216_v25  ;;  %v7783_v32 = vld [vmem:[#allocation8 + $0x328] sm:$0xf]  ;;  %v8152_v25 = vor.u32 %v9241_v7, %v8151_v20 }
 0x2c0   :  { %5095 = vmatpush.bf16.msrb.mxu3 %v7896_v43  ;;  %v7436_v43 = vor.u32 %v9059_v35, %v7433_v37  ;;  %v9145_v37 = vld [vmem:[#allocation8 + $0x314] sm:$0xf0] }
 0x2c1   :  { %5108 = vmatpush.bf16.msrb.mxu1 %v8024_v48  ;;  %v9055_v48 = vld [vmem:[#allocation8 + $0x4c] sm:$0xf]  ;;  %v4902_v17 = vpop.f32.mrf.mxu1 }
 0x2c3   :  { %5096 = vmatmul.bf16.vlgmr.msrb.gmra.mxu3 %v9831_v47  ;;  %5077 = vmatpush.bf16.msra.mxu0 %v7848_v46  ;;  %v8009_v46 = vld [vmem:[#allocation8 + $0x4f8] sm:$0xf0] }
 0x2c4   :  { %5140 = vmatpush.bf16.msra.mxu3 %v7500_v50  ;;  %5109 = vmatmul.bf16.vlgmr.msrb.gmra.mxu1 %v9834_v1  ;;  %v7417_v50 = vld [vmem:[#allocation8 + $0x58] sm:$0xf0] }
 0x2c5   :  { %5153 = vmatpush.bf16.msra.mxu1 %v7628_v26  ;;  %5118 = vmatpush.bf16.msrb.mxu2 %v8200_v36  ;;  %v7545_v26 = vld [vmem:[#allocation8 + $0x158] sm:$0xf0]  ;;  %v7420_v63 = vor.u32 %v9055_v48, %v7417_v50  ;;  %v9135_v36 = vld [vmem:[#allocation8 + $0x2cc] sm:$0xf] }
 0x2c6   :  { %v4889_v29 = vpop.f32.mrf.mxu3  ;;  %v7548_v2 = vor.u32 %v9087_v53, %v7545_v26  ;;  %v9199_v48 = vld [vmem:[#allocation8 + $0x4cc] sm:$0xf]  ;;  %v7993_v50 = vld [vmem:[#allocation8 + $0x4d8] sm:$0xf0]  ;;  %v8392_v53 = vor.u32 %v9301_v44, %v8391_v40 }
 0x2c7   :  { %5078 = vmatpush.bf16.msra.mxu0 %v7832_v39  ;;  %v4890_v54 = vadd.f32 %v4889_v29, %v9881_v31  ;;  %v7385_v31 = vld [vmem:[#allocation8 + $0x18] sm:$0xf0]  ;;  %v7516_v39 = vor.u32 %v9079_v41, %v7513_v27  ;;  %v9195_v29 = vld [vmem:[#allocation8 + $0x4ac] sm:$0xf] }
 0x2c8   :  { %5141 = vmatpush.bf16.msra.mxu3 %v7484_v3  ;;  %v9051_v3 = vld [vmem:[#allocation8 + $0x2c] sm:$0xf]  ;;  %v7388_v35 = vor.u32 %v9047_v24, %v7385_v31  ;;  %v8121_v26 = vld [vmem:[#allocation8 + $0x5d8] sm:$0xf0]  ;;  %v8343_v31 = vld [vmem:[#allocation8 + $0x788] sm:$0xf] }
 0x2c9   :  { %5154 = vmatpush.bf16.msra.mxu1 %v7612_v4  ;;  %5119 = vmatpush.bf16.msrb.mxu2 %v8184_v51  ;;  %v8168_v4 = vor.u32 %v9245_v45, %v8167_v59  ;;  %v9888_v12 = vadd.f32 %v4902_v17, %v4890_v54  ;;  %v7404_v14 = vor.u32 %v9051_v3, %v7401_v60  ;;  %v4904_v62 = vpop.f32.mrf.mxu1  ;;  %v9231_v51 = vld [vmem:[#allocation8 + $0x5cc] sm:$0xf]  ;;  %v8375_v59 = vld [vmem:[#allocation8 + $0x7c8] sm:$0xf]  ;;  %v9297_v45 = vld [vmem:[#allocation8 + $0x7d4] sm:$0xf0] }
 0x2ca   :  { %v9131_v17 = vld [vmem:[#allocation8 + $0x2ac] sm:$0xf]  ;;  %v8124_v57 = vor.u32 %v9231_v51, %v8121_v26  ;;  %v8376_v60 = vor.u32 %v9297_v45, %v8375_v59  ;;  %v8105_v54 = vld [vmem:[#allocation8 + $0x5b8] sm:$0xf0]  ;;  %v9281_v51 = vld [vmem:[#allocation8 + $0x754] sm:$0xf0] }
 0x2cb   :  { %5079 = vmatpush.bf16.msra.mxu0 %v7816_v55  ;;  %v7721_v55 = vld [vmem:[#allocation8 + $0x2b8] sm:$0xf0]  ;;  %v9227_v3 = vld [vmem:[#allocation8 + $0x5ac] sm:$0xf] }
 0x2cc   :  { %5142 = vmatpush.bf16.msra.mxu3 %v7468_v16  ;;  %v9149_v16 = vld [vmem:[#allocation8 + $0x334] sm:$0xf0]  ;;  %v7724_v19 = vor.u32 %v9131_v17, %v7721_v55  ;;  %v8108_v7 = vor.u32 %v9227_v3, %v8105_v54  ;;  %v7689_v24 = vld [vmem:[#allocation8 + $0x278] sm:$0xf0]  ;;  %v9219_v62 = vld [vmem:[#allocation8 + $0x56c] sm:$0xf] }
 0x2cd   :  { %5155 = vmatpush.bf16.msra.mxu1 %v7596_v23  ;;  %v7532_v23 = vor.u32 %v9083_v49, %v7529_v6  ;;  %5120 = vmatpush.bf16.msrb.mxu2 %v8168_v4  ;;  %v7784_v18 = vor.u32 %v9149_v16, %v7783_v32  ;;  %v9127_v4 = vld [vmem:[#allocation8 + $0x28c] sm:$0xf]  ;;  %v7705_v49 = vld [vmem:[#allocation8 + $0x298] sm:$0xf0]  ;;  %v8359_v6 = vld [vmem:[#allocation8 + $0x7a8] sm:$0xf] }
 0x2ce   :  { %v4891_v15 = vpop.f32.mrf.mxu3  ;;  %v7708_v32 = vor.u32 %v9127_v4, %v7705_v49  ;;  %v7961_v16 = vld [vmem:[#allocation8 + $0x498] sm:$0xf0]  ;;  %v9183_v40 = vld [vmem:[#allocation8 + $0x44c] sm:$0xf]  ;;  %v8295_v3 = vld [vmem:[#allocation8 + $0x728] sm:$0xf] }
 0x2cf   :  { %5080 = vmatpush.bf16.msra.mxu0 %v7800_v38  ;;  %v9293_v38 = vld [vmem:[#allocation8 + $0x7b4] sm:$0xf0]  ;;  %v7929_v44 = vld [vmem:[#allocation8 + $0x458] sm:$0xf0]  ;;  %v9179_v17 = vld [vmem:[#allocation8 + $0x42c] sm:$0xf] }
 0x2d0   :  { %5143 = vmatpush.bf16.msra.mxu3 %v7452_v52  ;;  %v7756_v52 = vor.u32 %v9139_v22, %v7753_v21  ;;  %v9223_v22 = vld [vmem:[#allocation8 + $0x58c] sm:$0xf]  ;;  %v8089_v21 = vld [vmem:[#allocation8 + $0x598] sm:$0xf0]  ;;  %v7932_v26 = vor.u32 %v9183_v40, %v7929_v44  ;;  %v9277_v54 = vld [vmem:[#allocation8 + $0x734] sm:$0xf0] }
 0x2d1   :  { %5156 = vmatpush.bf16.msra.mxu1 %v7580_v34  ;;  %v7767_v34 = vld [vmem:[#allocation8 + $0x308] sm:$0xf]  ;;  %5121 = vmatpush.bf16.msrb.mxu2 %v8152_v25  ;;  %v8092_v25 = vor.u32 %v9223_v22, %v8089_v21  ;;  %v7913_v45 = vld [vmem:[#allocation8 + $0x438] sm:$0xf0]  ;;  %v9267_v4 = vld [vmem:[#allocation8 + $0x6ec] sm:$0xf] }
 0x2d2   :  { %v7768_v8 = vor.u32 %v9145_v37, %v7767_v34  ;;  %v9285_v37 = vld [vmem:[#allocation8 + $0x774] sm:$0xf0]  ;;  %v8265_v49 = vld [vmem:[#allocation8 + $0x6f8] sm:$0xf0] }
 0x2d3   :  { %5081 = vmatpush.bf16.msra.mxu0 %v7784_v18  ;;  %v8025_v22 = vld [vmem:[#allocation8 + $0x518] sm:$0xf0]  ;;  %v8268_v21 = vor.u32 %v9267_v4, %v8265_v49  ;;  %v8423_v4 = vld [vmem:[#allocation11 + $0x30] sm:$0xf] }
 0x2d4   :  { %5144 = vmatpush.bf16.msra.mxu3 %v7436_v43  ;;  %v8012_v43 = vor.u32 %v9203_v28, %v8009_v46  ;;  %5122 = vmatmul.bf16.vlgmr.msrb.gmra.mxu2 %v9859_v0  ;;  %v9187_v28 = vld [vmem:[#allocation8 + $0x46c] sm:$0xf]  ;;  %v7945_v46 = vld [vmem:[#allocation8 + $0x478] sm:$0xf0] }
 0x2d5   :  { %5157 = vmatpush.bf16.msra.mxu1 %v7564_v13  ;;  %5166 = vmatpush.bf16.msra.mxu2 %v7756_v52  ;;  %v7740_v13 = vor.u32 %v9135_v36, %v7737_v30  ;;  %v8073_v52 = vld [vmem:[#allocation8 + $0x578] sm:$0xf0]  ;;  %v7948_v36 = vor.u32 %v9187_v28, %v7945_v46  ;;  %v3541_v30 = vperm.slane %v9874_v58, 1  ;;  %v9171_v46 = vld [vmem:[#allocation8 + $0x3ec] sm:$0xf] }
 0x2d6   :  { %v8076_v15 = vor.u32 %v9219_v62, %v8073_v52  ;;  %v7881_v62 = vld [vmem:[#allocation8 + $0x3f8] sm:$0xf0] }
 0x2d7   :  { %5082 = vmatpush.bf16.msra.mxu0 %v7768_v8  ;;  %v8057_v8 = vld [vmem:[#allocation8 + $0x558] sm:$0xf0] }
 0x2d8   :  { %5145 = vmatpush.bf16.msra.mxu3 %v7420_v63  ;;  %v7996_v63 = vor.u32 %v9199_v48, %v7993_v50  ;;  %v7657_v48 = vld [vmem:[#allocation8 + $0x238] sm:$0xf0]  ;;  %v8311_v50 = vld [vmem:[#allocation8 + $0x748] sm:$0xf] }
 0x2d9   :  { %5158 = vmatpush.bf16.msra.mxu1 %v7548_v2  ;;  %5167 = vmatpush.bf16.msra.mxu2 %v7740_v13  ;;  %v7977_v2 = vld [vmem:[#allocation8 + $0x4b8] sm:$0xf0]  ;;  %v9115_v13 = vld [vmem:[#allocation8 + $0x22c] sm:$0xf] }
 0x2da   :  { %5083 = vmatmul.bf16.vlgmr.msra.gmra.mxu0 %v9816_v11  ;;  %v7980_v20 = vor.u32 %v9195_v29, %v7977_v2  ;;  %v7660_v59 = vor.u32 %v9115_v13, %v7657_v48  ;;  %v9111_v29 = vld [vmem:[#allocation8 + $0x20c] sm:$0xf]  ;;  %v7641_v2 = vld [vmem:[#allocation8 + $0x218] sm:$0xf0] }
 0x2db   :  { %5127 = vmatpush.bf16.msrb.mxu0 %v8392_v53  ;;  %v9255_v48 = vld [vmem:[#allocation8 + $0x68c] sm:$0xf]  ;;  %v9309_v49 = vld [vmem:[#allocation11 + $0x34] sm:$0xf0] }
 0x2dc   :  { %5146 = vmatpush.bf16.msra.mxu3 %v7404_v14  ;;  %v9191_v14 = vld [vmem:[#allocation8 + $0x48c] sm:$0xf] }
 0x2dd   :  { %5159 = vmatpush.bf16.msra.mxu1 %v7532_v23  ;;  %5168 = vmatpush.bf16.msra.mxu2 %v7724_v19  ;;  %v9123_v23 = vld [vmem:[#allocation8 + $0x26c] sm:$0xf]  ;;  %v7964_v41 = vor.u32 %v9191_v14, %v7961_v16  ;;  %v8312_v19 = vor.u32 %v9281_v51, %v8311_v50  ;;  %v7897_v14 = vld [vmem:[#allocation8 + $0x418] sm:$0xf0] }
 0x2de   :  { %v7692_v27 = vor.u32 %v9123_v23, %v7689_v24  ;;  %v9207_v16 = vld [vmem:[#allocation8 + $0x50c] sm:$0xf]  ;;  %v8279_v23 = vld [vmem:[#allocation8 + $0x708] sm:$0xf]  ;;  %v8455_v24 = vld [vmem:[#allocation11 + $0x70] sm:$0xf] }
 0x2df   :  { %5128 = vmatpush.bf16.msrb.mxu0 %v8376_v60  ;;  %v8217_v50 = vld [vmem:[#allocation8 + $0x698] sm:$0xf0] }
 0x2e0   :  { %5147 = vmatpush.bf16.msra.mxu3 %v7388_v35  ;;  %v8327_v35 = vld [vmem:[#allocation8 + $0x768] sm:$0xf]  ;;  %v9333_v51 = vld [vmem:[#allocation11 + $0xf4] sm:$0xf0] }
 0x2e1   :  { %5160 = vmatpush.bf16.msra.mxu1 %v7516_v39  ;;  %5169 = vmatpush.bf16.msra.mxu2 %v7708_v32  ;;  %v4954_v34 = vpop.f32.mrf.mxu1  ;;  %v7676_v39 = vor.u32 %v9119_v10, %v7673_v33  ;;  %v7644_v32 = vor.u32 %v9111_v29, %v7641_v2  ;;  %v7833_v2 = vld [vmem:[#allocation8 + $0x398] sm:$0xf0] }
 0x2e3   :  { %5148 = vmatmul.bf16.vlgmr.msra.gmra.mxu3 %v9810_v5  ;;  %v8360_v5 = vor.u32 %v9293_v38, %v8359_v6  ;;  %v7916_v38 = vor.u32 %v9179_v17, %v7913_v45  ;;  %v8511_v45 = vld [vmem:[#allocation11 + $0xe0] sm:$0xf] }
 0x2e4   :  { %5192 = vmatpush.bf16.msrb.mxu3 %v8012_v43  ;;  %5161 = vmatmul.bf16.vlgmr.msra.gmra.mxu1 %v9812_v42  ;;  %v9289_v42 = vld [vmem:[#allocation8 + $0x794] sm:$0xf0]  ;;  %v9215_v43 = vld [vmem:[#allocation8 + $0x54c] sm:$0xf] }
 0x2e5   :  { %5205 = vmatpush.bf16.msrb.mxu1 %v8140_v56  ;;  %5129 = vmatpush.bf16.msrb.mxu0 %v8360_v5  ;;  %v8344_v18 = vor.u32 %v9289_v42, %v8343_v31  ;;  %v8328_v56 = vor.u32 %v9285_v37, %v8327_v35  ;;  %v8060_v55 = vor.u32 %v9215_v43, %v8057_v8  ;;  %v9317_v31 = vld [vmem:[#allocation11 + $0x74] sm:$0xf0]  ;;  %v9273_v42 = vld [vmem:[#allocation8 + $0x714] sm:$0xf0]  ;;  %v9315_v35 = vld [vmem:[#allocation11 + $0x64] sm:$0xf0] }
 0x2e6   :  { %5170 = vmatpush.bf16.msra.mxu2 %v7692_v27  ;;  %v4941_v53 = vpop.f32.mrf.mxu3  ;;  %v8296_v5 = vor.u32 %v9277_v54, %v8295_v3  ;;  %v8456_v52 = vor.u32 %v9317_v31, %v8455_v24  ;;  %v8280_v10 = vor.u32 %v9273_v42, %v8279_v23  ;;  %v7884_v37 = vor.u32 %v9171_v46, %v7881_v62  ;;  %v8439_v43 = vld [vmem:[#allocation11 + $0x50] sm:$0xf]  ;;  %v8415_v31 = vld [vmem:[#allocation11 + $0x20] sm:$0xf]  ;;  %v9307_v42 = vld [vmem:[#allocation11 + $0x24] sm:$0xf0] }
 0x2e7   :  { %v4942_v58 = vadd.f32 %v4941_v53, %v3541_v30  ;;  %v8233_v30 = vld [vmem:[#allocation8 + $0x6b8] sm:$0xf0]  ;;  %v8519_v8 = vld [vmem:[#allocation11 + $0xf0] sm:$0xf]  ;;  %v8424_v23 = vor.u32 %v9309_v49, %v8423_v4  ;;  %v9327_v46 = vld [vmem:[#allocation11 + $0xc4] sm:$0xf0] }
 0x2e8   :  { %5193 = vmatpush.bf16.msrb.mxu3 %v7996_v63  ;;  %v9211_v63 = vld [vmem:[#allocation8 + $0x52c] sm:$0xf]  ;;  %v7849_v53 = vld [vmem:[#allocation8 + $0x3b8] sm:$0xf0]  ;;  %v9314_v4 = vld [vmem:[#allocation11 + $0x64] sm:$0xf] }
 0x2e9   :  { %5206 = vmatpush.bf16.msrb.mxu1 %v8124_v57  ;;  %5130 = vmatpush.bf16.msrb.mxu0 %v8344_v18  ;;  %v8041_v57 = vld [vmem:[#allocation8 + $0x538] sm:$0xf0]  ;;  %v4956_v60 = vpop.f32.mrf.mxu1  ;;  %v9895_v6 = vadd.f32 %v4954_v34, %v4942_v58  ;;  %v8028_v18 = vor.u32 %v9207_v16, %v8025_v22  ;;  %v8447_v34 = vld [vmem:[#allocation11 + $0x60] sm:$0xf]  ;;  %v9155_v22 = vld [vmem:[#allocation8 + $0x36c] sm:$0xf] }
 0x2ea   :  { %5171 = vmatpush.bf16.msra.mxu2 %v7676_v39  ;;  %v7865_v39 = vld [vmem:[#allocation8 + $0x3d8] sm:$0xf0]  ;;  %v8448_v40 = vor.u32 %v9315_v35, %v8447_v34  ;;  %v8431_v58 = vld [vmem:[#allocation11 + $0x40] sm:$0xf]  ;;  %v9151_v62 = vld [vmem:[#allocation8 + $0x34c] sm:$0xf] }
 0x2eb   :  { %v8407_v34 = vld [vmem:[#allocation11 + $0x10] sm:$0xf]  ;;  %v8449_v49 = vld [vmem:[#allocation11 + $0x68] sm:$0xf0] }
 0x2ec   :  { %5194 = vmatpush.bf16.msrb.mxu3 %v7980_v20  ;;  %v9175_v20 = vld [vmem:[#allocation8 + $0x40c] sm:$0xf] }
 0x2ed   :  { %5207 = vmatpush.bf16.msrb.mxu1 %v8108_v7  ;;  %5131 = vmatpush.bf16.msrb.mxu0 %v8328_v56  ;;  %v8044_v7 = vor.u32 %v9211_v63, %v8041_v57  ;;  %v7900_v28 = vor.u32 %v9175_v20, %v7897_v14  ;;  %v9313_v56 = vld [vmem:[#allocation11 + $0x54] sm:$0xf0]  ;;  %v9251_v57 = vld [vmem:[#allocation8 + $0x66c] sm:$0xf] }
 0x2ee   :  { %5172 = vmatpush.bf16.msra.mxu2 %v7660_v59  ;;  %v4943_v27 = vpop.f32.mrf.mxu3  ;;  %v8440_v17 = vor.u32 %v9313_v56, %v8439_v43  ;;  %v9311_v59 = vld [vmem:[#allocation11 + $0x44] sm:$0xf0]  ;;  %v9901_v60 = vpop.f32.mrf.mxu2  ;;  %v9329_v14 = vld [vmem:[#allocation11 + $0xd4] sm:$0xf0] }
 0x2ef   :  { %v8432_v3 = vor.u32 %v9311_v59, %v8431_v58  ;;  %v9243_v27 = vld [vmem:[#allocation8 + $0x62c] sm:$0xf]  ;;  %v8457_v58 = vld [vmem:[#allocation11 + $0x78] sm:$0xf0] }
 0x2f0   :  { %5195 = vmatpush.bf16.msrb.mxu3 %v7964_v41  ;;  %v9263_v41 = vld [vmem:[#allocation8 + $0x6cc] sm:$0xf] }
 0x2f1   :  { %5208 = vmatpush.bf16.msrb.mxu1 %v8092_v25  ;;  %5132 = vmatpush.bf16.msrb.mxu0 %v8312_v19  ;;  %v8249_v25 = vld [vmem:[#allocation8 + $0x6d8] sm:$0xf0]  ;;  %v9143_v59 = vld [vmem:[#allocation8 + $0x30c] sm:$0xf] }
 0x2f2   :  { %5173 = vmatpush.bf16.msra.mxu2 %v7644_v32  ;;  %v8252_v33 = vor.u32 %v9263_v41, %v8249_v25  ;;  %v8201_v19 = vld [vmem:[#allocation8 + $0x678] sm:$0xf0]  ;;  %v8495_v41 = vld [vmem:[#allocation11 + $0xc0] sm:$0xf] }
 0x2f3   :  { %v8204_v54 = vor.u32 %v9251_v57, %v8201_v19  ;;  %v8185_v32 = vld [vmem:[#allocation8 + $0x658] sm:$0xf0]  ;;  %v9299_v57 = vld [vmem:[#allocation8 + $0x7ec] sm:$0xf] }
 0x2f4   :  { %5196 = vmatpush.bf16.msrb.mxu3 %v7948_v36  ;;  %v9259_v36 = vld [vmem:[#allocation8 + $0x6ac] sm:$0xf]  ;;  %v8393_v19 = vld [vmem:[#allocation8 + $0x7f8] sm:$0xf0] }
 0x2f5   :  { %5209 = vmatpush.bf16.msrb.mxu1 %v8076_v15  ;;  %5133 = vmatpush.bf16.msrb.mxu0 %v8296_v5  ;;  %v9167_v15 = vld [vmem:[#allocation8 + $0x3cc] sm:$0xf]  ;;  %v8236_v44 = vor.u32 %v9259_v36, %v8233_v30  ;;  %v7817_v5 = vld [vmem:[#allocation8 + $0x378] sm:$0xf0]  ;;  %v8487_v30 = vld [vmem:[#allocation11 + $0xb0] sm:$0xf] }
 0x2f6   :  { %5218 = vmatpush.bf16.msrb.mxu2 %v8268_v21  ;;  %v7868_v13 = vor.u32 %v9167_v15, %v7865_v39  ;;  %v7820_v25 = vor.u32 %v9155_v22, %v7817_v5  ;;  %v4917_v35 = vpop.f32.mrf.mxu2  ;;  %v9305_v36 = vld [vmem:[#allocation11 + $0x14] sm:$0xf0]  ;;  %v8452_v22 = vor.u32 %v9314_v4, %v8449_v49  ;;  %v9312_v5 = vld [vmem:[#allocation11 + $0x54] sm:$0xf]  ;;  %v8409_v49 = vld [vmem:[#allocation11 + $0x18] sm:$0xf0] }
 0x2f7   :  { %5174 = vmatmul.bf16.vlgmr.msra.gmra.mxu2 %v9814_v9  ;;  %v9163_v9 = vld [vmem:[#allocation8 + $0x3ac] sm:$0xf]  ;;  %v9325_v15 = vld [vmem:[#allocation11 + $0xb4] sm:$0xf0] }
 0x2f8   :  { %5197 = vmatpush.bf16.msrb.mxu3 %v7932_v26  ;;  %v8520_v26 = vor.u32 %v9333_v51, %v8519_v8  ;;  %v7852_v63 = vor.u32 %v9163_v9, %v7849_v53  ;;  %v8488_v43 = vor.u32 %v9325_v15, %v8487_v30  ;;  %v9147_v8 = vld [vmem:[#allocation8 + $0x32c] sm:$0xf]  ;;  %v8399_v51 = vld [vmem:[#allocation11] sm:$0xf]  ;;  %v8345_v30 = vld [vmem:[#allocation8 + $0x798] sm:$0xf0] }
 0x2f9   :  { %5210 = vmatpush.bf16.msrb.mxu1 %v8060_v55  ;;  %5134 = vmatpush.bf16.msrb.mxu0 %v8280_v10  ;;  %v8220_v55 = vor.u32 %v9255_v48, %v8217_v50  ;;  %v8408_v48 = vor.u32 %v9305_v36, %v8407_v34  ;;  %v9303_v9 = vld [vmem:[#allocation11 + $0x4] sm:$0xf0]  ;;  %v8479_v53 = vld [vmem:[#allocation11 + $0xa0] sm:$0xf]  ;;  %v8433_v34 = vld [vmem:[#allocation11 + $0x48] sm:$0xf0] }
 0x2fa   :  { %5219 = vmatpush.bf16.msrb.mxu2 %v8252_v33  ;;  %v8416_v33 = vor.u32 %v9307_v42, %v8415_v31  ;;  %v9332_v42 = vld [vmem:[#allocation11 + $0xf4] sm:$0xf]  ;;  %v9287_v36 = vld [vmem:[#allocation8 + $0x78c] sm:$0xf] }
 0x2fc   :  { %5198 = vmatpush.bf16.msrb.mxu3 %v7916_v38  ;;  %5135 = vmatmul.bf16.vlgmr.msrb.gmra.mxu0 %v9868_v61  ;;  %v8503_v38 = vld [vmem:[#allocation11 + $0xd0] sm:$0xf] }
 0x2fd   :  { %5211 = vmatpush.bf16.msrb.mxu1 %v8044_v7  ;;  %5179 = vmatpush.bf16.msra.mxu0 %v7884_v37  ;;  %v9247_v7 = vld [vmem:[#allocation8 + $0x64c] sm:$0xf]  ;;  %v8504_v21 = vor.u32 %v9329_v14, %v8503_v38  ;;  %v9321_v38 = vld [vmem:[#allocation11 + $0x94] sm:$0xf0] }
 0x2fe   :  { %5220 = vmatpush.bf16.msrb.mxu2 %v8236_v44  ;;  %v8188_v24 = vor.u32 %v9247_v7, %v8185_v32  ;;  %v8153_v44 = vld [vmem:[#allocation8 + $0x618] sm:$0xf0]  ;;  %v9295_v32 = vld [vmem:[#allocation8 + $0x7cc] sm:$0xf] }
 0x2ff   :  { %v8377_v14 = vld [vmem:[#allocation8 + $0x7d8] sm:$0xf0] }
 0x300   :  { %5199 = vmatpush.bf16.msrb.mxu3 %v7900_v28  ;;  %v8169_v28 = vld [vmem:[#allocation8 + $0x638] sm:$0xf0] }
 0x301   :  { %5212 = vmatpush.bf16.msrb.mxu1 %v8028_v18  ;;  %5180 = vmatpush.bf16.msra.mxu0 %v7868_v13  ;;  %v9903_v16 = vpop.f32.mrf.mxu1  ;;  %v7801_v18 = vld [vmem:[#allocation8 + $0x358] sm:$0xf0]  ;;  %v8172_v37 = vor.u32 %v9243_v27, %v8169_v28  ;;  %v9291_v27 = vld [vmem:[#allocation8 + $0x7ac] sm:$0xf] }
 0x302   :  { %5221 = vmatpush.bf16.msrb.mxu2 %v8220_v55  ;;  %v7804_v39 = vor.u32 %v9151_v62, %v7801_v18  ;;  %v7785_v13 = vld [vmem:[#allocation8 + $0x338] sm:$0xf0]  ;;  %v9323_v55 = vld [vmem:[#allocation11 + $0xa4] sm:$0xf0]  ;;  %v8513_v62 = vld [vmem:[#allocation11 + $0xe8] sm:$0xf0] }
 0x303   :  { %5200 = vmatmul.bf16.vlgmr.msrb.gmra.mxu3 %v9831_v47  ;;  %v9331_v47 = vld [vmem:[#allocation11 + $0xe4] sm:$0xf0] }
 0x304   :  { %5642 = vmatpush.bf16.msra.mxu3 %v8456_v52  ;;  %5213 = vmatmul.bf16.vlgmr.msrb.gmra.mxu1 %v9834_v1  ;;  %v8512_v29 = vor.u32 %v9331_v47, %v8511_v45  ;;  %v9159_v1 = vld [vmem:[#allocation8 + $0x38c] sm:$0xf]  ;;  %v8496_v52 = vor.u32 %v9327_v46, %v8495_v41  ;;  %v7769_v45 = vld [vmem:[#allocation8 + $0x318] sm:$0xf0]  ;;  %v8480_v47 = vor.u32 %v9323_v55, %v8479_v53  ;;  %v8521_v41 = vld [vmem:[#allocation11 + $0xf8] sm:$0xf0] }
 0x305   :  { %5655 = vmatpush.bf16.msra.mxu1 %v8520_v26  ;;  %5181 = vmatpush.bf16.msra.mxu0 %v7852_v63  ;;  %v7836_v20 = vor.u32 %v9159_v1, %v7833_v2  ;;  %v7788_v26 = vor.u32 %v9147_v8, %v7785_v13  ;;  %v9907_v1 = vpop.f32.mrf.mxu2  ;;  %v8524_v28 = vor.u32 %v9332_v42, %v8521_v41  ;;  %v8361_v46 = vld [vmem:[#allocation8 + $0x7b8] sm:$0xf0]  ;;  %v8401_v41 = vld [vmem:[#allocation11 + $0x8] sm:$0xf0] }
 0x306   :  { %5222 = vmatpush.bf16.msrb.mxu2 %v8204_v54  ;;  %v9905_v10 = vpop.f32.mrf.mxu3  ;;  %v7772_v54 = vor.u32 %v9143_v59, %v7769_v45  ;;  %v8364_v35 = vor.u32 %v9291_v27, %v8361_v46  ;;  %v8348_v8 = vor.u32 %v9287_v36, %v8345_v30  ;;  %v9326_v59 = vld [vmem:[#allocation11 + $0xc4] sm:$0xf]  ;;  %v8497_v45 = vld [vmem:[#allocation11 + $0xc8] sm:$0xf0]  ;;  %v9271_v46 = vld [vmem:[#allocation8 + $0x70c] sm:$0xf] }
 0x307   :  { %v8481_v27 = vld [vmem:[#allocation11 + $0xa8] sm:$0xf0] }
 0x308   :  { %5643 = vmatpush.bf16.msra.mxu3 %v8448_v40  ;;  %v9239_v40 = vld [vmem:[#allocation8 + $0x60c] sm:$0xf] }
 0x309   :  { %5656 = vmatpush.bf16.msra.mxu1 %v8512_v29  ;;  %5182 = vmatpush.bf16.msra.mxu0 %v7836_v20  ;;  %v5008_v56 = vpop.f32.mrf.mxu1  ;;  %v8156_v50 = vor.u32 %v9239_v40, %v8153_v44  ;;  %v8400_v29 = vor.u32 %v9303_v9, %v8399_v51  ;;  %v8396_v20 = vor.u32 %v9299_v57, %v8393_v19  ;;  %v8425_v44 = vld [vmem:[#allocation11 + $0x38] sm:$0xf0]  ;;  %v9283_v51 = vld [vmem:[#allocation8 + $0x76c] sm:$0xf]  ;;  %v8329_v9 = vld [vmem:[#allocation8 + $0x778] sm:$0xf0] }
 0x30a   :  { %5223 = vmatpush.bf16.msrb.mxu2 %v8188_v24  ;;  %v8441_v24 = vld [vmem:[#allocation11 + $0x58] sm:$0xf0]  ;;  %v4916_v40 = vadd.f32 %v9901_v60, %v9888_v12  ;;  %v9279_v19 = vld [vmem:[#allocation8 + $0x74c] sm:$0xf] }
 0x30b   :  { %v9915_v12 = vld [vmem:[#allocation10] sm:$0xf] }
 0x30c   :  { %5644 = vmatpush.bf16.msra.mxu3 %v8440_v17  ;;  %v9316_v17 = vld [vmem:[#allocation11 + $0x74] sm:$0xf]  ;;  %v3542_v60 = vperm.slane %v9915_v12, 2 }
 0x30d   :  { %5657 = vmatpush.bf16.msra.mxu1 %v8504_v21  ;;  %5183 = vmatpush.bf16.msra.mxu0 %v7820_v25  ;;  %v8460_v2 = vor.u32 %v9316_v17, %v8457_v58  ;;  %v8463_v21 = vld [vmem:[#allocation11 + $0x80] sm:$0xf]  ;;  %v8380_v25 = vor.u32 %v9295_v32, %v8377_v14  ;;  %v4969_v18 = vpop.f32.mrf.mxu2  ;;  %v8417_v17 = vld [vmem:[#allocation11 + $0x28] sm:$0xf0] }
 0x30e   :  { %5224 = vmatpush.bf16.msrb.mxu2 %v8172_v37  ;;  %v4995_v63 = vpop.f32.mrf.mxu3  ;;  %v9349_v18 = vld [vmem:[#allocation11 + $0x174] sm:$0xf0] }
 0x30f   :  { %v8500_v63 = vor.u32 %v9326_v59, %v8497_v45 }
 0x310   :  { %5645 = vmatpush.bf16.msra.mxu3 %v8432_v3  ;;  %v8471_v3 = vld [vmem:[#allocation11 + $0x90] sm:$0xf]  ;;  %v4928_v56 = vpop.f32.mrf.mxu0 }
 0x311   :  { %5658 = vmatpush.bf16.msra.mxu1 %v8496_v52  ;;  %5184 = vmatpush.bf16.msra.mxu0 %v7804_v39  ;;  %v8472_v7 = vor.u32 %v9321_v38, %v8471_v3  ;;  %v8444_v52 = vor.u32 %v9312_v5, %v8441_v24  ;;  %v9308_v39 = vld [vmem:[#allocation11 + $0x34] sm:$0xf]  ;;  %v9275_v5 = vld [vmem:[#allocation8 + $0x72c] sm:$0xf] }
 0x312   :  { %5225 = vmatpush.bf16.msrb.mxu2 %v8156_v50  ;;  %v8428_v53 = vor.u32 %v9308_v39, %v8425_v44  ;;  %v9324_v38 = vld [vmem:[#allocation11 + $0xb4] sm:$0xf]  ;;  %v9318_v44 = vld [vmem:[#allocation11 + $0x84] sm:$0xf] }
 0x314   :  { %5646 = vmatpush.bf16.msra.mxu3 %v8424_v23  ;;  %v9319_v23 = vld [vmem:[#allocation11 + $0x84] sm:$0xf0] }
 0x315   :  { %5659 = vmatpush.bf16.msra.mxu1 %v8488_v43  ;;  %5185 = vmatpush.bf16.msra.mxu0 %v7788_v26  ;;  %v8464_v31 = vor.u32 %v9319_v23, %v8463_v21  ;;  %v8505_v43 = vld [vmem:[#allocation11 + $0xd8] sm:$0xf0]  ;;  %v9306_v26 = vld [vmem:[#allocation11 + $0x24] sm:$0xf]  ;;  %v9913_v55 = vpop.f32.mrf.mxu2  ;;  %v8297_v21 = vld [vmem:[#allocation8 + $0x738] sm:$0xf0] }
 0x316   :  { %5226 = vmatmul.bf16.vlgmr.msrb.gmra.mxu2 %v9859_v0  ;;  %v9330_v0 = vld [vmem:[#allocation11 + $0xe4] sm:$0xf]  ;;  %v8420_v3 = vor.u32 %v9306_v26, %v8417_v17 }
 0x317   :  { %v8516_v37 = vor.u32 %v9330_v0, %v8513_v62  ;;  %v8583_v62 = vld [vmem:[#allocation11 + $0x170] sm:$0xf] }
 0x318   :  { %5647 = vmatpush.bf16.msra.mxu3 %v8416_v33  ;;  %v9310_v33 = vld [vmem:[#allocation11 + $0x44] sm:$0xf] }
 0x319   :  { %5660 = vmatpush.bf16.msra.mxu1 %v8480_v47  ;;  %5186 = vmatpush.bf16.msra.mxu0 %v7772_v54  ;;  %v8436_v15 = vor.u32 %v9310_v33, %v8433_v34  ;;  %v8332_v47 = vor.u32 %v9283_v51, %v8329_v9  ;;  %v9304_v54 = vld [vmem:[#allocation11 + $0x14] sm:$0xf]  ;;  %v8473_v34 = vld [vmem:[#allocation11 + $0x98] sm:$0xf0]  ;;  %v9345_v9 = vld [vmem:[#allocation11 + $0x154] sm:$0xf0] }
 0x31a   :  { %v8412_v24 = vor.u32 %v9304_v54, %v8409_v49  ;;  %v9320_v33 = vld [vmem:[#allocation11 + $0x94] sm:$0xf] }
 0x31b   :  { %v8476_v39 = vor.u32 %v9320_v33, %v8473_v34 }
 0x31c   :  { %5648 = vmatpush.bf16.msra.mxu3 %v8408_v48  ;;  %5187 = vmatmul.bf16.vlgmr.msra.gmra.mxu0 %v9816_v11  ;;  %v9328_v11 = vld [vmem:[#allocation11 + $0xd4] sm:$0xf]  ;;  %v4929_v48 = vadd.f32 %v4928_v56, %v4916_v40  ;;  %v4968_v40 = vadd.f32 %v9907_v1, %v9895_v6  ;;  %v8567_v1 = vld [vmem:[#allocation11 + $0x150] sm:$0xf] }
 0x31d   :  { %5661 = vmatpush.bf16.msra.mxu1 %v8472_v7  ;;  %5231 = vmatpush.bf16.msrb.mxu0 %v8396_v20  ;;  %v8508_v13 = vor.u32 %v9328_v11, %v8505_v43  ;;  %v8489_v20 = vld [vmem:[#allocation11 + $0xb8] sm:$0xf0]  ;;  %v4930_v7 = vpop.f32.mrf.mxu0  ;;  %v5021_v42 = vpop.f32.mrf.mxu2  ;;  %v8465_v11 = vld [vmem:[#allocation11 + $0x88] sm:$0xf0] }
 0x31e   :  { %v5244_v58 = vmax.f32 %v4929_v48, 0.0  ;;  %v8492_v14 = vor.u32 %v9324_v38, %v8489_v20  ;;  %v8468_v56 = vor.u32 %v9318_v44, %v8465_v11  ;;  %v9347_v48 = vld [vmem:[#allocation11 + $0x164] sm:$0xf0]  ;;  %v8535_v38 = vld [vmem:[#allocation11 + $0x110] sm:$0xf] }
 0x31f   :  { %v9337_v20 = vld [vmem:[#allocation11 + $0x114] sm:$0xf0]  ;;  %v9346_v42 = vld [vmem:[#allocation11 + $0x164] sm:$0xf] }
 0x320   :  { %5649 = vmatpush.bf16.msra.mxu3 %v8400_v29  ;;  %v5248_v57 = vpack.c.bf16 %v5244_v58, %v5244_v58  ;;  %v8313_v29 = vld [vmem:[#allocation8 + $0x758] sm:$0xf0]  ;;  %v9343_v58 = vld [vmem:[#allocation11 + $0x144] sm:$0xf0]  ;;  %v8536_v7 = vor.u32 %v9337_v20, %v8535_v38  ;;  %v9338_v11 = vld [vmem:[#allocation11 + $0x124] sm:$0xf] }
 0x321   :  { %5662 = vmatpush.bf16.msra.mxu1 %v8464_v31  ;;  %5232 = vmatpush.bf16.msrb.mxu0 %v8380_v25  ;;  %v5058_v50 = vpop.f32.mrf.mxu1  ;;  %v8316_v32 = vor.u32 %v9279_v19, %v8313_v29  ;;  %v9302_v31 = vld [vmem:[#allocation11 + $0x4] sm:$0xf]  ;;  %v8615_v20 = vld [vmem:[#allocation11 + $0x1b0] sm:$0xf] }
 0x322   :  { %v9322_v25 = vld [vmem:[#allocation11 + $0xa4] sm:$0xf]  ;;  %v8404_v36 = vor.u32 %v9302_v31, %v8401_v41  ;;  %v8577_v41 = vld [vmem:[#allocation11 + $0x168] sm:$0xf0] }
 0x323   :  { %5650 = vmatmul.bf16.vlgmr.msra.gmra.mxu3 %v5248_v57  ;;  %v8484_v0 = vor.u32 %v9322_v25, %v8481_v27  ;;  %v8580_v25 = vor.u32 %v9346_v42, %v8577_v41  ;;  %v9344_v27 = vld [vmem:[#allocation11 + $0x154] sm:$0xf]  ;;  %v9353_v42 = vld [vmem:[#allocation11 + $0x194] sm:$0xf0] }
 0x324   :  { %5694 = vmatpush.bf16.msrb.mxu3 %v8460_v2 }
 0x325   :  { %5707 = vmatpush.bf16.msrb.mxu1 %v8524_v28  ;;  %5233 = vmatpush.bf16.msrb.mxu0 %v8364_v35  ;;  %v8300_v28 = vor.u32 %v9275_v5, %v8297_v21  ;;  %v8584_v35 = vor.u32 %v9349_v18, %v8583_v62  ;;  %v4980_v30 = vpop.f32.mrf.mxu0  ;;  %v9348_v5 = vld [vmem:[#allocation11 + $0x174] sm:$0xf]  ;;  %v8585_v21 = vld [vmem:[#allocation11 + $0x178] sm:$0xf0]  ;;  %v9342_v62 = vld [vmem:[#allocation11 + $0x144] sm:$0xf] }
 0x326   :  { %v5045_v2 = vpop.f32.mrf.mxu3  ;;  %v4981_v43 = vadd.f32 %v4980_v30, %v4968_v40  ;;  %v8588_v31 = vor.u32 %v9348_v5, %v8585_v21  ;;  %v8561_v18 = vld [vmem:[#allocation11 + $0x148] sm:$0xf0]  ;;  %v9355_v5 = vld [vmem:[#allocation11 + $0x1a4] sm:$0xf0] }
 0x327   :  { %v5046_v4 = vadd.f32 %v5045_v2, %v3542_v60  ;;  %5668 = vmatpush.bf16.msra.mxu2 %v8584_v35  ;;  %v8564_v33 = vor.u32 %v9342_v62, %v8561_v18  ;;  %v3543_v35 = vperm.slane %v9915_v12, 3  ;;  %v8647_v12 = vld [vmem:[#allocation11 + $0x1f0] sm:$0xf]  ;;  %v9364_v18 = vld [vmem:[#allocation11 + $0x1f4] sm:$0xf] }
 0x328   :  { %5695 = vmatpush.bf16.msrb.mxu3 %v8452_v22 }
 0x329   :  { %5708 = vmatpush.bf16.msrb.mxu1 %v8516_v37  ;;  %5234 = vmatpush.bf16.msrb.mxu0 %v8348_v8  ;;  %v5060_v22 = vpop.f32.mrf.mxu1  ;;  %v9918_v23 = vadd.f32 %v5058_v50, %v5046_v4  ;;  %v4994_v8 = vadd.f32 %v9905_v10, %v4981_v43  ;;  %v8559_v10 = vld [vmem:[#allocation11 + $0x140] sm:$0xf]  ;;  %v8545_v43 = vld [vmem:[#allocation11 + $0x128] sm:$0xf0] }
 0x32a   :  { %v8560_v59 = vor.u32 %v9343_v58, %v8559_v10  ;;  %v9335_v22 = vld [vmem:[#allocation11 + $0x104] sm:$0xf0] }
 0x32b   :  { %v5007_v6 = vadd.f32 %v9903_v16, %v4994_v8  ;;  %v8551_v16 = vld [vmem:[#allocation11 + $0x130] sm:$0xf]  ;;  %v8548_v8 = vor.u32 %v9338_v11, %v8545_v43 }
 0x32c   :  { %5696 = vmatpush.bf16.msrb.mxu3 %v8444_v52  ;;  %v8281_v52 = vld [vmem:[#allocation8 + $0x718] sm:$0xf0] }
 0x32d   :  { %5709 = vmatpush.bf16.msrb.mxu1 %v8508_v13  ;;  %5235 = vmatpush.bf16.msrb.mxu0 %v8332_v47  ;;  %v8575_v13 = vld [vmem:[#allocation11 + $0x160] sm:$0xf]  ;;  %v4982_v50 = vpop.f32.mrf.mxu0  ;;  %v5020_v17 = vadd.f32 %v9913_v55, %v5007_v6  ;;  %v9339_v55 = vld [vmem:[#allocation11 + $0x124] sm:$0xf0]  ;;  %v9365_v6 = vld [vmem:[#allocation11 + $0x1f4] sm:$0xf0] }
 0x32e   :  { %v5047_v37 = vpop.f32.mrf.mxu3  ;;  %v8576_v51 = vor.u32 %v9347_v48, %v8575_v13  ;;  %v9336_v48 = vld [vmem:[#allocation11 + $0x114] sm:$0xf]  ;;  %v8537_v50 = vld [vmem:[#allocation11 + $0x118] sm:$0xf0] }
 0x32f   :  { %v9340_v37 = vld [vmem:[#allocation11 + $0x134] sm:$0xf] }
 0x330   :  { %5697 = vmatpush.bf16.msrb.mxu3 %v8436_v15  ;;  %v8284_v15 = vor.u32 %v9271_v46, %v8281_v52  ;;  %5669 = vmatpush.bf16.msra.mxu2 %v8576_v51  ;;  %v8540_v51 = vor.u32 %v9336_v48, %v8537_v50  ;;  %v9354_v50 = vld [vmem:[#allocation11 + $0x1a4] sm:$0xf] }
 0x331   :  { %5710 = vmatpush.bf16.msrb.mxu1 %v8500_v63  ;;  %5236 = vmatpush.bf16.msrb.mxu0 %v8316_v32 }
 0x333   :  { %v9928_v60 = vpop.f32.mrf.mxu2 }
 0x334   :  { %5698 = vmatpush.bf16.msrb.mxu3 %v8428_v53  ;;  %v8568_v53 = vor.u32 %v9345_v9, %v8567_v1  ;;  %v9334_v1 = vld [vmem:[#allocation11 + $0x104] sm:$0xf]  ;;  %v8529_v9 = vld [vmem:[#allocation11 + $0x108] sm:$0xf0]  ;;  %v5072_v10 = vadd.f32 %v9928_v60, %v9918_v23  ;;  %v8623_v23 = vld [vmem:[#allocation11 + $0x1c0] sm:$0xf] }
 0x335   :  { %5711 = vmatpush.bf16.msrb.mxu1 %v8492_v14  ;;  %5237 = vmatpush.bf16.msrb.mxu0 %v8300_v28  ;;  %v8527_v14 = vld [vmem:[#allocation11 + $0x100] sm:$0xf]  ;;  %v8569_v28 = vld [vmem:[#allocation11 + $0x158] sm:$0xf0]  ;;  %v8532_v58 = vor.u32 %v9334_v1, %v8529_v9  ;;  %v9359_v60 = vld [vmem:[#allocation11 + $0x1c4] sm:$0xf0] }
 0x336   :  { %5670 = vmatpush.bf16.msra.mxu2 %v8568_v53  ;;  %v8572_v46 = vor.u32 %v9344_v27, %v8569_v28  ;;  %v8648_v53 = vor.u32 %v9365_v6, %v8647_v12  ;;  %v9352_v9 = vld [vmem:[#allocation11 + $0x194] sm:$0xf] }
 0x338   :  { %5699 = vmatpush.bf16.msrb.mxu3 %v8420_v3  ;;  %v8543_v3 = vld [vmem:[#allocation11 + $0x120] sm:$0xf] }
 0x339   :  { %5712 = vmatpush.bf16.msrb.mxu1 %v8484_v0  ;;  %5238 = vmatpush.bf16.msrb.mxu0 %v8284_v15  ;;  %v8544_v49 = vor.u32 %v9339_v55, %v8543_v3 }
 0x33a   :  { %5671 = vmatpush.bf16.msra.mxu2 %v8560_v59 }
 0x33b   :  { %v5073_v4 = vpop.f32.mrf.mxu2 }
 0x33c   :  { %5700 = vmatpush.bf16.msrb.mxu3 %v8412_v24  ;;  %5239 = vmatmul.bf16.vlgmr.msrb.gmra.mxu0 %v9868_v61  ;;  %v5032_v61 = vpop.f32.mrf.mxu0  ;;  %v8528_v24 = vor.u32 %v9335_v22, %v8527_v14  ;;  %v8624_v4 = vor.u32 %v9359_v60, %v8623_v23  ;;  %v8607_v22 = vld [vmem:[#allocation11 + $0x1a0] sm:$0xf] }
 0x33d   :  { %5713 = vmatpush.bf16.msrb.mxu1 %v8476_v39  ;;  %v5033_v45 = vadd.f32 %v5032_v61, %v5020_v17  ;;  %5681 = vmatpush.bf16.msra.mxu0 %v8648_v53  ;;  %v8601_v53 = vld [vmem:[#allocation11 + $0x198] sm:$0xf0] }
 0x33f   :  { %v5245_v47 = vmax.f32 %v5033_v45, 0.0  ;;  %v8639_v45 = vld [vmem:[#allocation11 + $0x1e0] sm:$0xf] }
 0x340   :  { %5701 = vmatpush.bf16.msrb.mxu3 %v8404_v36  ;;  %v8553_v36 = vld [vmem:[#allocation11 + $0x138] sm:$0xf0] }
 0x341   :  { %5714 = vmatpush.bf16.msrb.mxu1 %v8468_v56  ;;  %v9925_v26 = vpop.f32.mrf.mxu1  ;;  %v5249_v29 = vpack.c.bf16 %v5245_v47, %v5245_v47  ;;  %v8556_v15 = vor.u32 %v9340_v37, %v8553_v36  ;;  %v9363_v47 = vld [vmem:[#allocation11 + $0x1e4] sm:$0xf0]  ;;  %v9360_v36 = vld [vmem:[#allocation11 + $0x1d4] sm:$0xf] }
 0x343   :  { %5702 = vmatmul.bf16.vlgmr.msrb.gmra.mxu3 %v5248_v57  ;;  %v9341_v57 = vld [vmem:[#allocation11 + $0x134] sm:$0xf0]  ;;  %5663 = vmatmul.bf16.vlgmr.msra.gmra.mxu1 %v5249_v29 }
 0x344   :  { %v8552_v19 = vor.u32 %v9341_v57, %v8551_v16  ;;  %v5034_v54 = vpop.f32.mrf.mxu0  ;;  %v8640_v16 = vor.u32 %v9363_v47, %v8639_v45 }
 0x346   :  { %v9930_v63 = vpop.f32.mrf.mxu3  ;;  %5672 = vmatpush.bf16.msra.mxu2 %v8552_v19  ;;  %5682 = vmatpush.bf16.msra.mxu0 %v8640_v16  ;;  %v8631_v19 = vld [vmem:[#allocation11 + $0x1d0] sm:$0xf] }
 0x349   :  { %v5112_v2 = vpop.f32.mrf.mxu1 }
 0x34a   :  { %5673 = vmatpush.bf16.msra.mxu2 %v8544_v49 }
 0x34e   :  { %v5099_v32 = vpop.f32.mrf.mxu3  ;;  %5674 = vmatpush.bf16.msra.mxu2 %v8536_v7  ;;  %v9357_v7 = vld [vmem:[#allocation11 + $0x1b4] sm:$0xf0] }
 0x34f   :  { %v8616_v14 = vor.u32 %v9357_v7, %v8615_v20 }
 0x352   :  { %5675 = vmatpush.bf16.msra.mxu2 %v8528_v24  ;;  %v8608_v24 = vor.u32 %v9355_v5, %v8607_v22 }
 0x353   :  { %5715 = vmatmul.bf16.vlgmr.msrb.gmra.mxu1 %v5249_v29  ;;  %v9361_v29 = vld [vmem:[#allocation11 + $0x1d4] sm:$0xf0] }
 0x354   :  { %v8632_v2 = vor.u32 %v9361_v29, %v8631_v19 }
 0x356   :  { %5720 = vmatpush.bf16.msrb.mxu2 %v8588_v31  ;;  %5683 = vmatpush.bf16.msra.mxu0 %v8632_v2  ;;  %v8599_v31 = vld [vmem:[#allocation11 + $0x190] sm:$0xf] }
 0x357   :  { %v5084_v52 = vpop.f32.mrf.mxu0  ;;  %v5123_v34 = vpop.f32.mrf.mxu2  ;;  %v8600_v27 = vor.u32 %v9353_v42, %v8599_v31 }
 0x358   :  { %v5085_v61 = vadd.f32 %v5084_v52, %v5072_v10  ;;  %v8649_v52 = vld [vmem:[#allocation11 + $0x1f8] sm:$0xf0] }
 0x35a   :  { %5721 = vmatpush.bf16.msrb.mxu2 %v8580_v25  ;;  %v5098_v59 = vadd.f32 %v9930_v63, %v5085_v61  ;;  %5684 = vmatpush.bf16.msra.mxu0 %v8624_v4  ;;  %v8593_v61 = vld [vmem:[#allocation11 + $0x188] sm:$0xf0]  ;;  %v5316_v4 = vld [vmem:[#allocation13] sm:$0x3] }
 0x35c   :  { %v5111_v57 = vadd.f32 %v9925_v26, %v5098_v59 }
 0x35e   :  { %5722 = vmatpush.bf16.msrb.mxu2 %v8572_v46  ;;  %v5124_v3 = vadd.f32 %v5123_v34, %v5111_v57  ;;  %5685 = vmatpush.bf16.msra.mxu0 %v8616_v14  ;;  %v8591_v46 = vld [vmem:[#allocation11 + $0x180] sm:$0xf]  ;;  %v9362_v34 = vld [vmem:[#allocation11 + $0x1e4] sm:$0xf] }
 0x35f   :  { %v5086_v56 = vpop.f32.mrf.mxu0  ;;  %v5125_v13 = vpop.f32.mrf.mxu2 }
 0x360   :  { %v8617_v13 = vld [vmem:[#allocation11 + $0x1b8] sm:$0xf0] }
 0x361   :  { %v5162_v0 = vpop.f32.mrf.mxu1 }
 0x362   :  { %5723 = vmatpush.bf16.msrb.mxu2 %v8564_v33  ;;  %5686 = vmatpush.bf16.msra.mxu0 %v8608_v24  ;;  %v8652_v33 = vor.u32 %v9364_v18, %v8649_v52 }
 0x366   :  { %v5149_v30 = vpop.f32.mrf.mxu3  ;;  %5724 = vmatpush.bf16.msrb.mxu2 %v8556_v15  ;;  %5687 = vmatpush.bf16.msra.mxu0 %v8600_v27  ;;  %v5748_v27 = vld [vmem:[#allocation14] sm:$0x3] }
 0x367   :  { %v5150_v39 = vadd.f32 %v5149_v30, %v3543_v35  ;;  %v8641_v35 = vld [vmem:[#allocation11 + $0x1e8] sm:$0xf0]  ;;  %v8633_v30 = vld [vmem:[#allocation11 + $0x1d8] sm:$0xf0] }
 0x368   :  { %v8644_v37 = vor.u32 %v9362_v34, %v8641_v35  ;;  %v8636_v15 = vor.u32 %v9360_v36, %v8633_v30 }
 0x369   :  { %v5164_v40 = vpop.f32.mrf.mxu1  ;;  %v9933_v44 = vadd.f32 %v5162_v0, %v5150_v39  ;;  %v9351_v0 = vld [vmem:[#allocation11 + $0x184] sm:$0xf0]  ;;  %v9358_v39 = vld [vmem:[#allocation11 + $0x1c4] sm:$0xf] }
 0x36a   :  { %5725 = vmatpush.bf16.msrb.mxu2 %v8548_v8  ;;  %v8592_v62 = vor.u32 %v9351_v0, %v8591_v46  ;;  %v8625_v40 = vld [vmem:[#allocation11 + $0x1c8] sm:$0xf0]  ;;  %v9356_v8 = vld [vmem:[#allocation11 + $0x1b4] sm:$0xf]  ;;  %v5749_v46 = vunpack.c.l.bf16 %v5748_v27 }
 0x36b   :  { %v8628_v43 = vor.u32 %v9358_v39, %v8625_v40  ;;  %v8620_v48 = vor.u32 %v9356_v8, %v8617_v13 }
 0x36c   :  { %5688 = vmatpush.bf16.msra.mxu0 %v8592_v62  ;;  %v5751_v62 = vperm.slane %v5749_v46, 0  ;;  %v5752_v18 = vperm.slane %v5749_v46, 2 }
 0x36e   :  { %v5151_v17 = vpop.f32.mrf.mxu3  ;;  %5726 = vmatpush.bf16.msrb.mxu2 %v8540_v51  ;;  %v8609_v51 = vld [vmem:[#allocation11 + $0x1a8] sm:$0xf0]  ;;  %v5756_v36 = vperm.slane %v5752_v18, 0 }
 0x36f   :  { %v8612_v12 = vor.u32 %v9354_v50, %v8609_v51  ;;  %v8604_v17 = vor.u32 %v9352_v9, %v8601_v53 }
 0x370   :  { %5733 = vmatpush.bf16.msrb.mxu0 %v8652_v33 }
 0x372   :  { %5727 = vmatpush.bf16.msrb.mxu2 %v8532_v58  ;;  %v9350_v58 = vld [vmem:[#allocation11 + $0x184] sm:$0xf] }
 0x373   :  { %v8596_v59 = vor.u32 %v9350_v58, %v8593_v61 }
 0x374   :  { %5734 = vmatpush.bf16.msrb.mxu0 %v8644_v37  ;;  %v5755_v37 = vperm.slane %v5751_v62, 0 }
 0x378   :  { %5735 = vmatpush.bf16.msrb.mxu0 %v8636_v15 }
 0x379   :  { %v5136_v54 = vpop.f32.mrf.mxu0 }
 0x37a   :  { %v5137_v49 = vadd.f32 %v5136_v54, %v5124_v3  ;;  %v5175_v38 = vpop.f32.mrf.mxu2 }
 0x37b   :  { %v5176_v10 = vadd.f32 %v5175_v38, %v9933_v44 }
 0x37c   :  { %v5246_v63 = vmax.f32 %v5137_v49, 0.0  ;;  %5736 = vmatpush.bf16.msrb.mxu0 %v8628_v43  ;;  %v5318_v49 = vperm.slane %v5316_v4, 0  ;;  %v9380_v43 = vld [vmem:[#allocation2] ss:$0 sm:$0xff] }
 0x37e   :  { %v5250_v26 = vpack.c.bf16 %v5246_v63, %v5246_v63 }
 0x380   :  { %5676 = vmatmul.bf16.vlgmr.msra.gmra.mxu2 %v5250_v26  ;;  %5737 = vmatpush.bf16.msrb.mxu0 %v8620_v48 }
 0x381   :  { %v9939_v55 = vpop.f32.mrf.mxu1  ;;  %v5138_v41 = vpop.f32.mrf.mxu0 }
 0x382   :  { %v5177_v25 = vpop.f32.mrf.mxu2 }
 0x384   :  { %5738 = vmatpush.bf16.msrb.mxu0 %v8612_v12 }
 0x386   :  { %v5201_v32 = vpop.f32.mrf.mxu3 }
 0x388   :  { %5739 = vmatpush.bf16.msrb.mxu0 %v8604_v17 }
 0x389   :  { %v5216_v21 = vpop.f32.mrf.mxu1 }
 0x38c   :  { %5740 = vmatpush.bf16.msrb.mxu0 %v8596_v59 }
 0x38e   :  { %v5203_v28 = vpop.f32.mrf.mxu3 }
 0x390   :  { %5728 = vmatmul.bf16.vlgmr.msrb.gmra.mxu2 %v5250_v26 }
 0x399   :  { %v5188_v11 = vpop.f32.mrf.mxu0  ;;  %v5227_v56 = vpop.f32.mrf.mxu2 }
 0x39a   :  { %v5189_v45 = vadd.f32 %v5188_v11, %v5176_v10 }
 0x39c   :  { %v5202_v16 = vadd.f32 %v5201_v32, %v5189_v45  ;;  %v5319_v32 = vperm.slane %v5316_v4, 1 }
 0x39e   :  { %v5215_v57 = vadd.f32 %v9939_v55, %v5202_v16 }
 0x3a0   :  { %v5228_v29 = vadd.f32 %v5227_v56, %v5215_v57 }
 0x3a1   :  { %v5190_v6 = vpop.f32.mrf.mxu0  ;;  %v5229_v1 = vpop.f32.mrf.mxu2 }
 0x3a6   :  { %v5651_v47 = vpop.f32.mrf.mxu3 }
 0x3a7   :  { %v5652_v63 = vadd.f32 %v5651_v47, %v5318_v49 }
 0x3ae   :  { %v5653_v19 = vpop.f32.mrf.mxu3 }
 0x3b9   :  { %v5240_v2 = vpop.f32.mrf.mxu0 }
 0x3ba   :  { %v5241_v3 = vadd.f32 %v5240_v2, %v5228_v29 }
 0x3bc   :  { %v5247_v23 = vmax.f32 %v5241_v3, 0.0 }
 0x3be   :  { %v5251_v60 = vpack.c.bf16 %v5247_v23, %v5247_v23 }
 0x3c0   :  { %5689 = vmatmul.bf16.vlgmr.msra.gmra.mxu0 %v5251_v60  ;;  %v5664_v20 = vpop.f32.mrf.mxu1 }
 0x3c1   :  { %v5242_v44 = vpop.f32.mrf.mxu0  ;;  %v5665_v7 = vadd.f32 %v5664_v20, %v5652_v63 }
 0x3c6   :  { %v5703_v54 = vpop.f32.mrf.mxu3 }
 0x3c7   :  { %v5704_v26 = vadd.f32 %v5703_v54, %v5319_v32 }
 0x3c8   :  { %v5666_v14 = vpop.f32.mrf.mxu1 }
 0x3ce   :  { %v5705_v38 = vpop.f32.mrf.mxu3 }
 0x3d0   :  { %5741 = vmatmul.bf16.vlgmr.msrb.gmra.mxu0 %v5251_v60  ;;  %v5716_v55 = vpop.f32.mrf.mxu1 }
 0x3d1   :  { %v5717_v22 = vadd.f32 %v5716_v55, %v5704_v26 }
 0x3d8   :  { %v5718_v5 = vpop.f32.mrf.mxu1 }
 0x403   :  { %v5677_v21 = vpop.f32.mrf.mxu2 }
 0x404   :  { %v5678_v24 = vadd.f32 %v5677_v21, %v5665_v7 }
 0x40b   :  { %v5679_v31 = vpop.f32.mrf.mxu2 }
 0x413   :  { %v5729_v42 = vpop.f32.mrf.mxu2 }
 0x414   :  { %v5730_v52 = vadd.f32 %v5729_v42, %v5717_v22 }
 0x41b   :  { %v5731_v41 = vpop.f32.mrf.mxu2 }
 0x43d   :  { %v5690_v25 = vpop.f32.mrf.mxu0 }
 0x43e   :  { %v5691_v0 = vadd.f32 %v5690_v25, %v5678_v24 }
 0x440   :  { %v5746_v34 = vmax.f32 %v5691_v0, 0.0 }
 0x442   :  { %v5757_v15 = vmul.f32 %v5755_v37, %v5746_v34 }
 0x445   :  { %v5692_v28 = vpop.f32.mrf.mxu0 }
 0x44d   :  { %v5742_v33 = vpop.f32.mrf.mxu0 }
 0x44e   :  { %v5743_v35 = vadd.f32 %v5742_v33, %v5730_v52 }
 0x450   :  { %v5747_v30 = vmax.f32 %v5743_v35, 0.0 }
 0x452   :  { %v5758_v39 = vmul.f32 %v5756_v36, %v5747_v30 }
 0x454   :  { %v5759_v40 = vadd.f32 %v5758_v39, %v5757_v15 }
 0x455   :  { %v5744_v11 = vpop.f32.mrf.mxu0 }
 0x456   :  { %5760 = vadd.xlane.f32.xlu0 %v5759_v40 }
 0x4c9   :  { %v5761_v56 = vpop.xlane.xlu0 %5760 }
 0x4ca   :  { %v5766_v8 = vadd.f32 %v9380_v43, %v5761_v56 }
 0x4cc   :  { %v8653_v13 = vmul.f32 -1.442695, %v5766_v8 }
 0x4ce   :  { %9381 = vpow2.f32 %v8653_v13 }
 0x4d4   :  { %v9382_v48 = vpop.eup %9381 }
 0x4d5   :  { %v5770_v50 = vadd.f32 1.0, %v9382_v48 }
 0x4d7   :  { %9383 = vrcp.f32 %v5770_v50  ;;  %v5782_v1 = vand.u32 2147483648, %v5770_v50  ;;  %v5780_v53 = vand.u32 2147483647, %v5770_v50  ;;  %vm5776_vm2 = vweird.f32 %v5770_v50 }
 0x4d9   :  { %v5783_v10 = vor.u32 1.1754944e-38, %v5782_v1  ;;  %vm5781_vm5 = vcmp.eq.f32.partialorder %v5780_v53, 8.507059e+37 }
 0x4dd   :  { %v9384_v51 = vpop.eup %9383 }
 0x4de   :  { %v5772_v12 = vmul.f32 %v9384_v51, %v5770_v50  ;;  %vm5777_vm1 = vweird.f32 %v9384_v51 }
 0x4df   :  { %vm5778_vm3 = vmor %vm5776_vm2, %vm5777_vm1 }
 0x4e0   :  { %v5773_v6 = vsub.f32 1.0, %v5772_v12 }
 0x4e2   :  { %v5774_v9 = vmul.f32 %v9384_v51, %v5773_v6 }
 0x4e4   :  { %v5775_v17 = vadd.f32 %v9384_v51, %v5774_v9 }
 0x4e6   :  { %v5779_v58 = vsel %vm5778_vm3, %v9384_v51, %v5775_v17 }
 0x4e7   :  { %v5784_v61 = vsel %vm5781_vm5, %v5783_v10, %v5779_v58 }
 0x4e8   :  { %5787 = vst.msk [vmem:[%s9955_s9] sm:$0xff] %vm5786_vm4, %v5784_v61 }
 0x4e9   :  { %5792 = vsyncpa [#allocation4], 1 }
 0x4ea   :  { %5793 = vsyncpa [#allocation6], 1 }
 0x4eb   :  { %5794 = vsyncpa [#allocation9], 1 }
 0x4ec   :  { %5795 = vsyncpa [#allocation12], 1 }
 0x4ed   :  { %5796 = vsyncpa [#allocation15], 1 }

</bundles_post_ra>
